<compile_context>
chip_gen: v7x
topology: tpu7x:2x2x1
jax: 0.10.0
libtpu: 0.0.40
codegen_flags: <defaults>
</compile_context>

<pallas_src>
import functools
import math

import jax
import jax.numpy as jnp
from jax.experimental import pallas as pl
from jax.experimental.pallas import tpu as pltpu

F32 = jnp.float32
BF16 = jnp.bfloat16


# ----------------------------------------------------------------------------
# Pallas kernel
# ----------------------------------------------------------------------------
def _block_attn_kernel(x_ref, w_ref, b_ref, o_ref, k_scr):
    """x_ref: (Gb, T, D); w_ref: (D, D+2); b_ref: (1, D+2); o_ref: (Gb, T, D);
    k_scr: (Gb, 1, T) VMEM scratch holding the lane-oriented per-group k row-sums.

    Fused weight columns: [0:D] -> V projection, [D] -> scaled Q row-sum, [D+1] -> K row-sum.
    """
    Gb, T, D = x_ref.shape
    x2 = x_ref[...].reshape(Gb * T, D)               # merge leading dims (layout-preserving)

    # One batched MXU matmul for every (group, time) row of the block.  Kept in f32: the
    # q/k sum columns feed exp(), so bf16 here would cost ~1e-2-level score error.
    f = jnp.dot(x2, w_ref[...], preferred_element_type=F32) + b_ref[...]    # (Gb*T, D+2)

    q3 = f[:, D:D + 1].reshape(Gb, T, 1)             # scaled q row-sums (native column layout)
    v3 = f[:, :D].reshape(Gb, T, D)                  # V values

    # Only the ksum column needs a lane-oriented copy (transposed q row is never used).
    k_row = jnp.transpose(f[:, D + 1:D + 2])         # (1, Gb*T): one small 2-D transpose
    for g in range(Gb):                              # tiny (1,T) stores -> bounded live ranges
        k_scr[g] = k_row[:, g * T:(g + 1) * T]
    k3 = k_scr[...]                                  # (Gb, 1, T)

    # Exact factored row-max:  max_s q_t*k_s = q_t * (max_s k_s if q_t >= 0 else min_s k_s).
    kmax = jnp.max(k3, axis=-1, keepdims=True)       # (Gb, 1, 1)
    kmin = jnp.min(k3, axis=-1, keepdims=True)       # (Gb, 1, 1)
    sel = jnp.where(q3 >= 0, kmax, kmin)             # (Gb, T, 1)

    # Batched softmax across all groups.  Exponent = q_t*k_s - row_max = q_t*(k_s - sel_t)
    # <= 0 always, so exp never overflows.  Rank-1 scores -> pure VPU broadcast work.
    e = jnp.exp(q3 * (k3 - sel))                     # (Gb, T, T)
    denom = jnp.sum(e, axis=-1, keepdims=True)       # (Gb, T, 1)
    p = e * pl.reciprocal(denom, approx=True)        # EUP slot, not VALU

    # Batched PV matmul on the MXU, bf16 operands, f32 accumulation.
    out = jnp.einsum("gts,gsd->gtd", p.astype(BF16), v3.astype(BF16),
                     preferred_element_type=F32)     # (Gb, T, D)
    # TODO(synk): if a bundle dump shows masked-store pressure (D=16 < 128 lanes), emit the
    # block output lane-dense (transposed) and transpose back in the wrapper.
    o_ref[...] = out.astype(o_ref.dtype)


# ----------------------------------------------------------------------------
# Wrapper
# ----------------------------------------------------------------------------
def _num_tensorcores() -> int:
    """Trace-time TensorCore count: 2 on v7x, 1 on v5e/v6e.  On single-TC chips the grid is
    a sequential loop, so extra 'parallel' steps are pure per-step overhead."""
    try:
        info = pltpu.get_tpu_info()
        for attr in ("num_cores", "tensorcores_per_chip", "core_count",
                     "num_tensorcores", "cores_per_chip"):
            v = getattr(info, attr, None)
            if isinstance(v, int) and 0 < v <= 16:
                return v
    except Exception:
        pass
    try:
        kind = jax.devices()[0].device_kind.lower()
        if "v7" in kind or "7x" in kind:
            return 2
    except Exception:
        pass
    return 1


@functools.partial(jax.jit, static_argnames=("num_cores",))
def _block_self_attention_impl(x, params, *, num_cores):
    B, C, T, D = x.shape
    G = B * C
    scale = 1.0 / math.sqrt(D)

    # Fold the Q/K row-sums (and, exactly, the 1/sqrt(D) scale) into single weight columns:
    #   sum_i (x @ Wq + bq)_i = x @ (Wq @ 1) + sum(bq)
    wq_col = jnp.sum(params["wq"], axis=1, keepdims=True) * scale            # (D, 1)
    wk_col = jnp.sum(params["wk"], axis=1, keepdims=True)                    # (D, 1)
    bq_sum = (jnp.sum(params["bq"]) * scale).reshape(1, 1)
    bk_sum = jnp.sum(params["bk"]).reshape(1, 1)
    w_fused = jnp.concatenate([params["wv"], wq_col, wk_col], axis=1)        # (D, D+2)
    b_fused = jnp.concatenate([params["bv"], bq_sum, bk_sum], axis=1)        # (1, D+2)

    # Generation-aware grid: one block per TensorCore (split=2 on v7x, 1 on v5e/v6e).
    n_tc = max(1, min(int(num_cores), 2))
    split = n_tc if (n_tc > 1 and G % n_tc == 0) else 1
    Gb = G // split
    xg = x.reshape(G, T, D)

    out = pl.pallas_call(
        _block_attn_kernel,
        out_shape=jax.ShapeDtypeStruct((G, T, D), F32),
        grid=(split,),
        in_specs=[
            pl.BlockSpec((Gb, T, D), lambda i: (i, 0, 0)),
            pl.BlockSpec((D, D + 2), lambda i: (0, 0)),
            pl.BlockSpec((1, D + 2), lambda i: (0, 0)),
        ],
        out_specs=pl.BlockSpec((Gb, T, D), lambda i: (i, 0, 0)),
        scratch_shapes=[pltpu.VMEM((Gb, 1, T), F32)],
        compiler_params=pltpu.CompilerParams(dimension_semantics=("parallel",)),
    )(xg, w_fused, b_fused)
    return out.reshape(B, C, T, D)


def block_self_attention(x, params):
    """x: (B, C, T, D) float32.  params: wq/wk/wv stored (in, out), bq/bk/bv (1, D)."""
    return _block_self_attention_impl(x, params, num_cores=_num_tensorcores())


# ----------------------------------------------------------------------------
# Pure-JAX reference (mirrors the PyTorch module) + synthetic parameters
# ----------------------------------------------------------------------------
def block_self_attention_ref(x, p):
    q = x @ p["wq"] + p["bq"]
    k = x @ p["wk"] + p["bk"]
    v = x @ p["wv"] + p["bv"]
    d = x.shape[-1]
    s = jnp.einsum('bcti,bcsj->bcts', q, k) / math.sqrt(d)
    w = jax.nn.softmax(s, axis=-1)
    return jnp.einsum('bcts,bcsj->bctj', w, v)


def _linear_params(key, d_in, d_out):
    k1, k2 = jax.random.split(key)
    bound = 1.0 / math.sqrt(d_in)
    w = jax.random.uniform(k1, (d_in, d_out), F32, -bound, bound)   # stored (in, out)
    b = jax.random.uniform(k2, (1, d_out), F32, -bound, bound)
    return w, b


def init_attn_params(key, d):
    ks = jax.random.split(key, 3)
    wq, bq = _linear_params(ks[0], d, d)
    wk, bk = _linear_params(ks[1], d, d)
    wv, bv = _linear_params(ks[2], d, d)
    return dict(wq=wq, wk=wk, wv=wv, bq=bq, bk=bk, bv=bv)


if __name__ == "__main__":
    # Shapes consistent with TimeMixer's use of BlockSelfAttention:
    # batch=2, c = m+1 = 4 wavelet-coefficient channels, t = 96 time steps, k_dim = 16.
    B, C, T, K_DIM = 2, 4, 96, 16
    key = jax.random.PRNGKey(0)
    kx, kp = jax.random.split(key)
    x = jax.random.normal(kx, (B, C, T, K_DIM), F32)
    params = init_attn_params(kp, K_DIM)

    out = jax.block_until_ready(block_self_attention(x, params))
    ref = block_self_attention_ref(x, params)

    assert out.shape == x.shape
    assert bool(jnp.all(jnp.isfinite(out)))
    # approx reciprocal (EUP) + bf16 PV matmul -> allow a small numeric tolerance
    err = float(jnp.max(jnp.abs(out - ref)))
    assert err < 5e-2, f"max abs error vs reference: {err}"
    print("KERNEL_OK")
</pallas_src>

<mosaic_0001>
module attributes {stable_mosaic.version = 11 : i64} {
  func.func @_block_attn_kernel(%arg0: i32, %arg1: memref<8x96x16xf32, #tpu.memory_space<vmem>>, %arg2: memref<16x18xf32, #tpu.memory_space<vmem>>, %arg3: memref<1x18xf32, #tpu.memory_space<vmem>>, %arg4: memref<8x96x16xf32, #tpu.memory_space<vmem>>, %arg5: memref<8x1x96xf32, #tpu.memory_space<vmem>>) attributes {dimension_semantics = [#tpu.dimension_semantics<parallel>], iteration_bounds = array<i64: 1>, scalar_prefetch = 0 : i64, scratch_operands = 1 : i64, tpu.core_type = #tpu.core_type<tc>, window_params = [{transform_indices = @transform_0, window_bounds = array<i64: 8, 96, 16>}, {pipeline_mode = #tpu.pipeline_mode<synchronous>, transform_indices = @transform_1, window_bounds = array<i64: 16, 18>}, {pipeline_mode = #tpu.pipeline_mode<synchronous>, transform_indices = @transform_2, window_bounds = array<i64: 1, 18>}, {transform_indices = @transform_3, window_bounds = array<i64: 8, 96, 16>}]} {
    %c0 = arith.constant 0 : index
    %c0_0 = arith.constant 0 : index
    %c0_1 = arith.constant 0 : index
    %0 = vector.load %arg1[%c0, %c0_0, %c0_1] : memref<8x96x16xf32, #tpu.memory_space<vmem>>, vector<8x96x16xf32>
    %1 = vector.shape_cast %0 : vector<8x96x16xf32> to vector<768x16xf32>
    %c0_2 = arith.constant 0 : index
    %c0_3 = arith.constant 0 : index
    %2 = vector.load %arg2[%c0_2, %c0_3] : memref<16x18xf32, #tpu.memory_space<vmem>>, vector<16x18xf32>
    %cst = arith.constant dense<0.000000e+00> : vector<768x18xf32>
    %3 = tpu.matmul %1, %2, %cst {dimension_numbers = #tpu.dot_dimension_numbers<[1], [0], [0], [1], [0, 0, 1, 1], [], []>} : vector<768x16xf32>, vector<16x18xf32>, vector<768x18xf32> -> vector<768x18xf32>
    %c0_4 = arith.constant 0 : index
    %c0_5 = arith.constant 0 : index
    %4 = vector.load %arg3[%c0_4, %c0_5] : memref<1x18xf32, #tpu.memory_space<vmem>>, vector<1x18xf32>
    %5 = vector.broadcast %4 : vector<1x18xf32> to vector<768x18xf32>
    %6 = arith.addf %3, %5 : vector<768x18xf32>
    %7 = vector.extract_strided_slice %6 {offsets = [0, 16], sizes = [768, 1], strides = [1, 1]} : vector<768x18xf32> to vector<768x1xf32>
    %8 = vector.shape_cast %7 : vector<768x1xf32> to vector<8x96x1xf32>
    %9 = vector.extract_strided_slice %6 {offsets = [0, 0], sizes = [768, 16], strides = [1, 1]} : vector<768x18xf32> to vector<768x16xf32>
    %10 = vector.shape_cast %9 : vector<768x16xf32> to vector<8x96x16xf32>
    %11 = vector.extract_strided_slice %6 {offsets = [0, 17], sizes = [768, 1], strides = [1, 1]} : vector<768x18xf32> to vector<768x1xf32>
    %12 = tpu.transpose %11, [1, 0] : vector<768x1xf32> -> vector<1x768xf32>
    %13 = vector.extract_strided_slice %12 {offsets = [0, 0], sizes = [1, 96], strides = [1, 1]} : vector<1x768xf32> to vector<1x96xf32>
    %c0_6 = arith.constant 0 : index
    %c0_7 = arith.constant 0 : index
    %c0_8 = arith.constant 0 : index
    %14 = vector.load %arg5[%c0_6, %c0_7, %c0_8] : memref<8x1x96xf32, #tpu.memory_space<vmem>>, vector<1x1x96xf32>
    %15 = vector.shape_cast %14 : vector<1x1x96xf32> to vector<1x96xf32>
    %16 = vector.shape_cast %13 : vector<1x96xf32> to vector<1x1x96xf32>
    tpu.vector_store %arg5[%c0_6, %c0_7, %c0_8], %16 {strides = array<i32>} : memref<8x1x96xf32, #tpu.memory_space<vmem>>, vector<1x1x96xf32>,
    %17 = vector.extract_strided_slice %12 {offsets = [0, 96], sizes = [1, 96], strides = [1, 1]} : vector<1x768xf32> to vector<1x96xf32>
    %c1 = arith.constant 1 : index
    %c0_9 = arith.constant 0 : index
    %c0_10 = arith.constant 0 : index
    %18 = vector.load %arg5[%c1, %c0_9, %c0_10] : memref<8x1x96xf32, #tpu.memory_space<vmem>>, vector<1x1x96xf32>
    %19 = vector.shape_cast %18 : vector<1x1x96xf32> to vector<1x96xf32>
    %20 = vector.shape_cast %17 : vector<1x96xf32> to vector<1x1x96xf32>
    tpu.vector_store %arg5[%c1, %c0_9, %c0_10], %20 {strides = array<i32>} : memref<8x1x96xf32, #tpu.memory_space<vmem>>, vector<1x1x96xf32>,
    %21 = vector.extract_strided_slice %12 {offsets = [0, 192], sizes = [1, 96], strides = [1, 1]} : vector<1x768xf32> to vector<1x96xf32>
    %c2 = arith.constant 2 : index
    %c0_11 = arith.constant 0 : index
    %c0_12 = arith.constant 0 : index
    %22 = vector.load %arg5[%c2, %c0_11, %c0_12] : memref<8x1x96xf32, #tpu.memory_space<vmem>>, vector<1x1x96xf32>
    %23 = vector.shape_cast %22 : vector<1x1x96xf32> to vector<1x96xf32>
    %24 = vector.shape_cast %21 : vector<1x96xf32> to vector<1x1x96xf32>
    tpu.vector_store %arg5[%c2, %c0_11, %c0_12], %24 {strides = array<i32>} : memref<8x1x96xf32, #tpu.memory_space<vmem>>, vector<1x1x96xf32>,
    %25 = vector.extract_strided_slice %12 {offsets = [0, 288], sizes = [1, 96], strides = [1, 1]} : vector<1x768xf32> to vector<1x96xf32>
    %c3 = arith.constant 3 : index
    %c0_13 = arith.constant 0 : index
    %c0_14 = arith.constant 0 : index
    %26 = vector.load %arg5[%c3, %c0_13, %c0_14] : memref<8x1x96xf32, #tpu.memory_space<vmem>>, vector<1x1x96xf32>
    %27 = vector.shape_cast %26 : vector<1x1x96xf32> to vector<1x96xf32>
    %28 = vector.shape_cast %25 : vector<1x96xf32> to vector<1x1x96xf32>
    tpu.vector_store %arg5[%c3, %c0_13, %c0_14], %28 {strides = array<i32>} : memref<8x1x96xf32, #tpu.memory_space<vmem>>, vector<1x1x96xf32>,
    %29 = vector.extract_strided_slice %12 {offsets = [0, 384], sizes = [1, 96], strides = [1, 1]} : vector<1x768xf32> to vector<1x96xf32>
    %c4 = arith.constant 4 : index
    %c0_15 = arith.constant 0 : index
    %c0_16 = arith.constant 0 : index
    %30 = vector.load %arg5[%c4, %c0_15, %c0_16] : memref<8x1x96xf32, #tpu.memory_space<vmem>>, vector<1x1x96xf32>
    %31 = vector.shape_cast %30 : vector<1x1x96xf32> to vector<1x96xf32>
    %32 = vector.shape_cast %29 : vector<1x96xf32> to vector<1x1x96xf32>
    tpu.vector_store %arg5[%c4, %c0_15, %c0_16], %32 {strides = array<i32>} : memref<8x1x96xf32, #tpu.memory_space<vmem>>, vector<1x1x96xf32>,
    %33 = vector.extract_strided_slice %12 {offsets = [0, 480], sizes = [1, 96], strides = [1, 1]} : vector<1x768xf32> to vector<1x96xf32>
    %c5 = arith.constant 5 : index
    %c0_17 = arith.constant 0 : index
    %c0_18 = arith.constant 0 : index
    %34 = vector.load %arg5[%c5, %c0_17, %c0_18] : memref<8x1x96xf32, #tpu.memory_space<vmem>>, vector<1x1x96xf32>
    %35 = vector.shape_cast %34 : vector<1x1x96xf32> to vector<1x96xf32>
    %36 = vector.shape_cast %33 : vector<1x96xf32> to vector<1x1x96xf32>
    tpu.vector_store %arg5[%c5, %c0_17, %c0_18], %36 {strides = array<i32>} : memref<8x1x96xf32, #tpu.memory_space<vmem>>, vector<1x1x96xf32>,
    %37 = vector.extract_strided_slice %12 {offsets = [0, 576], sizes = [1, 96], strides = [1, 1]} : vector<1x768xf32> to vector<1x96xf32>
    %c6 = arith.constant 6 : index
    %c0_19 = arith.constant 0 : index
    %c0_20 = arith.constant 0 : index
    %38 = vector.load %arg5[%c6, %c0_19, %c0_20] : memref<8x1x96xf32, #tpu.memory_space<vmem>>, vector<1x1x96xf32>
    %39 = vector.shape_cast %38 : vector<1x1x96xf32> to vector<1x96xf32>
    %40 = vector.shape_cast %37 : vector<1x96xf32> to vector<1x1x96xf32>
    tpu.vector_store %arg5[%c6, %c0_19, %c0_20], %40 {strides = array<i32>} : memref<8x1x96xf32, #tpu.memory_space<vmem>>, vector<1x1x96xf32>,
    %41 = vector.extract_strided_slice %12 {offsets = [0, 672], sizes = [1, 96], strides = [1, 1]} : vector<1x768xf32> to vector<1x96xf32>
    %c7 = arith.constant 7 : index
    %c0_21 = arith.constant 0 : index
    %c0_22 = arith.constant 0 : index
    %42 = vector.load %arg5[%c7, %c0_21, %c0_22] : memref<8x1x96xf32, #tpu.memory_space<vmem>>, vector<1x1x96xf32>
    %43 = vector.shape_cast %42 : vector<1x1x96xf32> to vector<1x96xf32>
    %44 = vector.shape_cast %41 : vector<1x96xf32> to vector<1x1x96xf32>
    tpu.vector_store %arg5[%c7, %c0_21, %c0_22], %44 {strides = array<i32>} : memref<8x1x96xf32, #tpu.memory_space<vmem>>, vector<1x1x96xf32>,
    %c0_23 = arith.constant 0 : index
    %c0_24 = arith.constant 0 : index
    %c0_25 = arith.constant 0 : index
    %45 = vector.load %arg5[%c0_23, %c0_24, %c0_25] : memref<8x1x96xf32, #tpu.memory_space<vmem>>, vector<8x1x96xf32>
    %cst_26 = arith.constant dense<0xFF800000> : vector<8x1xf32>
    %46 = vector.multi_reduction <maximumf>, %45, %cst_26 [2] : vector<8x1x96xf32> to vector<8x1xf32>
    %47 = vector.shape_cast %46 : vector<8x1xf32> to vector<8x1x1xf32>
    %cst_27 = arith.constant dense<0x7F800000> : vector<8x1xf32>
    %48 = vector.multi_reduction <minimumf>, %45, %cst_27 [2] : vector<8x1x96xf32> to vector<8x1xf32>
    %49 = vector.shape_cast %48 : vector<8x1xf32> to vector<8x1x1xf32>
    %cst_28 = arith.constant 0.000000e+00 : f32
    %50 = vector.broadcast %cst_28 : f32 to vector<8x96x1xf32>
    %51 = arith.cmpf oge, %8, %50 : vector<8x96x1xf32>
    %52 = vector.shape_cast %47 : vector<8x1x1xf32> to vector<8x1x1xf32>
    %53 = vector.broadcast %52 : vector<8x1x1xf32> to vector<8x96x1xf32>
    %54 = vector.shape_cast %49 : vector<8x1x1xf32> to vector<8x1x1xf32>
    %55 = vector.broadcast %54 : vector<8x1x1xf32> to vector<8x96x1xf32>
    %56 = arith.select %51, %53, %55 : vector<8x96x1xi1>, vector<8x96x1xf32>
    %57 = vector.broadcast %45 : vector<8x1x96xf32> to vector<8x96x96xf32>
    %58 = vector.broadcast %56 : vector<8x96x1xf32> to vector<8x96x96xf32>
    %59 = arith.subf %57, %58 : vector<8x96x96xf32>
    %60 = vector.broadcast %8 : vector<8x96x1xf32> to vector<8x96x96xf32>
    %61 = arith.mulf %60, %59 : vector<8x96x96xf32>
    %62 = math.exp %61 : vector<8x96x96xf32>
    %cst_29 = arith.constant dense<0.000000e+00> : vector<8x96xf32>
    %63 = vector.multi_reduction <add>, %62, %cst_29 [2] : vector<8x96x96xf32> to vector<8x96xf32>
    %64 = vector.shape_cast %63 : vector<8x96xf32> to vector<8x96x1xf32>
    %65 = tpu.reciprocal %64 {approx = true} : vector<8x96x1xf32> -> vector<8x96x1xf32>
    %66 = vector.broadcast %65 : vector<8x96x1xf32> to vector<8x96x96xf32>
    %67 = arith.mulf %62, %66 : vector<8x96x96xf32>
    %68 = arith.truncf %67 : vector<8x96x96xf32> to vector<8x96x96xbf16>
    %69 = arith.truncf %10 : vector<8x96x16xf32> to vector<8x96x16xbf16>
    "tpu.trace_start"() <{level = 10 : i32, message = "gts,gsd->gtd"}> : () -> ()
    %cst_30 = arith.constant dense<0.000000e+00> : vector<8x96x16xf32>
    %70 = tpu.matmul %68, %69, %cst_30 {dimension_numbers = #tpu.dot_dimension_numbers<[2], [1], [1], [2], [0, 0, 0, 1, 1, 2], [0], [0]>} : vector<8x96x96xbf16>, vector<8x96x16xbf16>, vector<8x96x16xf32> -> vector<8x96x16xf32>
    "tpu.trace_stop"() : () -> ()
    %c0_31 = arith.constant 0 : index
    %c0_32 = arith.constant 0 : index
    %c0_33 = arith.constant 0 : index
    %71 = vector.load %arg4[%c0_31, %c0_32, %c0_33] : memref<8x96x16xf32, #tpu.memory_space<vmem>>, vector<8x96x16xf32>
    tpu.vector_store %arg4[%c0_31, %c0_32, %c0_33], %70 {strides = array<i32>} : memref<8x96x16xf32, #tpu.memory_space<vmem>>, vector<8x96x16xf32>,
    return
  }
  func.func @transform_0(%arg0: i32) -> (i32, i32, i32) {
    %c0_i32 = arith.constant 0 : i32
    %c0_i32_0 = arith.constant 0 : i32
    %c0_i32_1 = arith.constant 0 : i32
    return %arg0, %c0_i32, %c0_i32_0 : i32, i32, i32
  }
  func.func @transform_1(%arg0: i32) -> (i32, i32) {
    %c0_i32 = arith.constant 0 : i32
    %c0_i32_0 = arith.constant 0 : i32
    %c0_i32_1 = arith.constant 0 : i32
    return %c0_i32, %c0_i32_0 : i32, i32
  }
  func.func @transform_2(%arg0: i32) -> (i32, i32) {
    %c0_i32 = arith.constant 0 : i32
    %c0_i32_0 = arith.constant 0 : i32
    %c0_i32_1 = arith.constant 0 : i32
    return %c0_i32, %c0_i32_0 : i32, i32
  }
  func.func @transform_3(%arg0: i32) -> (i32, i32, i32) {
    %c0_i32 = arith.constant 0 : i32
    %c0_i32_0 = arith.constant 0 : i32
    %c0_i32_1 = arith.constant 0 : i32
    return %arg0, %c0_i32, %c0_i32_0 : i32, i32, i32
  }
}

</mosaic_0001>

<bundles_post_ra>
// kernel: _block_self_attention_impl.1
= control target key start
LH: loop header
LB: loop body
LE: loop exit
PB: predicated region body
PF: predicated region fallthrough
CT: control target
= control target key end

     0   :  { %vm120_vm0 = vcmask 130048   ;;  %v5757_v49 = vmov 16   ;;  %s5758_s14 = smov 111   ;;  %vm1530_vm1 = vcmask 778240   ;;  %vm1538_vm2 = vcmask 261120   ;;  %s5761_s15 = smov 96   ;;  %s9122_s1 = inlined_call_operand.vmem [shape: f32[16,18], index: 1, kind: input, shape index: {}]   ;;  %s9123_s0 = inlined_call_operand.vmem [shape: f32[8,96,16], index: 0, kind: input, shape index: {}]   ;;  %s9124_s2 = inlined_call_operand.vmem [shape: f32[1,18], index: 2, kind: input, shape index: {}]   ;;  %s9125_s3 = inlined_call_operand.vmem [shape: f32[8,96,16], index: 3, kind: output, shape index: {}]  }
   0x1   :  { %v111_v0 = vld [vmem:[%s9122_s1] sm:$0xff]  ;;  %v112_v1 = vld [vmem:[%s9122_s1 + $0x8] sm:$0xff]  ;;  %v17_v5 = vld [vmem:[%s9123_s0 + $0x10] sm:$0xff]  ;;  %5361 = vset.pattern.permute.xlu1 %v5757_v49  ;;  %5362 = vset.pattern.permute.xlu0 %v5757_v49  ;;  %vm1548_vm8 = vcmask 523264  }
   0x2   :  { %v15_v2 = vld [vmem:[%s9123_s0] sm:$0xff]  ;;  %v5340_v3 = vpack.c.bf16 %v112_v1, %v111_v0  ;;  %v16_v4 = vld [vmem:[%s9123_s0 + $0x8] sm:$0xff]  ;;  %v18_v6 = vld [vmem:[%s9123_s0 + $0x18] sm:$0xff] }
   0x3   :  { %5004 = vmatprep.mubr.msk.f32.mxu0 %vm120_vm0, %v15_v2  ;;  %v19_v7 = vld [vmem:[%s9123_s0 + $0x20] sm:$0xff]  ;;  %v20_v8 = vld [vmem:[%s9123_s0 + $0x28] sm:$0xff]  ;;  %v21_v9 = vld [vmem:[%s9123_s0 + $0x30] sm:$0xff] }
   0x4   :  { %5341 = vmatprep.subr.bf16.mxu0 %v5340_v3  ;;  %v22_v10 = vld [vmem:[%s9123_s0 + $0x38] sm:$0xff]  ;;  %v23_v11 = vld [vmem:[%s9123_s0 + $0x40] sm:$0xff]  ;;  %v24_v12 = vld [vmem:[%s9123_s0 + $0x48] sm:$0xff] }
   0x5   :  { %5343 = vmatpush3.bf16.msra.mxu0 %v5340_v3  ;;  %v25_v13 = vld [vmem:[%s9123_s0 + $0x50] sm:$0xff]  ;;  %v26_v14 = vld [vmem:[%s9123_s0 + $0x58] sm:$0xff]  ;;  %v27_v15 = vld [vmem:[%s9123_s0 + $0x60] sm:$0xff] }
   0x6   :  { %v28_v16 = vld [vmem:[%s9123_s0 + $0x68] sm:$0xff]  ;;  %v29_v17 = vld [vmem:[%s9123_s0 + $0x70] sm:$0xff]  ;;  %v30_v18 = vld [vmem:[%s9123_s0 + $0x78] sm:$0xff] }
   0x7   :  { %v31_v19 = vld [vmem:[%s9123_s0 + $0x80] sm:$0xff]  ;;  %v32_v20 = vld [vmem:[%s9123_s0 + $0x88] sm:$0xff]  ;;  %v33_v21 = vld [vmem:[%s9123_s0 + $0x90] sm:$0xff] }
   0x8   :  { %5005 = vmatmul.mubr.msk.f32.vlgmr.msra.gmra.mrb[0].mxu0 %vm120_vm0, %v16_v4  ;;  %v34_v22 = vld [vmem:[%s9123_s0 + $0x98] sm:$0xff]  ;;  %v35_v23 = vld [vmem:[%s9123_s0 + $0xa0] sm:$0xff]  ;;  %v36_v24 = vld [vmem:[%s9123_s0 + $0xa8] sm:$0xff] }
   0x9   :  { %5007 = vmatprep.mubr.msk.f32.mxu0 %vm120_vm0, %v17_v5  ;;  %v37_v25 = vld [vmem:[%s9123_s0 + $0xb0] sm:$0xff]  ;;  %v38_v26 = vld [vmem:[%s9123_s0 + $0xb8] sm:$0xff]  ;;  %v39_v27 = vld [vmem:[%s9123_s0 + $0xc0] sm:$0xff] }
   0xa   :  { %v40_v28 = vld [vmem:[%s9123_s0 + $0xc8] sm:$0xff]  ;;  %v41_v29 = vld [vmem:[%s9123_s0 + $0xd0] sm:$0xff]  ;;  %v42_v30 = vld [vmem:[%s9123_s0 + $0xd8] sm:$0xff] }
   0xb   :  { %v43_v31 = vld [vmem:[%s9123_s0 + $0xe0] sm:$0xff]  ;;  %v44_v32 = vld [vmem:[%s9123_s0 + $0xe8] sm:$0xff]  ;;  %v45_v33 = vld [vmem:[%s9123_s0 + $0xf0] sm:$0xff] }
   0xc   :  { %5008 = vmatmul.mubr.msk.f32.gmra.mrb[2].mxu0 %vm120_vm0, %v18_v6  ;;  %v46_v34 = vld [vmem:[%s9123_s0 + $0xf8] sm:$0xff]  ;;  %v47_v35 = vld [vmem:[%s9123_s0 + $0x100] sm:$0xff]  ;;  %v48_v36 = vld [vmem:[%s9123_s0 + $0x108] sm:$0xff] }
   0xd   :  { %5010 = vmatprep.mubr.msk.f32.mxu0 %vm120_vm0, %v19_v7  ;;  %v49_v37 = vld [vmem:[%s9123_s0 + $0x110] sm:$0xff]  ;;  %v50_v38 = vld [vmem:[%s9123_s0 + $0x118] sm:$0xff]  ;;  %v51_v39 = vld [vmem:[%s9123_s0 + $0x120] sm:$0xff] }
   0xe   :  { %v52_v40 = vld [vmem:[%s9123_s0 + $0x128] sm:$0xff]  ;;  %v53_v41 = vld [vmem:[%s9123_s0 + $0x130] sm:$0xff]  ;;  %v54_v42 = vld [vmem:[%s9123_s0 + $0x138] sm:$0xff] }
   0xf   :  { %v55_v43 = vld [vmem:[%s9123_s0 + $0x140] sm:$0xff]  ;;  %v56_v44 = vld [vmem:[%s9123_s0 + $0x148] sm:$0xff]  ;;  %v57_v45 = vld [vmem:[%s9123_s0 + $0x150] sm:$0xff] }
  0x10   :  { %5011 = vmatmul.mubr.msk.f32.gmra.mrb[4].mxu0 %vm120_vm0, %v20_v8  ;;  %v58_v46 = vld [vmem:[%s9123_s0 + $0x158] sm:$0xff]  ;;  %v59_v47 = vld [vmem:[%s9123_s0 + $0x160] sm:$0xff]  ;;  %v60_v48 = vld [vmem:[%s9123_s0 + $0x168] sm:$0xff] }
  0x11   :  { %5013 = vmatprep.mubr.msk.f32.mxu0 %vm120_vm0, %v21_v9  ;;  %v61_v50 = vld [vmem:[%s9123_s0 + $0x170] sm:$0xff]  ;;  %v62_v51 = vld [vmem:[%s9123_s0 + $0x178] sm:$0xff]  ;;  %v63_v52 = vld [vmem:[%s9123_s0 + $0x180] sm:$0xff] }
  0x12   :  { %v64_v53 = vld [vmem:[%s9123_s0 + $0x188] sm:$0xff]  ;;  %v65_v54 = vld [vmem:[%s9123_s0 + $0x190] sm:$0xff]  ;;  %v66_v55 = vld [vmem:[%s9123_s0 + $0x198] sm:$0xff] }
  0x13   :  { %v67_v56 = vld [vmem:[%s9123_s0 + $0x1a0] sm:$0xff]  ;;  %v68_v57 = vld [vmem:[%s9123_s0 + $0x1a8] sm:$0xff]  ;;  %v69_v58 = vld [vmem:[%s9123_s0 + $0x1b0] sm:$0xff] }
  0x14   :  { %5014 = vmatmul.mubr.msk.f32.gmra.mrb[6].mxu0 %vm120_vm0, %v22_v10  ;;  %v70_v59 = vld [vmem:[%s9123_s0 + $0x1b8] sm:$0xff]  ;;  %v71_v60 = vld [vmem:[%s9123_s0 + $0x1c0] sm:$0xff]  ;;  %v72_v61 = vld [vmem:[%s9123_s0 + $0x1c8] sm:$0xff] }
  0x15   :  { %5016 = vmatprep.mubr.msk.f32.mxu0 %vm120_vm0, %v23_v11  ;;  %v73_v62 = vld [vmem:[%s9123_s0 + $0x1d0] sm:$0xff]  ;;  %v74_v63 = vld [vmem:[%s9123_s0 + $0x1d8] sm:$0xff]  ;;  %v75_v0 = vld [vmem:[%s9123_s0 + $0x1e0] sm:$0xff] }
  0x16   :  { %v76_v1 = vld [vmem:[%s9123_s0 + $0x1e8] sm:$0xff]  ;;  %v77_v2 = vld [vmem:[%s9123_s0 + $0x1f0] sm:$0xff]  ;;  %v78_v3 = vld [vmem:[%s9123_s0 + $0x1f8] sm:$0xff] }
  0x17   :  { %v79_v4 = vld [vmem:[%s9123_s0 + $0x200] sm:$0xff]  ;;  %v80_v5 = vld [vmem:[%s9123_s0 + $0x208] sm:$0xff]  ;;  %v81_v6 = vld [vmem:[%s9123_s0 + $0x210] sm:$0xff] }
  0x18   :  { %5017 = vmatmul.mubr.msk.f32.gmra.mrb[8].mxu0 %vm120_vm0, %v24_v12  ;;  %v82_v7 = vld [vmem:[%s9123_s0 + $0x218] sm:$0xff]  ;;  %v83_v8 = vld [vmem:[%s9123_s0 + $0x220] sm:$0xff]  ;;  %v84_v9 = vld [vmem:[%s9123_s0 + $0x228] sm:$0xff] }
  0x19   :  { %5019 = vmatprep.mubr.msk.f32.mxu0 %vm120_vm0, %v25_v13  ;;  %v85_v10 = vld [vmem:[%s9123_s0 + $0x230] sm:$0xff]  ;;  %v86_v11 = vld [vmem:[%s9123_s0 + $0x238] sm:$0xff]  ;;  %v87_v12 = vld [vmem:[%s9123_s0 + $0x240] sm:$0xff] }
  0x1a   :  { %v88_v13 = vld [vmem:[%s9123_s0 + $0x248] sm:$0xff] }
  0x1c   :  { %5020 = vmatmul.mubr.msk.f32.gmra.mrb[10].mxu0 %vm120_vm0, %v26_v14  ;;  %v89_v14 = vld [vmem:[%s9123_s0 + $0x250] sm:$0xff] }
  0x1d   :  { %5022 = vmatprep.mubr.msk.f32.mxu0 %vm120_vm0, %v27_v15  ;;  %v90_v15 = vld [vmem:[%s9123_s0 + $0x258] sm:$0xff] }
  0x20   :  { %5023 = vmatmul.mubr.msk.f32.gmra.mrb[12].mxu0 %vm120_vm0, %v28_v16  ;;  %v91_v16 = vld [vmem:[%s9123_s0 + $0x260] sm:$0xff] }
  0x21   :  { %5025 = vmatprep.mubr.msk.f32.mxu0 %vm120_vm0, %v29_v17  ;;  %v92_v17 = vld [vmem:[%s9123_s0 + $0x268] sm:$0xff] }
  0x24   :  { %5026 = vmatmul.mubr.msk.f32.gmra.mrb[14].mxu0 %vm120_vm0, %v30_v18  ;;  %v93_v18 = vld [vmem:[%s9123_s0 + $0x270] sm:$0xff] }
  0x25   :  { %5028 = vmatprep.mubr.msk.f32.mxu0 %vm120_vm0, %v31_v19  ;;  %v94_v19 = vld [vmem:[%s9123_s0 + $0x278] sm:$0xff] }
  0x28   :  { %5029 = vmatmul.mubr.msk.f32.gmra.mrb[16].mxu0 %vm120_vm0, %v32_v20  ;;  %v95_v20 = vld [vmem:[%s9123_s0 + $0x280] sm:$0xff] }
  0x29   :  { %5031 = vmatprep.mubr.msk.f32.mxu0 %vm120_vm0, %v33_v21  ;;  %v96_v21 = vld [vmem:[%s9123_s0 + $0x288] sm:$0xff] }
  0x2c   :  { %5032 = vmatmul.mubr.msk.f32.gmra.mrb[18].mxu0 %vm120_vm0, %v34_v22  ;;  %v97_v22 = vld [vmem:[%s9123_s0 + $0x290] sm:$0xff] }
  0x2d   :  { %5034 = vmatprep.mubr.msk.f32.mxu0 %vm120_vm0, %v35_v23  ;;  %v98_v23 = vld [vmem:[%s9123_s0 + $0x298] sm:$0xff] }
  0x30   :  { %5035 = vmatmul.mubr.msk.f32.gmra.mrb[20].mxu0 %vm120_vm0, %v36_v24  ;;  %v99_v24 = vld [vmem:[%s9123_s0 + $0x2a0] sm:$0xff] }
  0x31   :  { %5037 = vmatprep.mubr.msk.f32.mxu0 %vm120_vm0, %v37_v25  ;;  %v100_v25 = vld [vmem:[%s9123_s0 + $0x2a8] sm:$0xff] }
  0x34   :  { %5038 = vmatmul.mubr.msk.f32.gmra.mrb[22].mxu0 %vm120_vm0, %v38_v26  ;;  %v101_v26 = vld [vmem:[%s9123_s0 + $0x2b0] sm:$0xff] }
  0x35   :  { %5040 = vmatprep.mubr.msk.f32.mxu0 %vm120_vm0, %v39_v27  ;;  %v102_v27 = vld [vmem:[%s9123_s0 + $0x2b8] sm:$0xff] }
  0x38   :  { %5041 = vmatmul.mubr.msk.f32.gmra.mrb[24].mxu0 %vm120_vm0, %v40_v28  ;;  %v103_v28 = vld [vmem:[%s9123_s0 + $0x2c0] sm:$0xff] }
  0x39   :  { %5043 = vmatprep.mubr.msk.f32.mxu0 %vm120_vm0, %v41_v29  ;;  %v104_v29 = vld [vmem:[%s9123_s0 + $0x2c8] sm:$0xff] }
  0x3c   :  { %5044 = vmatmul.mubr.msk.f32.gmra.mrb[26].mxu0 %vm120_vm0, %v42_v30  ;;  %v105_v30 = vld [vmem:[%s9123_s0 + $0x2d0] sm:$0xff] }
  0x3d   :  { %5046 = vmatprep.mubr.msk.f32.mxu0 %vm120_vm0, %v43_v31  ;;  %v106_v31 = vld [vmem:[%s9123_s0 + $0x2d8] sm:$0xff] }
  0x40   :  { %5047 = vmatmul.mubr.msk.f32.gmra.mrb[28].mxu0 %vm120_vm0, %v44_v32  ;;  %v107_v32 = vld [vmem:[%s9123_s0 + $0x2e0] sm:$0xff] }
  0x41   :  { %5049 = vmatprep.mubr.msk.f32.mxu0 %vm120_vm0, %v45_v33  ;;  %v108_v33 = vld [vmem:[%s9123_s0 + $0x2e8] sm:$0xff] }
  0x44   :  { %5050 = vmatmul.mubr.msk.f32.gmra.mrb[30].mxu0 %vm120_vm0, %v46_v34  ;;  %v109_v34 = vld [vmem:[%s9123_s0 + $0x2f0] sm:$0xff] }
  0x45   :  { %5052 = vmatprep.mubr.msk.f32.mxu0 %vm120_vm0, %v47_v35  ;;  %v110_v35 = vld [vmem:[%s9123_s0 + $0x2f8] sm:$0xff]  ;;  %s5759_s0 = smov 32  }
  0x48   :  { %5053 = vmatmul.mubr.msk.f32.gmra.mrb[32].mxu0 %vm120_vm0, %v48_v36  ;;  %v6175_v36 = vld [vmem:[%s9124_s2] ss:$0 sm:$0xff]  ;;  %s5760_s2 = smov 64  }
  0x49   :  { %5055 = vmatprep.mubr.msk.f32.mxu0 %vm120_vm0, %v49_v37 }
  0x4c   :  { %5056 = vmatmul.mubr.msk.f32.gmra.mrb[34].mxu0 %vm120_vm0, %v50_v38 }
  0x4d   :  { %5058 = vmatprep.mubr.msk.f32.mxu0 %vm120_vm0, %v51_v39 }
  0x50   :  { %5059 = vmatmul.mubr.msk.f32.gmra.mrb[36].mxu0 %vm120_vm0, %v52_v40 }
  0x51   :  { %5061 = vmatprep.mubr.msk.f32.mxu0 %vm120_vm0, %v53_v41 }
  0x54   :  { %5062 = vmatmul.mubr.msk.f32.gmra.mrb[38].mxu0 %vm120_vm0, %v54_v42 }
  0x55   :  { %5064 = vmatprep.mubr.msk.f32.mxu0 %vm120_vm0, %v55_v43 }
  0x58   :  { %5065 = vmatmul.mubr.msk.f32.gmra.mrb[40].mxu0 %vm120_vm0, %v56_v44 }
  0x59   :  { %5067 = vmatprep.mubr.msk.f32.mxu0 %vm120_vm0, %v57_v45 }
  0x5c   :  { %5068 = vmatmul.mubr.msk.f32.gmra.mrb[42].mxu0 %vm120_vm0, %v58_v46 }
  0x5d   :  { %5070 = vmatprep.mubr.msk.f32.mxu0 %vm120_vm0, %v59_v47 }
  0x60   :  { %5071 = vmatmul.mubr.msk.f32.gmra.mrb[44].mxu0 %vm120_vm0, %v60_v48 }
  0x61   :  { %5073 = vmatprep.mubr.msk.f32.mxu0 %vm120_vm0, %v61_v50 }
  0x64   :  { %5074 = vmatmul.mubr.msk.f32.gmra.mrb[46].mxu0 %vm120_vm0, %v62_v51 }
  0x65   :  { %5076 = vmatprep.mubr.msk.f32.mxu0 %vm120_vm0, %v63_v52 }
  0x68   :  { %5077 = vmatmul.mubr.msk.f32.gmra.mrb[48].mxu0 %vm120_vm0, %v64_v53 }
  0x69   :  { %5079 = vmatprep.mubr.msk.f32.mxu0 %vm120_vm0, %v65_v54 }
  0x6c   :  { %5080 = vmatmul.mubr.msk.f32.gmra.mrb[50].mxu0 %vm120_vm0, %v66_v55 }
  0x6d   :  { %5082 = vmatprep.mubr.msk.f32.mxu0 %vm120_vm0, %v67_v56 }
  0x70   :  { %5083 = vmatmul.mubr.msk.f32.gmra.mrb[52].mxu0 %vm120_vm0, %v68_v57 }
  0x71   :  { %5085 = vmatprep.mubr.msk.f32.mxu0 %vm120_vm0, %v69_v58 }
  0x74   :  { %5086 = vmatmul.mubr.msk.f32.gmra.mrb[54].mxu0 %vm120_vm0, %v70_v59 }
  0x75   :  { %5088 = vmatprep.mubr.msk.f32.mxu0 %vm120_vm0, %v71_v60 }
  0x78   :  { %5089 = vmatmul.mubr.msk.f32.gmra.mrb[56].mxu0 %vm120_vm0, %v72_v61 }
  0x79   :  { %5091 = vmatprep.mubr.msk.f32.mxu0 %vm120_vm0, %v73_v62 }
  0x7c   :  { %5092 = vmatmul.mubr.msk.f32.gmra.mrb[58].mxu0 %vm120_vm0, %v74_v63 }
  0x7d   :  { %5094 = vmatprep.mubr.msk.f32.mxu0 %vm120_vm0, %v75_v0 }
  0x80   :  { %5095 = vmatmul.mubr.msk.f32.gmra.mrb[60].mxu0 %vm120_vm0, %v76_v1 }
  0x81   :  { %5097 = vmatprep.mubr.msk.f32.mxu0 %vm120_vm0, %v77_v2 }
  0x84   :  { %5098 = vmatmul.mubr.msk.f32.gmra.mrb[62].mxu0 %vm120_vm0, %v78_v3 }
  0x85   :  { %5100 = vmatprep.mubr.msk.f32.mxu0 %vm120_vm0, %v79_v4 }
  0x88   :  { %5101 = vmatmul.mubr.msk.f32.gmra.mrb[64].mxu0 %vm120_vm0, %v80_v5 }
  0x89   :  { %5103 = vmatprep.mubr.msk.f32.mxu0 %vm120_vm0, %v81_v6 }
  0x8c   :  { %5104 = vmatmul.mubr.msk.f32.gmra.mrb[66].mxu0 %vm120_vm0, %v82_v7 }
  0x8d   :  { %5106 = vmatprep.mubr.msk.f32.mxu0 %vm120_vm0, %v83_v8 }
  0x90   :  { %5107 = vmatmul.mubr.msk.f32.gmra.mrb[68].mxu0 %vm120_vm0, %v84_v9 }
  0x91   :  { %5109 = vmatprep.mubr.msk.f32.mxu0 %vm120_vm0, %v85_v10 }
  0x94   :  { %5110 = vmatmul.mubr.msk.f32.gmra.mrb[70].mxu0 %vm120_vm0, %v86_v11 }
  0x95   :  { %5112 = vmatprep.mubr.msk.f32.mxu0 %vm120_vm0, %v87_v12 }
  0x98   :  { %5113 = vmatmul.mubr.msk.f32.gmra.mrb[72].mxu0 %vm120_vm0, %v88_v13 }
  0x99   :  { %5115 = vmatprep.mubr.msk.f32.mxu0 %vm120_vm0, %v89_v14 }
  0x9c   :  { %5116 = vmatmul.mubr.msk.f32.gmra.mrb[74].mxu0 %vm120_vm0, %v90_v15 }
  0x9d   :  { %5118 = vmatprep.mubr.msk.f32.mxu0 %vm120_vm0, %v91_v16 }
  0xa0   :  { %5119 = vmatmul.mubr.msk.f32.gmra.mrb[76].mxu0 %vm120_vm0, %v92_v17 }
  0xa1   :  { %5121 = vmatprep.mubr.msk.f32.mxu0 %vm120_vm0, %v93_v18 }
  0xa4   :  { %5122 = vmatmul.mubr.msk.f32.gmra.mrb[78].mxu0 %vm120_vm0, %v94_v19 }
  0xa5   :  { %5124 = vmatprep.mubr.msk.f32.mxu0 %vm120_vm0, %v95_v20 }
  0xa8   :  { %5125 = vmatmul.mubr.msk.f32.gmra.mrb[80].mxu0 %vm120_vm0, %v96_v21 }
  0xa9   :  { %5127 = vmatprep.mubr.msk.f32.mxu0 %vm120_vm0, %v97_v22 }
  0xac   :  { %5128 = vmatmul.mubr.msk.f32.gmra.mrb[82].mxu0 %vm120_vm0, %v98_v23 }
  0xad   :  { %5130 = vmatprep.mubr.msk.f32.mxu0 %vm120_vm0, %v99_v24 }
  0xb0   :  { %5131 = vmatmul.mubr.msk.f32.gmra.mrb[84].mxu0 %vm120_vm0, %v100_v25 }
  0xb1   :  { %5133 = vmatprep.mubr.msk.f32.mxu0 %vm120_vm0, %v101_v26 }
  0xb4   :  { %5134 = vmatmul.mubr.msk.f32.gmra.mrb[86].mxu0 %vm120_vm0, %v102_v27 }
  0xb5   :  { %5136 = vmatprep.mubr.msk.f32.mxu0 %vm120_vm0, %v103_v28 }
  0xb8   :  { %5137 = vmatmul.mubr.msk.f32.gmra.mrb[88].mxu0 %vm120_vm0, %v104_v29 }
  0xb9   :  { %5139 = vmatprep.mubr.msk.f32.mxu0 %vm120_vm0, %v105_v30 }
  0xbc   :  { %5140 = vmatmul.mubr.msk.f32.gmra.mrb[90].mxu0 %vm120_vm0, %v106_v31 }
  0xbd   :  { %5142 = vmatprep.mubr.msk.f32.mxu0 %vm120_vm0, %v107_v32 }
  0xc0   :  { %5143 = vmatmul.mubr.msk.f32.gmra.mrb[92].mxu0 %vm120_vm0, %v108_v33 }
  0xc1   :  { %5145 = vmatprep.mubr.msk.f32.mxu0 %vm120_vm0, %v109_v34 }
  0xc4   :  { %5146 = vmatmul.mubr.msk.f32.gmra.mrb[94].mxu0 %vm120_vm0, %v110_v35 }
  0xdb   :  { %v5006_v37 = vpop.f32.mrb[0].mxu0 }
  0xdc   :  { %v6178_v38 = vadd.f32 %v5006_v37, %v6175_v36  ;;  %v475_v39 = vpop.f32.mrb[1].mxu0 }
  0xdd   :  { %v6181_v40 = vadd.f32 %v6175_v36, %v475_v39 }
  0xde   :  { %9340 = vst [vmem:[#allocation3_spill] sm:$0xff] %v6178_v38  ;;  %2525 = vperm.xlu1 %5361, %v6178_v38   ;;  %1052 = vrot.lane.b32.xlu0 %v6178_v38, %s5758_s14 }
  0xdf   :  { %9341 = vst [vmem:[#allocation4_spill] sm:$0xff] %v6181_v40  ;;  %v5009_v41 = vpop.f32.mrb[2].mxu0  ;;  %v3721_v42 = vpack.c.bf16 %v6178_v38, %v6181_v40 }
  0xe0   :  { %v6189_v43 = vadd.f32 %v5009_v41, %v6175_v36  ;;  %v485_v44 = vpop.f32.mrb[3].mxu0 }
  0xe1   :  { %5148 = vmatprep.subr.bf16.mxu1 %v3721_v42  ;;  %v6192_v45 = vadd.f32 %v6175_v36, %v485_v44 }
  0xe2   :  { %9342 = vst [vmem:[#allocation5_spill] sm:$0xff] %v6189_v43  ;;  %1056 = vrot.lane.b32.xlu1 %v6189_v43, %s5758_s14  ;;  %1050 = vrot.lane.b32.xlu0 %v6181_v40, %s5758_s14 }
  0xe3   :  { %9343 = vst [vmem:[#allocation6_spill] sm:$0xff] %v6192_v45  ;;  %5149 = vmatpush3.bf16.msra.mxu1 %v3721_v42  ;;  %v5012_v46 = vpop.f32.mrb[4].mxu0  ;;  %v3722_v47 = vpack.c.bf16 %v6189_v43, %v6192_v45 }
  0xe4   :  { %v6201_v48 = vadd.f32 %v5012_v46, %v6175_v36  ;;  %v495_v49 = vpop.f32.mrb[5].mxu0 }
  0xe5   :  { %v6204_v50 = vadd.f32 %v6175_v36, %v495_v49  ;;  %5150 = vmatprep.subr.bf16.mxu1 %v3722_v47 }
  0xe6   :  { %9344 = vst [vmem:[#allocation7_spill] sm:$0xff] %v6201_v48  ;;  %2533 = vperm.xlu1 %5361, %v6189_v43   ;;  %2521 = vperm.xlu0 %5362, %v6181_v40  }
  0xe7   :  { %9345 = vst [vmem:[#allocation8_spill] sm:$0xff] %v6204_v50  ;;  %5151 = vmatpush3.bf16.msra.mxu1 %v3722_v47  ;;  %v3723_v51 = vpack.c.bf16 %v6201_v48, %v6204_v50  ;;  %v5015_v52 = vpop.f32.mrb[6].mxu0 }
  0xe8   :  { %v6211_v53 = vadd.f32 %v5015_v52, %v6175_v36  ;;  %v505_v54 = vpop.f32.mrb[7].mxu0 }
  0xe9   :  { %5152 = vmatprep.subr.bf16.mxu1 %v3723_v51  ;;  %v6214_v55 = vadd.f32 %v6175_v36, %v505_v54 }
  0xea   :  { %9346 = vst [vmem:[#allocation9_spill] sm:$0xff] %v6211_v53  ;;  %1054 = vrot.lane.b32.xlu1 %v6192_v45, %s5758_s14  ;;  %2529 = vperm.xlu0 %5362, %v6192_v45  }
  0xeb   :  { %9347 = vst [vmem:[#allocation10_spill] sm:$0xff] %v6214_v55  ;;  %5153 = vmatpush3.bf16.msra.mxu1 %v3723_v51  ;;  %v3724_v56 = vpack.c.bf16 %v6211_v53, %v6214_v55  ;;  %v5018_v57 = vpop.f32.mrb[8].mxu0 }
  0xec   :  { %v6222_v58 = vadd.f32 %v5018_v57, %v6175_v36  ;;  %v515_v59 = vpop.f32.mrb[9].mxu0 }
  0xed   :  { %5154 = vmatprep.subr.bf16.mxu1 %v3724_v56  ;;  %v6225_v60 = vadd.f32 %v6175_v36, %v515_v59 }
  0xee   :  { %9348 = vst [vmem:[#allocation11_spill] sm:$0xff] %v6222_v58  ;;  %1060 = vrot.lane.b32.xlu1 %v6201_v48, %s5758_s14  ;;  %1058 = vrot.lane.b32.xlu0 %v6204_v50, %s5758_s14 }
  0xef   :  { %9349 = vst [vmem:[#allocation12_spill] sm:$0xff] %v6225_v60  ;;  %5155 = vmatpush3.bf16.msra.mxu1 %v3724_v56  ;;  %v3725_v61 = vpack.c.bf16 %v6222_v58, %v6225_v60  ;;  %v5021_v62 = vpop.f32.mrb[10].mxu0 }
  0xf0   :  { %v6234_v63 = vadd.f32 %v5021_v62, %v6175_v36  ;;  %v525_v0 = vpop.f32.mrb[11].mxu0 }
  0xf1   :  { %5156 = vmatprep.subr.bf16.mxu1 %v3725_v61  ;;  %v6237_v1 = vadd.f32 %v6175_v36, %v525_v0 }
  0xf2   :  { %9350 = vst [vmem:[#allocation13_spill] sm:$0xff] %v6234_v63  ;;  %2541 = vperm.xlu1 %5361, %v6201_v48   ;;  %2537 = vperm.xlu0 %5362, %v6204_v50  }
  0xf3   :  { %9351 = vst [vmem:[#allocation14_spill] sm:$0xff] %v6237_v1  ;;  %5157 = vmatpush3.bf16.msra.mxu1 %v3725_v61  ;;  %v3726_v2 = vpack.c.bf16 %v6234_v63, %v6237_v1  ;;  %v5024_v3 = vpop.f32.mrb[12].mxu0 }
  0xf4   :  { %v6244_v4 = vadd.f32 %v5024_v3, %v6175_v36  ;;  %v535_v5 = vpop.f32.mrb[13].mxu0 }
  0xf5   :  { %5158 = vmatprep.subr.bf16.mxu1 %v3726_v2  ;;  %v6247_v6 = vadd.f32 %v6175_v36, %v535_v5 }
  0xf6   :  { %9352 = vst [vmem:[#allocation15_spill] sm:$0xff] %v6244_v4  ;;  %1064 = vrot.lane.b32.xlu1 %v6211_v53, %s5758_s14  ;;  %1062 = vrot.lane.b32.xlu0 %v6214_v55, %s5758_s14 }
  0xf7   :  { %9353 = vst [vmem:[#allocation16_spill] sm:$0xff] %v6247_v6  ;;  %5159 = vmatpush3.bf16.msra.mxu1 %v3726_v2  ;;  %v6255_v7 = vpack.c.bf16 %v6244_v4, %v6247_v6  ;;  %v5027_v8 = vpop.f32.mrb[14].mxu0 }
  0xf8   :  { %v6258_v9 = vadd.f32 %v5027_v8, %v6175_v36  ;;  %v545_v10 = vpop.f32.mrb[15].mxu0 }
  0xf9   :  { %9354 = vst [vmem:[#allocation17_spill] sm:$0xff] %v6255_v7  ;;  %5172 = vmatprep.subr.bf16.mxu1 %v6255_v7  ;;  %v6262_v11 = vadd.f32 %v6175_v36, %v545_v10 }
  0xfa   :  { %9355 = vst [vmem:[#allocation18_spill] sm:$0xff] %v6258_v9  ;;  %2549 = vperm.xlu1 %5361, %v6211_v53   ;;  %2545 = vperm.xlu0 %5362, %v6214_v55  }
  0xfb   :  { %9356 = vst [vmem:[#allocation19_spill] sm:$0xff] %v6262_v11  ;;  %v5030_v12 = vpop.f32.mrb[16].mxu0  ;;  %v6268_v13 = vpack.c.bf16 %v6258_v9, %v6262_v11 }
  0xfc   :  { %v6271_v14 = vadd.f32 %v5030_v12, %v6175_v36  ;;  %v555_v15 = vpop.f32.mrb[17].mxu0 }
  0xfd   :  { %9357 = vst [vmem:[#allocation20_spill] sm:$0xff] %v6268_v13  ;;  %v6274_v16 = vadd.f32 %v6175_v36, %v555_v15 }
  0xfe   :  { %9358 = vst [vmem:[#allocation21_spill] sm:$0xff] %v6271_v14  ;;  %1068 = vrot.lane.b32.xlu1 %v6222_v58, %s5758_s14  ;;  %1066 = vrot.lane.b32.xlu0 %v6225_v60, %s5758_s14 }
  0xff   :  { %9359 = vst [vmem:[#allocation22_spill] sm:$0xff] %v6274_v16  ;;  %v5033_v17 = vpop.f32.mrb[18].mxu0  ;;  %v6282_v18 = vpack.c.bf16 %v6271_v14, %v6274_v16 }
 0x100   :  { %v6285_v19 = vadd.f32 %v5033_v17, %v6175_v36  ;;  %v565_v20 = vpop.f32.mrb[19].mxu0 }
 0x101   :  { %9360 = vst [vmem:[#allocation23_spill] sm:$0xff] %v6282_v18  ;;  %v6288_v21 = vadd.f32 %v6175_v36, %v565_v20 }
 0x102   :  { %9361 = vst [vmem:[#allocation24_spill] sm:$0xff] %v6285_v19  ;;  %2557 = vperm.xlu1 %5361, %v6222_v58   ;;  %2553 = vperm.xlu0 %5362, %v6225_v60  }
 0x103   :  { %9362 = vst [vmem:[#allocation25_spill] sm:$0xff] %v6288_v21  ;;  %v5036_v22 = vpop.f32.mrb[20].mxu0  ;;  %v6294_v23 = vpack.c.bf16 %v6285_v19, %v6288_v21 }
 0x104   :  { %v6297_v24 = vadd.f32 %v5036_v22, %v6175_v36  ;;  %v575_v25 = vpop.f32.mrb[21].mxu0 }
 0x105   :  { %9363 = vst [vmem:[#allocation26_spill] sm:$0xff] %v6294_v23  ;;  %v6300_v26 = vadd.f32 %v6175_v36, %v575_v25 }
 0x106   :  { %9364 = vst [vmem:[#allocation27_spill] sm:$0xff] %v6297_v24  ;;  %1072 = vrot.lane.b32.xlu1 %v6234_v63, %s5758_s14  ;;  %1070 = vrot.lane.b32.xlu0 %v6237_v1, %s5758_s14 }
 0x107   :  { %9365 = vst [vmem:[#allocation28_spill] sm:$0xff] %v6300_v26  ;;  %v5039_v27 = vpop.f32.mrb[22].mxu0  ;;  %v6308_v28 = vpack.c.bf16 %v6297_v24, %v6300_v26 }
 0x108   :  { %v585_v29 = vpop.f32.mrb[23].mxu0  ;;  %v6341_v61 = vadd.f32 %v5039_v27, %v6175_v36 }
 0x109   :  { %9366 = vst [vmem:[#allocation29_spill] sm:$0xff] %v6308_v28  ;;  %v6344_v62 = vadd.f32 %v6175_v36, %v585_v29 }
 0x10a   :  { %2565 = vperm.xlu1 %5361, %v6234_v63   ;;  %2561 = vperm.xlu0 %5362, %v6237_v1  }
 0x10b   :  { %v5042_v30 = vpop.f32.mrb[24].mxu0  ;;  %9367 = vst [vmem:[#allocation30_spill] sm:$0xff] %v6344_v62 }
 0x10c   :  { %v595_v31 = vpop.f32.mrb[25].mxu0  ;;  %v6353_v3 = vadd.f32 %v5042_v30, %v6175_v36 }
 0x10d   :  { %v6356_v5 = vadd.f32 %v6175_v36, %v595_v31 }
 0x10e   :  { %1076 = vrot.lane.b32.xlu1 %v6244_v4, %s5758_s14  ;;  %1074 = vrot.lane.b32.xlu0 %v6247_v6, %s5758_s14 }
 0x10f   :  { %v5045_v32 = vpop.f32.mrb[26].mxu0  ;;  %9368 = vst [vmem:[#allocation31_spill] sm:$0xff] %v6356_v5 }
 0x110   :  { %v605_v33 = vpop.f32.mrb[27].mxu0  ;;  %v6367_v12 = vadd.f32 %v5045_v32, %v6175_v36 }
 0x111   :  { %v6370_v15 = vadd.f32 %v6175_v36, %v605_v33 }
 0x112   :  { %2573 = vperm.xlu1 %5361, %v6244_v4   ;;  %2569 = vperm.xlu0 %5362, %v6247_v6   ;;  %9369 = vst [vmem:[#allocation32_spill] sm:$0xff] %v6367_v12 }
 0x113   :  { %v5048_v34 = vpop.f32.mrb[28].mxu0  ;;  %9370 = vst [vmem:[#allocation33_spill] sm:$0xff] %v6370_v15 }
 0x114   :  { %v615_v35 = vpop.f32.mrb[29].mxu0  ;;  %v6381_v22 = vadd.f32 %v5048_v34, %v6175_v36 }
 0x115   :  { %v6384_v25 = vadd.f32 %v6175_v36, %v615_v35 }
 0x116   :  { %1080 = vrot.lane.b32.xlu1 %v6258_v9, %s5758_s14  ;;  %1078 = vrot.lane.b32.xlu0 %v6262_v11, %s5758_s14  ;;  %9371 = vst [vmem:[#allocation34_spill] sm:$0xff] %v6381_v22 }
 0x117   :  { %v5051_v37 = vpop.f32.mrb[30].mxu0  ;;  %9372 = vst [vmem:[#allocation35_spill] sm:$0xff] %v6384_v25 }
 0x118   :  { %v625_v39 = vpop.f32.mrb[31].mxu0  ;;  %v6395_v30 = vadd.f32 %v5051_v37, %v6175_v36 }
 0x119   :  { %v6398_v31 = vadd.f32 %v6175_v36, %v625_v39 }
 0x11a   :  { %2581 = vperm.xlu1 %5361, %v6258_v9   ;;  %2577 = vperm.xlu0 %5362, %v6262_v11   ;;  %9373 = vst [vmem:[#allocation36_spill] sm:$0xff] %v6395_v30 }
 0x11b   :  { %v5054_v41 = vpop.f32.mrb[32].mxu0  ;;  %9374 = vst [vmem:[#allocation37_spill] sm:$0xff] %v6398_v31 }
 0x11c   :  { %v635_v42 = vpop.f32.mrb[33].mxu0  ;;  %v6409_v34 = vadd.f32 %v5054_v41, %v6175_v36 }
 0x11d   :  { %v6412_v35 = vadd.f32 %v6175_v36, %v635_v42 }
 0x11e   :  { %1084 = vrot.lane.b32.xlu1 %v6271_v14, %s5758_s14  ;;  %1082 = vrot.lane.b32.xlu0 %v6274_v16, %s5758_s14  ;;  %9375 = vst [vmem:[#allocation38_spill] sm:$0xff] %v6409_v34 }
 0x11f   :  { %v5057_v44 = vpop.f32.mrb[34].mxu0  ;;  %9376 = vst [vmem:[#allocation39_spill] sm:$0xff] %v6412_v35 }
 0x120   :  { %v645_v46 = vpop.f32.mrb[35].mxu0  ;;  %v6423_v28 = vadd.f32 %v5057_v44, %v6175_v36 }
 0x121   :  { %v6426_v23 = vadd.f32 %v6175_v36, %v645_v46 }
 0x122   :  { %2589 = vperm.xlu1 %5361, %v6271_v14   ;;  %2585 = vperm.xlu0 %5362, %v6274_v16   ;;  %9377 = vst [vmem:[#allocation40_spill] sm:$0xff] %v6423_v28 }
 0x123   :  { %v5060_v47 = vpop.f32.mrb[36].mxu0  ;;  %9378 = vst [vmem:[#allocation41_spill] sm:$0xff] %v6426_v23 }
 0x124   :  { %v655_v49 = vpop.f32.mrb[37].mxu0  ;;  %v6437_v18 = vadd.f32 %v5060_v47, %v6175_v36 }
 0x125   :  { %v6440_v13 = vadd.f32 %v6175_v36, %v655_v49 }
 0x126   :  { %1088 = vrot.lane.b32.xlu1 %v6285_v19, %s5758_s14  ;;  %1086 = vrot.lane.b32.xlu0 %v6288_v21, %s5758_s14  ;;  %9379 = vst [vmem:[#allocation42_spill] sm:$0xff] %v6437_v18 }
 0x127   :  { %v5063_v51 = vpop.f32.mrb[38].mxu0  ;;  %9380 = vst [vmem:[#allocation43_spill] sm:$0xff] %v6440_v13 }
 0x128   :  { %v665_v52 = vpop.f32.mrb[39].mxu0  ;;  %v6451_v7 = vadd.f32 %v5063_v51, %v6175_v36 }
 0x12a   :  { %2597 = vperm.xlu1 %5361, %v6285_v19   ;;  %2593 = vperm.xlu0 %5362, %v6288_v21   ;;  %9381 = vst [vmem:[#allocation44_spill] sm:$0xff] %v6451_v7 }
 0x12b   :  { %v5066_v54 = vpop.f32.mrb[40].mxu0 }
 0x12c   :  { %v675_v56 = vpop.f32.mrb[41].mxu0  ;;  %v6465_v21 = vadd.f32 %v5066_v54, %v6175_v36 }
 0x12d   :  { %v6468_v16 = vadd.f32 %v6175_v36, %v675_v56 }
 0x12e   :  { %1092 = vrot.lane.b32.xlu1 %v6297_v24, %s5758_s14  ;;  %1090 = vrot.lane.b32.xlu0 %v6300_v26, %s5758_s14  ;;  %9383 = vst [vmem:[#allocation46_spill] sm:$0xff] %v6465_v21 }
 0x12f   :  { %v5069_v57 = vpop.f32.mrb[42].mxu0  ;;  %9384 = vst [vmem:[#allocation47_spill] sm:$0xff] %v6468_v16 }
 0x130   :  { %v685_v59 = vpop.f32.mrb[43].mxu0  ;;  %v6479_v11 = vadd.f32 %v5069_v57, %v6175_v36 }
 0x132   :  { %2605 = vperm.xlu1 %5361, %v6297_v24   ;;  %2601 = vperm.xlu0 %5362, %v6300_v26   ;;  %v6454_v26 = vadd.f32 %v6175_v36, %v665_v52  ;;  %9385 = vst [vmem:[#allocation48_spill] sm:$0xff] %v6479_v11  ;;  %v6482_v24 = vadd.f32 %v6175_v36, %v685_v59 }
 0x133   :  { %v6348_v0 = vpop.f32.mrb[44].mxu0 }
 0x134   :  { %v6350_v2 = vpop.f32.mrb[45].mxu0  ;;  %9382 = vst [vmem:[#allocation45_spill] sm:$0xff] %v6454_v26  ;;  %9386 = vst [vmem:[#allocation49_spill] sm:$0xff] %v6482_v24  ;;  %v6498_v57 = vadd.f32 %v6348_v0, %v6175_v36 }
 0x135   :  { %v6502_v59 = vadd.f32 %v6175_v36, %v6350_v2 }
 0x136   :  { %1096 = vrot.lane.b32.xlu1 %v6341_v61, %s5758_s14  ;;  %1094 = vrot.lane.b32.xlu0 %v6344_v62, %s5758_s14  ;;  %9388 = vst [vmem:[#allocation51_spill] sm:$0xff] %v6498_v57 }
 0x137   :  { %v6362_v8 = vpop.f32.mrb[46].mxu0  ;;  %9389 = vst [vmem:[#allocation52_spill] sm:$0xff] %v6502_v59 }
 0x138   :  { %v6364_v10 = vpop.f32.mrb[47].mxu0  ;;  %v6518_v0 = vadd.f32 %v6362_v8, %v6175_v36 }
 0x139   :  { %v6522_v2 = vadd.f32 %v6175_v36, %v6364_v10 }
 0x13a   :  { %1100 = vrot.lane.b32.xlu1 %v6353_v3, %s5758_s14  ;;  %1098 = vrot.lane.b32.xlu0 %v6356_v5, %s5758_s14  ;;  %9390 = vst [vmem:[#allocation53_spill] sm:$0xff] %v6518_v0 }
 0x13b   :  { %v6376_v17 = vpop.f32.mrb[48].mxu0  ;;  %9391 = vst [vmem:[#allocation54_spill] sm:$0xff] %v6522_v2 }
 0x13c   :  { %v6378_v20 = vpop.f32.mrb[49].mxu0  ;;  %v6538_v8 = vadd.f32 %v6376_v17, %v6175_v36 }
 0x13d   :  { %v6542_v10 = vadd.f32 %v6175_v36, %v6378_v20 }
 0x13e   :  { %1104 = vrot.lane.b32.xlu1 %v6367_v12, %s5758_s14  ;;  %1102 = vrot.lane.b32.xlu0 %v6370_v15, %s5758_s14  ;;  %9394 = vst [vmem:[#allocation57_spill] sm:$0xff] %v6538_v8 }
 0x13f   :  { %v6390_v27 = vpop.f32.mrb[50].mxu0  ;;  %9395 = vst [vmem:[#allocation58_spill] sm:$0xff] %v6542_v10 }
 0x140   :  { %v6392_v29 = vpop.f32.mrb[51].mxu0  ;;  %v6558_v17 = vadd.f32 %v6390_v27, %v6175_v36 }
 0x141   :  { %v6562_v20 = vadd.f32 %v6175_v36, %v6392_v29 }
 0x142   :  { %1108 = vrot.lane.b32.xlu1 %v6381_v22, %s5758_s14  ;;  %1106 = vrot.lane.b32.xlu0 %v6384_v25, %s5758_s14  ;;  %9397 = vst [vmem:[#allocation60_spill] sm:$0xff] %v6558_v17 }
 0x143   :  { %v6404_v32 = vpop.f32.mrb[52].mxu0  ;;  %9398 = vst [vmem:[#allocation61_spill] sm:$0xff] %v6562_v20 }
 0x144   :  { %v6406_v33 = vpop.f32.mrb[53].mxu0  ;;  %v6578_v27 = vadd.f32 %v6404_v32, %v6175_v36 }
 0x145   :  { %v6582_v29 = vadd.f32 %v6175_v36, %v6406_v33 }
 0x146   :  { %1112 = vrot.lane.b32.xlu1 %v6395_v30, %s5758_s14  ;;  %1110 = vrot.lane.b32.xlu0 %v6398_v31, %s5758_s14  ;;  %9399 = vst [vmem:[#allocation62_spill] sm:$0xff] %v6578_v27 }
 0x147   :  { %v6418_v37 = vpop.f32.mrb[54].mxu0  ;;  %9400 = vst [vmem:[#allocation63_spill] sm:$0xff] %v6582_v29 }
 0x148   :  { %v6420_v39 = vpop.f32.mrb[55].mxu0  ;;  %v6598_v32 = vadd.f32 %v6418_v37, %v6175_v36 }
 0x149   :  { %v6602_v33 = vadd.f32 %v6175_v36, %v6420_v39 }
 0x14a   :  { %1116 = vrot.lane.b32.xlu1 %v6409_v34, %s5758_s14  ;;  %1114 = vrot.lane.b32.xlu0 %v6412_v35, %s5758_s14  ;;  %9403 = vst [vmem:[#allocation66_spill] sm:$0xff] %v6598_v32 }
 0x14b   :  { %v6432_v41 = vpop.f32.mrb[56].mxu0  ;;  %9404 = vst [vmem:[#allocation67_spill] sm:$0xff] %v6602_v33 }
 0x14c   :  { %v6434_v42 = vpop.f32.mrb[57].mxu0  ;;  %v6618_v37 = vadd.f32 %v6432_v41, %v6175_v36 }
 0x14d   :  { %v6622_v39 = vadd.f32 %v6175_v36, %v6434_v42 }
 0x14e   :  { %1120 = vrot.lane.b32.xlu1 %v6423_v28, %s5758_s14  ;;  %1118 = vrot.lane.b32.xlu0 %v6426_v23, %s5758_s14  ;;  %9405 = vst [vmem:[#allocation68_spill] sm:$0xff] %v6618_v37 }
 0x14f   :  { %v6446_v44 = vpop.f32.mrb[58].mxu0  ;;  %9406 = vst [vmem:[#allocation69_spill] sm:$0xff] %v6622_v39 }
 0x150   :  { %v6448_v46 = vpop.f32.mrb[59].mxu0  ;;  %v6488_v54 = vpop.permute.xlu0 %1052  ;;  %v6638_v41 = vadd.f32 %v6446_v44, %v6175_v36 }
 0x151   :  { %v6642_v42 = vadd.f32 %v6175_v36, %v6448_v46 }
 0x152   :  { %1124 = vrot.lane.b32.xlu1 %v6437_v18, %s5758_s14  ;;  %1122 = vrot.lane.b32.xlu0 %v6440_v13, %s5758_s14  ;;  %9409 = vst [vmem:[#allocation72_spill] sm:$0xff] %v6638_v41 }
 0x153   :  { %v6460_v47 = vpop.f32.mrb[60].mxu0  ;;  %9410 = vst [vmem:[#allocation73_spill] sm:$0xff] %v6642_v42 }
 0x154   :  { %v6462_v49 = vpop.f32.mrb[61].mxu0  ;;  %v6512_v4 = vpop.permute.xlu0 %1050  ;;  %v6658_v44 = vadd.f32 %v6460_v47, %v6175_v36 }
 0x155   :  { %v6662_v46 = vadd.f32 %v6175_v36, %v6462_v49 }
 0x156   :  { %1128 = vrot.lane.b32.xlu1 %v6451_v7, %s5758_s14  ;;  %1126 = vrot.lane.b32.xlu0 %v6454_v26, %s5758_s14  ;;  %9411 = vst [vmem:[#allocation74_spill] sm:$0xff] %v6658_v44 }
 0x157   :  { %v6474_v51 = vpop.f32.mrb[62].mxu0  ;;  %9412 = vst [vmem:[#allocation75_spill] sm:$0xff] %v6662_v46 }
 0x158   :  { %v6476_v52 = vpop.f32.mrb[63].mxu0  ;;  %v6678_v47 = vadd.f32 %v6474_v51, %v6175_v36 }
 0x159   :  { %v6682_v49 = vadd.f32 %v6175_v36, %v6476_v52 }
 0x15a   :  { %1132 = vrot.lane.b32.xlu1 %v6465_v21, %s5758_s14  ;;  %1130 = vrot.lane.b32.xlu0 %v6468_v16, %s5758_s14  ;;  %9415 = vst [vmem:[#allocation78_spill] sm:$0xff] %v6678_v47 }
 0x15b   :  { %v6490_v56 = vpop.f32.mrb[64].mxu0  ;;  %9416 = vst [vmem:[#allocation79_spill] sm:$0xff] %v6682_v49 }
 0x15c   :  { %v6492_v6 = vpop.f32.mrb[65].mxu0  ;;  %v6700_v52 = vadd.f32 %v6490_v56, %v6175_v36 }
 0x15d   :  { %v6494_v19 = vpop.permute.xlu1 %2525 }
 0x15e   :  { %9387 = vst [vmem:[#allocation50_spill] sm:$0xff] %v6494_v19  ;;  %1136 = vrot.lane.b32.xlu1 %v6479_v11, %s5758_s14  ;;  %1134 = vrot.lane.b32.xlu0 %v6482_v24, %s5758_s14  ;;  %9419 = vst [vmem:[#allocation82_spill] sm:$0xff] %v6700_v52 }
 0x15f   :  { %v6508_v14 = vpop.f32.mrb[66].mxu0 }
 0x160   :  { %v6510_v9 = vpop.f32.mrb[67].mxu0 }
 0x161   :  { %v6514_v19 = vpop.permute.xlu1 %1056 }
 0x162   :  { %1140 = vrot.lane.b32.xlu1 %v6498_v57, %s5758_s14  ;;  %1138 = vrot.lane.b32.xlu0 %v6502_v59, %s5758_s14 }
 0x163   :  { %v6528_v11 = vpop.f32.mrb[68].mxu0 }
 0x164   :  { %v6530_v21 = vpop.f32.mrb[69].mxu0 }
 0x165   :  { %v6532_v7 = vpop.permute.xlu1 %2533  ;;  %v6534_v18 = vpop.permute.xlu0 %2521 }
 0x166   :  { %9392 = vst [vmem:[#allocation55_spill] sm:$0xff] %v6532_v7  ;;  %9393 = vst [vmem:[#allocation56_spill] sm:$0xff] %v6534_v18  ;;  %1144 = vrot.lane.b32.xlu1 %v6518_v0, %s5758_s14  ;;  %1142 = vrot.lane.b32.xlu0 %v6522_v2, %s5758_s14 }
 0x167   :  { %v6548_v59 = vpop.f32.mrb[70].mxu0 }
 0x168   :  { %v6550_v57 = vpop.f32.mrb[71].mxu0 }
 0x169   :  { %v6552_v7 = vpop.permute.xlu1 %1054  ;;  %v6554_v18 = vpop.permute.xlu0 %2529 }
 0x16a   :  { %9396 = vst [vmem:[#allocation59_spill] sm:$0xff] %v6554_v18  ;;  %1148 = vrot.lane.b32.xlu1 %v6538_v8, %s5758_s14  ;;  %1146 = vrot.lane.b32.xlu0 %v6542_v10, %s5758_s14 }
 0x16b   :  { %v6568_v2 = vpop.f32.mrb[72].mxu0 }
 0x16c   :  { %v6570_v0 = vpop.f32.mrb[73].mxu0 }
 0x16d   :  { %v6572_v28 = vpop.permute.xlu1 %1060  ;;  %v6574_v18 = vpop.permute.xlu0 %1058 }
 0x16e   :  { %1152 = vrot.lane.b32.xlu1 %v6558_v17, %s5758_s14  ;;  %1150 = vrot.lane.b32.xlu0 %v6562_v20, %s5758_s14 }
 0x16f   :  { %v6588_v8 = vpop.f32.mrb[74].mxu0 }
 0x170   :  { %v6590_v10 = vpop.f32.mrb[75].mxu0  ;;  %v6798_v25 = vadd.f32 %v6588_v8, %v6175_v36 }
 0x171   :  { %v6592_v34 = vpop.permute.xlu1 %2541  ;;  %v6594_v30 = vpop.permute.xlu0 %2537 }
 0x172   :  { %9401 = vst [vmem:[#allocation64_spill] sm:$0xff] %v6592_v34  ;;  %9402 = vst [vmem:[#allocation65_spill] sm:$0xff] %v6594_v30  ;;  %1156 = vrot.lane.b32.xlu1 %v6578_v27, %s5758_s14  ;;  %1154 = vrot.lane.b32.xlu0 %v6582_v29, %s5758_s14 }
 0x173   :  { %v6608_v17 = vpop.f32.mrb[76].mxu0  ;;  %9439 = vst [vmem:[#allocation102_spill] sm:$0xff] %v6798_v25 }
 0x174   :  { %v6610_v20 = vpop.f32.mrb[77].mxu0 }
 0x175   :  { %v6612_v34 = vpop.permute.xlu1 %1064  ;;  %v6614_v30 = vpop.permute.xlu0 %1062  ;;  %v6818_v8 = vadd.f32 %v6175_v36, %v6610_v20 }
 0x176   :  { %1160 = vrot.lane.b32.xlu1 %v6598_v32, %s5758_s14  ;;  %1158 = vrot.lane.b32.xlu0 %v6602_v33, %s5758_s14 }
 0x177   :  { %v6628_v27 = vpop.f32.mrb[78].mxu0  ;;  %9442 = vst [vmem:[#allocation105_spill] sm:$0xff] %v6818_v8 }
 0x178   :  { %v6630_v29 = vpop.f32.mrb[79].mxu0 }
 0x179   :  { %v6632_v24 = vpop.permute.xlu1 %2549  ;;  %v6634_v16 = vpop.permute.xlu0 %2545 }
 0x17a   :  { %9407 = vst [vmem:[#allocation70_spill] sm:$0xff] %v6632_v24  ;;  %9408 = vst [vmem:[#allocation71_spill] sm:$0xff] %v6634_v16  ;;  %1164 = vrot.lane.b32.xlu1 %v6618_v37, %s5758_s14  ;;  %1162 = vrot.lane.b32.xlu0 %v6622_v39, %s5758_s14 }
 0x17b   :  { %v6648_v32 = vpop.f32.mrb[80].mxu0 }
 0x17c   :  { %v6650_v33 = vpop.f32.mrb[81].mxu0 }
 0x17d   :  { %v6652_v24 = vpop.permute.xlu1 %1068  ;;  %v6654_v16 = vpop.permute.xlu0 %1066 }
 0x17e   :  { %1168 = vrot.lane.b32.xlu1 %v6638_v41, %s5758_s14  ;;  %1166 = vrot.lane.b32.xlu0 %v6642_v42, %s5758_s14 }
 0x17f   :  { %v6668_v37 = vpop.f32.mrb[82].mxu0 }
 0x180   :  { %v6670_v39 = vpop.f32.mrb[83].mxu0 }
 0x181   :  { %v6672_v26 = vpop.permute.xlu1 %2557  ;;  %v6674_v13 = vpop.permute.xlu0 %2553 }
 0x182   :  { %9413 = vst [vmem:[#allocation76_spill] sm:$0xff] %v6672_v26  ;;  %9414 = vst [vmem:[#allocation77_spill] sm:$0xff] %v6674_v13  ;;  %1172 = vrot.lane.b32.xlu1 %v6658_v44, %s5758_s14  ;;  %1170 = vrot.lane.b32.xlu0 %v6662_v46, %s5758_s14  ;;  %v6704_v44 = vadd.f32 %v6175_v36, %v6492_v6 }
 0x183   :  { %v5132_v42 = vpop.f32.mrb[84].mxu0 }
 0x184   :  { %v6689_v41 = vadd.f32 %v5132_v42, %v6175_v36  ;;  %v895_v26 = vpop.f32.mrb[85].mxu0  ;;  %9420 = vst [vmem:[#allocation83_spill] sm:$0xff] %v6704_v44 }
 0x185   :  { %v6691_v13 = vpop.permute.xlu1 %1072  ;;  %v6693_v23 = vpop.permute.xlu0 %1070  ;;  %v6696_v51 = vadd.f32 %v6175_v36, %v895_v26 }
 0x186   :  { %9417 = vst [vmem:[#allocation80_spill] sm:$0xff] %v6689_v41  ;;  %1176 = vrot.lane.b32.xlu1 %v6678_v47, %s5758_s14  ;;  %1174 = vrot.lane.b32.xlu0 %v6682_v49, %s5758_s14  ;;  %v6727_v49 = vadd.f32 %v6508_v14, %v6175_v36  ;;  %v6731_v47 = vadd.f32 %v6175_v36, %v6510_v9 }
 0x187   :  { %9418 = vst [vmem:[#allocation81_spill] sm:$0xff] %v6696_v51  ;;  %v5135_v42 = vpop.f32.mrb[86].mxu0  ;;  %v6712_v46 = vpack.c.bf16 %v6689_v41, %v6696_v51  ;;  %v6749_v9 = vadd.f32 %v6528_v11, %v6175_v36  ;;  %v6766_v11 = vadd.f32 %v6548_v59, %v6175_v36  ;;  %v6782_v59 = vadd.f32 %v6568_v2, %v6175_v36 }
 0x188   :  { %v6715_v26 = vadd.f32 %v5135_v42, %v6175_v36  ;;  %v905_v56 = vpop.f32.mrb[87].mxu0  ;;  %9426 = vst [vmem:[#allocation89_spill] sm:$0xff] %v6727_v49  ;;  %9427 = vst [vmem:[#allocation90_spill] sm:$0xff] %v6731_v47  ;;  %v6802_v2 = vadd.f32 %v6175_v36, %v6590_v10 }
 0x189   :  { %9421 = vst [vmem:[#allocation84_spill] sm:$0xff] %v6712_v46  ;;  %v6717_v35 = vpop.permute.xlu1 %2565  ;;  %v6719_v1 = vpop.permute.xlu0 %2561  ;;  %v6722_v6 = vadd.f32 %v6175_v36, %v905_v56  ;;  %5316 = vmatprep.subr.bf16.mxu0 %v6712_v46  ;;  %9429 = vst [vmem:[#allocation92_spill] sm:$0xff] %v6749_v9 }
 0x18a   :  { %9422 = vst [vmem:[#allocation85_spill] sm:$0xff] %v6715_v26  ;;  %9423 = vst [vmem:[#allocation86_spill] sm:$0xff] %v6717_v35  ;;  %1180 = vrot.lane.b32.xlu1 %v6700_v52, %s5758_s14  ;;  %1178 = vrot.lane.b32.xlu0 %v6704_v44, %s5758_s14  ;;  %v6753_v44 = vadd.f32 %v6175_v36, %v6530_v21  ;;  %v6770_v21 = vadd.f32 %v6175_v36, %v6550_v57 }
 0x18b   :  { %9424 = vst [vmem:[#allocation87_spill] sm:$0xff] %v6719_v1  ;;  %9425 = vst [vmem:[#allocation88_spill] sm:$0xff] %v6722_v6  ;;  %5317 = vmatpush3.bf16.msra.mxu0 %v6712_v46  ;;  %v6740_v42 = vpack.c.bf16 %v6715_v26, %v6722_v6  ;;  %v5138_v56 = vpop.f32.mrb[88].mxu0  ;;  %v6786_v57 = vadd.f32 %v6175_v36, %v6570_v0 }
 0x18c   :  { %v915_v35 = vpop.f32.mrb[89].mxu0  ;;  %9430 = vst [vmem:[#allocation93_spill] sm:$0xff] %v6753_v44  ;;  %9433 = vst [vmem:[#allocation96_spill] sm:$0xff] %v6766_v11 }
 0x18d   :  { %9428 = vst [vmem:[#allocation91_spill] sm:$0xff] %v6740_v42  ;;  %v6742_v14 = vpop.permute.xlu1 %1076  ;;  %v6744_v1 = vpop.permute.xlu0 %1074  ;;  %5318 = vmatprep.subr.bf16.mxu0 %v6740_v42  ;;  %9434 = vst [vmem:[#allocation97_spill] sm:$0xff] %v6770_v21 }
 0x18e   :  { %1184 = vrot.lane.b32.xlu1 %v6727_v49, %s5758_s14  ;;  %1182 = vrot.lane.b32.xlu0 %v6731_v47, %s5758_s14  ;;  %9435 = vst [vmem:[#allocation98_spill] sm:$0xff] %v6782_v59  ;;  %9436 = vst [vmem:[#allocation99_spill] sm:$0xff] %v6786_v57 }
 0x18f   :  { %5319 = vmatpush3.bf16.msra.mxu0 %v6740_v42  ;;  %v5141_v46 = vpop.f32.mrb[90].mxu0  ;;  %9440 = vst [vmem:[#allocation103_spill] sm:$0xff] %v6802_v2 }
 0x190   :  { %v925_v52 = vpop.f32.mrb[91].mxu0 }
 0x191   :  { %v6760_v38 = vpop.permute.xlu1 %2573  ;;  %v6762_v31 = vpop.permute.xlu0 %2569 }
 0x192   :  { %9431 = vst [vmem:[#allocation94_spill] sm:$0xff] %v6760_v38  ;;  %9432 = vst [vmem:[#allocation95_spill] sm:$0xff] %v6762_v31  ;;  %1188 = vrot.lane.b32.xlu1 %v6749_v9, %s5758_s14  ;;  %1186 = vrot.lane.b32.xlu0 %v6753_v44, %s5758_s14 }
 0x193   :  { %v5144_v42 = vpop.f32.mrb[92].mxu0 }
 0x194   :  { %v935_v47 = vpop.f32.mrb[93].mxu0 }
 0x195   :  { %v6776_v49 = vpop.permute.xlu1 %1080  ;;  %v6778_v38 = vpop.permute.xlu0 %1078 }
 0x196   :  { %1192 = vrot.lane.b32.xlu1 %v6766_v11, %s5758_s14  ;;  %1190 = vrot.lane.b32.xlu0 %v6770_v21, %s5758_s14 }
 0x197   :  { %v5147_v31 = vpop.f32.mrb[94].mxu0 }
 0x199   :  { %v6792_v44 = vpop.permute.xlu1 %2581  ;;  %v6794_v9 = vpop.permute.xlu0 %2577 }
 0x19a   :  { %9437 = vst [vmem:[#allocation100_spill] sm:$0xff] %v6792_v44  ;;  %9438 = vst [vmem:[#allocation101_spill] sm:$0xff] %v6794_v9  ;;  %1196 = vrot.lane.b32.xlu1 %v6782_v59, %s5758_s14  ;;  %1194 = vrot.lane.b32.xlu0 %v6786_v57, %s5758_s14  ;;  %v6814_v44 = vadd.f32 %v6608_v17, %v6175_v36  ;;  %v6830_v57 = vadd.f32 %v6628_v27, %v6175_v36 }
 0x19b   :  { %v6834_v17 = vadd.f32 %v6175_v36, %v6630_v29  ;;  %v6849_v27 = vadd.f32 %v6648_v32, %v6175_v36  ;;  %v6853_v29 = vadd.f32 %v6175_v36, %v6650_v33  ;;  %v6867_v32 = vadd.f32 %v6175_v36, %v925_v52 }
 0x19c   :  { %9441 = vst [vmem:[#allocation104_spill] sm:$0xff] %v6814_v44  ;;  %9445 = vst [vmem:[#allocation108_spill] sm:$0xff] %v6830_v57  ;;  %v6886_v52 = vadd.f32 %v5141_v46, %v6175_v36  ;;  %v6906_v46 = vadd.f32 %v5144_v42, %v6175_v36  ;;  %v945_v42 = vpop.f32.mrb[95].mxu0 }
 0x19d   :  { %v6808_v0 = vpop.permute.xlu1 %1084  ;;  %v6810_v21 = vpop.permute.xlu0 %1082  ;;  %9446 = vst [vmem:[#allocation109_spill] sm:$0xff] %v6834_v17  ;;  %9448 = vst [vmem:[#allocation111_spill] sm:$0xff] %v6849_v27 }
 0x19e   :  { %1200 = vrot.lane.b32.xlu1 %v6798_v25, %s5758_s14  ;;  %1198 = vrot.lane.b32.xlu0 %v6802_v2, %s5758_s14  ;;  %9449 = vst [vmem:[#allocation112_spill] sm:$0xff] %v6853_v29  ;;  %9453 = vst [vmem:[#allocation116_spill] sm:$0xff] %v6867_v32 }
 0x19f   :  { %9457 = vst [vmem:[#allocation120_spill] sm:$0xff] %v6886_v52  ;;  %9460 = vst [vmem:[#allocation123_spill] sm:$0xff] %v6906_v46 }
 0x1a1   :  { %v6824_v10 = vpop.permute.xlu1 %2589  ;;  %v6826_v9 = vpop.permute.xlu0 %2585 }
 0x1a2   :  { %9443 = vst [vmem:[#allocation106_spill] sm:$0xff] %v6824_v10  ;;  %9444 = vst [vmem:[#allocation107_spill] sm:$0xff] %v6826_v9  ;;  %1204 = vrot.lane.b32.xlu1 %v6814_v44, %s5758_s14  ;;  %1202 = vrot.lane.b32.xlu0 %v6818_v8, %s5758_s14  ;;  %v6845_v9 = vadd.f32 %v6175_v36, %v915_v35  ;;  %v6860_v10 = vadd.f32 %v5138_v56, %v6175_v36 }
 0x1a4   :  { %9447 = vst [vmem:[#allocation110_spill] sm:$0xff] %v6845_v9  ;;  %9450 = vst [vmem:[#allocation113_spill] sm:$0xff] %v6860_v10  ;;  %v6871_v33 = vpack.c.bf16 %v6860_v10, %v6845_v9 }
 0x1a5   :  { %v6840_v20 = vpop.permute.xlu1 %1088  ;;  %v6842_v2 = vpop.permute.xlu0 %1086 }
 0x1a6   :  { %1208 = vrot.lane.b32.xlu1 %v6830_v57, %s5758_s14  ;;  %1206 = vrot.lane.b32.xlu0 %v6834_v17, %s5758_s14  ;;  %9454 = vst [vmem:[#allocation117_spill] sm:$0xff] %v6871_v33  ;;  %v6875_v57 = vadd.f32 %v6668_v37, %v6175_v36  ;;  %v6879_v17 = vadd.f32 %v6175_v36, %v6670_v39 }
 0x1a7   :  { %5320 = vmatprep.subr.bf16.mxu0 %v6871_v33  ;;  %v6895_v39 = vadd.f32 %v6175_v36, %v935_v47 }
 0x1a8   :  { %9455 = vst [vmem:[#allocation118_spill] sm:$0xff] %v6875_v57  ;;  %9456 = vst [vmem:[#allocation119_spill] sm:$0xff] %v6879_v17  ;;  %5321 = vmatpush3.bf16.msra.mxu0 %v6871_v33 }
 0x1a9   :  { %v6862_v8 = vpop.permute.xlu1 %2597  ;;  %v6864_v35 = vpop.permute.xlu0 %2593  ;;  %9458 = vst [vmem:[#allocation121_spill] sm:$0xff] %v6895_v39 }
 0x1aa   :  { %9451 = vst [vmem:[#allocation114_spill] sm:$0xff] %v6862_v8  ;;  %9452 = vst [vmem:[#allocation115_spill] sm:$0xff] %v6864_v35  ;;  %1212 = vrot.lane.b32.xlu1 %v6849_v27, %s5758_s14  ;;  %1210 = vrot.lane.b32.xlu0 %v6853_v29, %s5758_s14  ;;  %v6899_v8 = vpack.c.bf16 %v6886_v52, %v6867_v32  ;;  %v6916_v35 = vpack.c.bf16 %v6906_v46, %v6895_v39 }
 0x1ac   :  { %9459 = vst [vmem:[#allocation122_spill] sm:$0xff] %v6899_v8  ;;  %5322 = vmatprep.subr.bf16.mxu0 %v6899_v8  ;;  %9463 = vst [vmem:[#allocation126_spill] sm:$0xff] %v6916_v35 }
 0x1ad   :  { %v6890_v56 = vpop.permute.xlu1 %1092  ;;  %v6892_v37 = vpop.permute.xlu0 %1090  ;;  %5323 = vmatpush3.bf16.msra.mxu0 %v6899_v8  ;;  %v6926_v8 = vadd.f32 %v6175_v36, %v945_v42 }
 0x1ae   :  { %1216 = vrot.lane.b32.xlu1 %v6875_v57, %s5758_s14  ;;  %1214 = vrot.lane.b32.xlu0 %v6879_v17, %s5758_s14  ;;  %v6923_v17 = vadd.f32 %v5147_v31, %v6175_v36 }
 0x1af   :  { %9465 = vst [vmem:[#allocation128_spill] sm:$0xff] %v6926_v8  ;;  %5324 = vmatprep.subr.bf16.mxu0 %v6916_v35 }
 0x1b0   :  { %9464 = vst [vmem:[#allocation127_spill] sm:$0xff] %v6923_v17  ;;  %v6936_v57 = vpack.c.bf16 %v6923_v17, %v6926_v8 }
 0x1b1   :  { %v6910_v33 = vpop.permute.xlu1 %2605  ;;  %v6912_v47 = vpop.permute.xlu0 %2601  ;;  %5325 = vmatpush3.bf16.msra.mxu0 %v6916_v35 }
 0x1b2   :  { %9461 = vst [vmem:[#allocation124_spill] sm:$0xff] %v6910_v33  ;;  %9462 = vst [vmem:[#allocation125_spill] sm:$0xff] %v6912_v47  ;;  %1220 = vrot.lane.b32.xlu1 %v6689_v41, %s5758_s14  ;;  %1218 = vrot.lane.b32.xlu0 %v6696_v51, %s5758_s14 }
 0x1b3   :  { %9466 = vst [vmem:[#allocation129_spill] sm:$0xff] %v6936_v57  ;;  %5326 = vmatprep.subr.bf16.mxu0 %v6936_v57 }
 0x1b5   :  { %v6930_v47 = vpop.permute.xlu1 %1096  ;;  %v6932_v33 = vpop.permute.xlu0 %1094  ;;  %5327 = vmatpush3.bf16.msra.mxu0 %v6936_v57 }
 0x1b6   :  { %1224 = vrot.lane.b32.xlu1 %v6715_v26, %s5758_s14  ;;  %1222 = vrot.lane.b32.xlu0 %v6722_v6, %s5758_s14 }
 0x1b9   :  { %v6944_v36 = vpop.permute.xlu1 %1100  ;;  %v6946_v31 = vpop.permute.xlu0 %1098 }
 0x1ba   :  { %1228 = vrot.lane.b32.xlu1 %v6860_v10, %s5758_s14 }
 0x1bd   :  { %v6950_v42 = vpop.permute.xlu1 %1104  ;;  %v6952_v35 = vpop.permute.xlu0 %1102 }
 0x1be   :  { %1232 = vrot.lane.b32.xlu1 %v6886_v52, %s5758_s14 }
 0x1c1   :  { %v6956_v29 = vpop.permute.xlu1 %1108  ;;  %v6958_v27 = vpop.permute.xlu0 %1106 }
 0x1c2   :  { %1236 = vrot.lane.b32.xlu1 %v6906_v46, %s5758_s14 }
 0x1c5   :  { %v6962_v57 = vpop.permute.xlu1 %1112  ;;  %v6964_v44 = vpop.permute.xlu0 %1110 }
 0x1c6   :  { %1240 = vrot.lane.b32.xlu1 %v6923_v17, %s5758_s14 }
 0x1c9   :  { %v6968_v25 = vpop.permute.xlu1 %1116  ;;  %v6970_v59 = vpop.permute.xlu0 %1114 }
 0x1cd   :  { %v6972_v10 = vpop.permute.xlu1 %1120  ;;  %v6974_v52 = vpop.permute.xlu0 %1118 }
 0x1d1   :  { %v6976_v6 = vpop.permute.xlu1 %1124  ;;  %v6978_v26 = vpop.permute.xlu0 %1122 }
 0x1d4   :  { %1338 = vxpose.xlu0.b32.start [1/16] (narrow) %v6512_v4, 8 }
 0x1d5   :  { %v6981_v46 = vpop.permute.xlu1 %1128  ;;  %v6983_v51 = vpop.permute.xlu0 %1126 }
 0x1d8   :  { %1339 = vxpose.xlu0.b32.cont [2/16] (narrow) %v6488_v54, 8 }
 0x1d9   :  { %v6986_v17 = vpop.permute.xlu1 %1132  ;;  %v6988_v41 = vpop.permute.xlu0 %1130 }
 0x1dc   :  { %1340 = vxpose.xlu0.b32.cont [3/16] (narrow) %v6552_v7, 8 }
 0x1dd   :  { %v6991_v11 = vpop.permute.xlu1 %1136  ;;  %v6993_v15 = vpop.permute.xlu0 %1134 }
 0x1e0   :  { %1341 = vxpose.xlu0.b32.cont [4/16] (narrow) %v6514_v19, 8 }
 0x1e1   :  { %v6996_v5 = vpop.permute.xlu1 %1140  ;;  %v6998_v4 = vpop.permute.xlu0 %1138 }
 0x1e4   :  { %1342 = vxpose.xlu0.b32.cont [5/16] (narrow) %v6574_v18, 8 }
 0x1e5   :  { %v7001_v62 = vpop.permute.xlu1 %1144  ;;  %v7003_v54 = vpop.permute.xlu0 %1142 }
 0x1e8   :  { %1343 = vxpose.xlu0.b32.cont [6/16] (narrow) %v6572_v28, 8 }
 0x1e9   :  { %v7006_v63 = vpop.permute.xlu1 %1148  ;;  %v7008_v7 = vpop.permute.xlu0 %1146 }
 0x1ec   :  { %1344 = vxpose.xlu0.b32.cont [7/16] (narrow) %v6614_v30, 8 }
 0x1ed   :  { %v7011_v60 = vpop.permute.xlu1 %1152  ;;  %v7013_v19 = vpop.permute.xlu0 %1150 }
 0x1ef   :  { %1370 = vxpose.xlu1.b32.start [1/16] (narrow) %v6810_v21, 8 }
 0x1f0   :  { %1345 = vxpose.xlu0.b32.cont [8/16] (narrow) %v6612_v34, 8 }
 0x1f1   :  { %v7017_v18 = vpop.permute.xlu1 %1156  ;;  %v7019_v58 = vpop.permute.xlu0 %1154 }
 0x1f3   :  { %1371 = vxpose.xlu1.b32.cont [2/16] (narrow) %v6808_v0, 8 }
 0x1f4   :  { %1346 = vxpose.xlu0.b32.cont [9/16] (narrow) %v6654_v16, 8 }
 0x1f5   :  { %v7023_v28 = vpop.permute.xlu1 %1160  ;;  %v7025_v53 = vpop.permute.xlu0 %1158 }
 0x1f7   :  { %1372 = vxpose.xlu1.b32.cont [3/16] (narrow) %v6842_v2, 8 }
 0x1f8   :  { %1347 = vxpose.xlu0.b32.cont [10/16] (narrow) %v6652_v24, 8 }
 0x1f9   :  { %v7029_v30 = vpop.permute.xlu0 %1162  ;;  %v7031_v21 = vpop.permute.xlu1 %1164 }
 0x1fb   :  { %1373 = vxpose.xlu1.b32.cont [4/16] (narrow) %v6840_v20, 8 }
 0x1fc   :  { %1348 = vxpose.xlu0.b32.cont [11/16] (narrow) %v6693_v23, 8 }
 0x1fd   :  { %v7035_v34 = vpop.permute.xlu0 %1166  ;;  %v7039_v16 = vpop.permute.xlu1 %1168 }
 0x1ff   :  { %1374 = vxpose.xlu1.b32.cont [5/16] (narrow) %v6892_v37, 8 }
 0x200   :  { %1349 = vxpose.xlu0.b32.cont [12/16] (narrow) %v6691_v13, 8 }
 0x201   :  { %v7041_v0 = vpop.permute.xlu0 %1170  ;;  %v7045_v24 = vpop.permute.xlu1 %1172 }
 0x203   :  { %1375 = vxpose.xlu1.b32.cont [6/16] (narrow) %v6890_v56, 8 }
 0x204   :  { %1350 = vxpose.xlu0.b32.cont [13/16] (narrow) %v6744_v1, 8 }
 0x205   :  { %v7048_v2 = vpop.permute.xlu0 %1174  ;;  %v7053_v13 = vpop.permute.xlu1 %1176 }
 0x207   :  { %1376 = vxpose.xlu1.b32.cont [7/16] (narrow) %v6932_v33, 8 }
 0x208   :  { %1351 = vxpose.xlu0.b32.cont [14/16] (narrow) %v6742_v14, 8 }
 0x209   :  { %v7055_v23 = vpop.permute.xlu0 %1178  ;;  %v7059_v1 = vpop.permute.xlu1 %1180 }
 0x20b   :  { %1377 = vxpose.xlu1.b32.cont [8/16] (narrow) %v6930_v47, 8 }
 0x20c   :  { %1352 = vxpose.xlu0.b32.cont [15/16] (narrow) %v6778_v38, 8 }
 0x20d   :  { %v7062_v20 = vpop.permute.xlu0 %1182  ;;  %v7065_v14 = vpop.permute.xlu1 %1184 }
 0x20f   :  { %1378 = vxpose.xlu1.b32.cont [9/16] (narrow) %v6946_v31, 8 }
 0x210   :  { %1353 = vxpose.xlu0.b32.end [16/16] (narrow) %v6776_v49, 8 }
 0x211   :  { %v7067_v33 = vpop.permute.xlu0 %1186  ;;  %v7070_v38 = vpop.permute.xlu1 %1188 }
 0x213   :  { %1379 = vxpose.xlu1.b32.cont [10/16] (narrow) %v6944_v36, 8 }
 0x215   :  { %v7073_v56 = vpop.permute.xlu0 %1190  ;;  %v7076_v49 = vpop.permute.xlu1 %1192 }
 0x217   :  { %1380 = vxpose.xlu1.b32.cont [11/16] (narrow) %v6952_v35, 8 }
 0x219   :  { %v7078_v37 = vpop.permute.xlu0 %1194  ;;  %v7081_v35 = vpop.permute.xlu1 %1196 }
 0x21b   :  { %1381 = vxpose.xlu1.b32.cont [12/16] (narrow) %v6950_v42, 8 }
 0x21d   :  { %v7084_v47 = vpop.permute.xlu0 %1198  ;;  %v7086_v36 = vpop.permute.xlu1 %1200 }
 0x21f   :  { %1382 = vxpose.xlu1.b32.cont [13/16] (narrow) %v6958_v27, 8 }
 0x221   :  { %v7088_v31 = vpop.permute.xlu0 %1202  ;;  %v7090_v27 = vpop.permute.xlu1 %1204 }
 0x223   :  { %1383 = vxpose.xlu1.b32.cont [14/16] (narrow) %v6956_v29, 8 }
 0x225   :  { %v7092_v42 = vpop.permute.xlu0 %1206  ;;  %v7096_v29 = vpop.permute.xlu1 %1208 }
 0x227   :  { %1384 = vxpose.xlu1.b32.cont [15/16] (narrow) %v6964_v44, 8 }
 0x229   :  { %v7100_v44 = vpop.permute.xlu0 %1210 }
 0x22b   :  { %1385 = vxpose.xlu1.b32.end [16/16] (narrow) %v6962_v57, 8  ;;  %v7104_v57 = vpop.permute.xlu1 %1212 }
 0x22d   :  { %v7106_v55 = vpop.permute.xlu0 %1214 }
 0x22f   :  { %v7110_v48 = vpop.permute.xlu1 %1216 }
 0x230   :  { %9467 = vst [vmem:[#allocation130_spill] sm:$0xff] %v7110_v48 }
 0x233   :  { %v7114_v50 = vpop.permute.xlu1 %1220 }
 0x234   :  { %9468 = vst [vmem:[#allocation131_spill] sm:$0xff] %v7114_v50 }
 0x237   :  { %v7118_v45 = vpop.permute.xlu1 %1224 }
 0x238   :  { %9469 = vst [vmem:[#allocation132_spill] sm:$0xff] %v7118_v45 }
 0x239   :  { %1226 = vrot.lane.b32.xlu0 %v6845_v9, %s5758_s14  ;;  %v7112_v9 = vpop.permute.xlu0 %1218 }
 0x23d   :  { %1230 = vrot.lane.b32.xlu0 %v6867_v32, %s5758_s14  ;;  %v7116_v43 = vpop.permute.xlu0 %1222 }
 0x241   :  { %1234 = vrot.lane.b32.xlu0 %v6895_v39, %s5758_s14  ;;  %v7121_v39 = vpop.permute.xlu1 %1228 }
 0x242   :  { %9470 = vst [vmem:[#allocation133_spill] sm:$0xff] %v7121_v39 }
 0x245   :  { %1238 = vrot.lane.b32.xlu0 %v6926_v8, %s5758_s14  ;;  %v7127_v48 = vpop.permute.xlu1 %1232 }
 0x249   :  { %v7130_v50 = vpop.permute.xlu1 %1236 }
 0x24d   :  { %v7134_v45 = vpop.permute.xlu1 %1240 }
 0x254   :  { %v1354_v32 = vpop.trf.xlu0 }
 0x255   :  { %1531 = vst.msk [vmem:[#allocation2] sm:$0x1] %vm1530_vm1, %v1354_v32 }
 0x25c   :  { %v7123_v40 = vld [vmem:[#allocation2] sm:$0x1] }
 0x25d   :  { %v1616_v8 = vsel %vm1530_vm1, %v7123_v40, inf }
 0x25e   :  { %1617 = vmin.xlane.f32.xlu1 %v1616_v8 }
 0x263   :  { %1402 = vxpose.xlu0.b32.start [1/16] (narrow) %v6970_v59, 8  ;;  %v9472_v59 = vld [vmem:[#allocation131_spill] sm:$0xff] }
 0x267   :  { %1403 = vxpose.xlu0.b32.cont [2/16] (narrow) %v6968_v25, 8 }
 0x26b   :  { %1404 = vxpose.xlu0.b32.cont [3/16] (narrow) %v6974_v52, 8  ;;  %v9475_v52 = vld [vmem:[#allocation5_spill] sm:$0xff] }
 0x26c   :  { %vm1643_vm5 = vcmp.ge.f32.partialorder %v9475_v52, 0.0 }
 0x26f   :  { %1405 = vxpose.xlu0.b32.cont [4/16] (narrow) %v6972_v10, 8  ;;  %v1386_v39 = vpop.trf.xlu1 }
 0x270   :  { %1536 = vrot.lane.b32.xlu1 %v1386_v39, %s5759_s0 }
 0x273   :  { %1406 = vxpose.xlu0.b32.cont [5/16] (narrow) %v6978_v26, 8 }
 0x277   :  { %1407 = vxpose.xlu0.b32.cont [6/16] (narrow) %v6976_v6, 8 }
 0x27b   :  { %1408 = vxpose.xlu0.b32.cont [7/16] (narrow) %v6983_v51, 8 }
 0x27f   :  { %1409 = vxpose.xlu0.b32.cont [8/16] (narrow) %v6981_v46, 8  ;;  %v9476_v46 = vld [vmem:[#allocation8_spill] sm:$0xff] }
 0x280   :  { %vm1644_vm6 = vcmp.ge.f32.partialorder %v9476_v46, 0.0 }
 0x283   :  { %1410 = vxpose.xlu0.b32.cont [9/16] (narrow) %v6988_v41, 8 }
 0x287   :  { %1411 = vxpose.xlu0.b32.cont [10/16] (narrow) %v6986_v17, 8  ;;  %v9473_v17 = vld [vmem:[#allocation4_spill] sm:$0xff] }
 0x288   :  { %vm1640_vm3 = vcmp.ge.f32.partialorder %v9473_v17, 0.0 }
 0x28b   :  { %1412 = vxpose.xlu0.b32.cont [11/16] (narrow) %v6993_v15, 8 }
 0x28f   :  { %1413 = vxpose.xlu0.b32.cont [12/16] (narrow) %v6991_v11, 8 }
 0x293   :  { %1414 = vxpose.xlu0.b32.cont [13/16] (narrow) %v6998_v4, 8  ;;  %v9478_v4 = vld [vmem:[#allocation10_spill] sm:$0xff] }
 0x294   :  { %vm1646_vm9 = vcmp.ge.f32.partialorder %v9478_v4, 0.0 }
 0x297   :  { %1415 = vxpose.xlu0.b32.cont [14/16] (narrow) %v6996_v5, 8  ;;  %v1592_v5 = vsel %vm1530_vm1, %v7123_v40, -inf }
 0x29b   :  { %1416 = vxpose.xlu0.b32.cont [15/16] (narrow) %v7003_v54, 8  ;;  %v9479_v54 = vld [vmem:[#allocation9_spill] sm:$0xff] }
 0x29c   :  { %vm1647_vm10 = vcmp.ge.f32.partialorder %v9479_v54, 0.0 }
 0x29f   :  { %1417 = vxpose.xlu0.b32.end [16/16] (narrow) %v7001_v62, 8 }
 0x2ab   :  { %v7151_v25 = vpop.permute.xlu0 %1226 }
 0x2af   :  { %v7153_v51 = vpop.permute.xlu0 %1230 }
 0x2b3   :  { %v7155_v41 = vpop.permute.xlu0 %1234 }
 0x2b7   :  { %v7157_v26 = vpop.permute.xlu0 %1238 }
 0x2c8   :  { %1534 = vrot.lane.b32.xlu0 %v1354_v32, %s5759_s0  ;;  %v9474_v32 = vld [vmem:[#allocation6_spill] sm:$0xff] }
 0x2c9   :  { %vm1642_vm4 = vcmp.ge.f32.partialorder %v9474_v32, 0.0 }
 0x2e3   :  { %v7159_v15 = vpop.trf.xlu0 }
 0x2e4   :  { %1546 = vrot.lane.b32.xlu1 %v7159_v15, %s5760_s2 }
 0x2e7   :  { %1593 = vmax.xlane.f32.xlu0 %v1592_v5  ;;  %v9492_v5 = vld [vmem:[#allocation39_spill] sm:$0xff] }
 0x2e8   :  { %2613 = vperm.xlu1 %5361, %v6341_v61  }
 0x2eb   :  { %v1618_v62 = vpop.xlane.xlu1 %1617 }
 0x2ec   :  { %2621 = vperm.xlu1 %5361, %v6353_v3  }
 0x2f0   :  { %2629 = vperm.xlu1 %5361, %v6367_v12  }
 0x2f4   :  { %2637 = vperm.xlu1 %5361, %v6381_v22  }
 0x2fd   :  { %1544 = vrot.lane.b32.xlu0 %v1386_v39, %s5760_s2 }
 0x31b   :  { %1466 = vxpose.xlu0.b32.start [1/16] (narrow) %v7055_v23, 8 }
 0x31d   :  { %1434 = vxpose.xlu1.b32.start [1/16] (narrow) %v7008_v7, 8  ;;  %v9480_v7 = vld [vmem:[#allocation11_spill] sm:$0xff] }
 0x31e   :  { %vm1649_vm11 = vcmp.ge.f32.partialorder %v9480_v7, 0.0 }
 0x31f   :  { %1467 = vxpose.xlu0.b32.cont [2/16] (narrow) %v7059_v1, 8 }
 0x321   :  { %1435 = vxpose.xlu1.b32.cont [2/16] (narrow) %v7006_v63, 8  ;;  %v1537_v63 = vpop.permute.xlu1 %1536 }
 0x323   :  { %1468 = vxpose.xlu0.b32.cont [3/16] (narrow) %v7062_v20, 8 }
 0x325   :  { %1436 = vxpose.xlu1.b32.cont [3/16] (narrow) %v7013_v19, 8 }
 0x327   :  { %1469 = vxpose.xlu0.b32.cont [4/16] (narrow) %v7065_v14, 8 }
 0x329   :  { %1437 = vxpose.xlu1.b32.cont [4/16] (narrow) %v7011_v60, 8 }
 0x32b   :  { %1470 = vxpose.xlu0.b32.cont [5/16] (narrow) %v7067_v33, 8  ;;  %v9484_v33 = vld [vmem:[#allocation133_spill] sm:$0xff] }
 0x32d   :  { %1438 = vxpose.xlu1.b32.cont [5/16] (narrow) %v7019_v58, 8  ;;  %v1736_v58 = vlaneseq }
 0x32f   :  { %1471 = vxpose.xlu0.b32.cont [6/16] (narrow) %v7070_v38, 8  ;;  %v1737_v11 = vshrl.u32 %v1736_v58, 7  ;;  %v9485_v38 = vld [vmem:[#allocation30_spill] sm:$0xff]  ;;  %v9497_v58 = vld [vmem:[#allocation49_spill] sm:$0xff] }
 0x331   :  { %1439 = vxpose.xlu1.b32.cont [6/16] (narrow) %v7017_v18, 8  ;;  %v7210_v8 = vsub.s32 0, %v1737_v11 }
 0x333   :  { %1472 = vxpose.xlu0.b32.cont [7/16] (narrow) %v7073_v56, 8  ;;  %v1771_v39 = vrot.slane %v1618_v62, %v7210_v8  ;;  %v9493_v62 = vld [vmem:[#allocation41_spill] sm:$0xff] }
 0x335   :  { %1440 = vxpose.xlu1.b32.cont [7/16] (narrow) %v7025_v53, 8  ;;  %v9471_v53 = vld [vmem:[#allocation130_spill] sm:$0xff] }
 0x337   :  { %1473 = vxpose.xlu0.b32.cont [8/16] (narrow) %v7076_v49, 8  ;;  %v9486_v49 = vld [vmem:[#allocation31_spill] sm:$0xff] }
 0x339   :  { %1441 = vxpose.xlu1.b32.cont [8/16] (narrow) %v7023_v28, 8  ;;  %v9481_v28 = vld [vmem:[#allocation12_spill] sm:$0xff] }
 0x33a   :  { %v1535_v60 = vpop.permute.xlu0 %1534  ;;  %vm1648_vm12 = vcmp.ge.f32.partialorder %v9481_v28, 0.0  ;;  %v9499_v28 = vld [vmem:[#allocation38_spill] sm:$0xff] }
 0x33b   :  { %v1539_v6 = vsel %vm1538_vm2, %v1535_v60, %v1537_v63  ;;  %1474 = vxpose.xlu0.b32.cont [9/16] (narrow) %v7078_v37, 8  ;;  %v9487_v37 = vld [vmem:[#allocation33_spill] sm:$0xff]  ;;  %v9494_v63 = vld [vmem:[#allocation43_spill] sm:$0xff] }
 0x33c   :  { %1542 = vst.msk [vmem:[#allocation2 + $0x1] sm:$0x1] %vm1530_vm1, %v1539_v6  ;;  %v9495_v60 = vld [vmem:[#allocation45_spill] sm:$0xff]  ;;  %v9496_v6 = vld [vmem:[#allocation47_spill] sm:$0xff] }
 0x33d   :  { %1442 = vxpose.xlu1.b32.cont [9/16] (narrow) %v7029_v30, 8  ;;  %v9482_v30 = vld [vmem:[#allocation13_spill] sm:$0xff] }
 0x33e   :  { %vm1651_vm13 = vcmp.ge.f32.partialorder %v9482_v30, 0.0  ;;  %v9500_v30 = vld [vmem:[#allocation40_spill] sm:$0xff] }
 0x33f   :  { %1475 = vxpose.xlu0.b32.cont [10/16] (narrow) %v7081_v35, 8 }
 0x341   :  { %1443 = vxpose.xlu1.b32.cont [10/16] (narrow) %v7031_v21, 8 }
 0x343   :  { %1476 = vxpose.xlu0.b32.cont [11/16] (narrow) %v7084_v47, 8  ;;  %v9488_v47 = vld [vmem:[#allocation35_spill] sm:$0xff] }
 0x345   :  { %1444 = vxpose.xlu1.b32.cont [11/16] (narrow) %v7035_v34, 8 }
 0x347   :  { %1477 = vxpose.xlu0.b32.cont [12/16] (narrow) %v7086_v36, 8 }
 0x349   :  { %1445 = vxpose.xlu1.b32.cont [12/16] (narrow) %v7039_v16, 8 }
 0x34b   :  { %1478 = vxpose.xlu0.b32.cont [13/16] (narrow) %v7088_v31, 8  ;;  %v9489_v31 = vld [vmem:[#allocation37_spill] sm:$0xff] }
 0x34d   :  { %1446 = vxpose.xlu1.b32.cont [13/16] (narrow) %v7041_v0, 8 }
 0x34f   :  { %1479 = vxpose.xlu0.b32.cont [14/16] (narrow) %v7090_v27, 8 }
 0x351   :  { %1447 = vxpose.xlu1.b32.cont [14/16] (narrow) %v7045_v24, 8 }
 0x353   :  { %1480 = vxpose.xlu0.b32.cont [15/16] (narrow) %v7092_v42, 8 }
 0x355   :  { %1448 = vxpose.xlu1.b32.cont [15/16] (narrow) %v7048_v2, 8 }
 0x357   :  { %1481 = vxpose.xlu0.b32.end [16/16] (narrow) %v7096_v29, 8  ;;  %v9490_v29 = vld [vmem:[#allocation3_spill] sm:$0xff] }
 0x358   :  { %vm1641_vm14 = vcmp.ge.f32.partialorder %v9490_v29, 0.0 }
 0x359   :  { %1449 = vxpose.xlu1.b32.end [16/16] (narrow) %v7053_v13, 8  ;;  %v9483_v13 = vld [vmem:[#allocation132_spill] sm:$0xff] }
 0x35d   :  { %1498 = vxpose.xlu1.b32.start [1/16] (narrow) %v7100_v44, 8 }
 0x361   :  { %1499 = vxpose.xlu1.b32.cont [2/16] (narrow) %v7104_v57, 8 }
 0x365   :  { %1500 = vxpose.xlu1.b32.cont [3/16] (narrow) %v7106_v55, 8 }
 0x369   :  { %1501 = vxpose.xlu1.b32.cont [4/16] (narrow) %v9471_v53, 8 }
 0x36d   :  { %1502 = vxpose.xlu1.b32.cont [5/16] (narrow) %v7112_v9, 8  ;;  %v9477_v9 = vld [vmem:[#allocation7_spill] sm:$0xff] }
 0x36e   :  { %vm1645_vm7 = vcmp.ge.f32.partialorder %v9477_v9, 0.0 }
 0x371   :  { %1503 = vxpose.xlu1.b32.cont [6/16] (narrow) %v9472_v59, 8 }
 0x374   :  { %v1594_v10 = vpop.xlane.xlu0 %1593 }
 0x375   :  { %v1739_v55 = vrot.slane %v1594_v10, %v7210_v8  ;;  %1504 = vxpose.xlu1.b32.cont [7/16] (narrow) %v7116_v43, 8  ;;  %v1547_v43 = vpop.permute.xlu1 %1546 }
 0x377   :  { %v7223_v19 = vsel %vm1640_vm3, %v1739_v55, %v1771_v39  ;;  %v7225_v18 = vsel %vm1642_vm4, %v1739_v55, %v1771_v39  ;;  %v1803_v34 = vsel %vm1643_vm5, %v1739_v55, %v1771_v39  ;;  %v1804_v16 = vsel %vm1644_vm6, %v1739_v55, %v1771_v39 }
 0x378   :  { %v1545_v21 = vpop.permute.xlu0 %1544  ;;  %v1805_v0 = vsel %vm1645_vm7, %v1739_v55, %v1771_v39  ;;  %v1806_v24 = vsel %vm1646_vm9, %v1739_v55, %v1771_v39  ;;  %v1807_v23 = vsel %vm1647_vm10, %v1739_v55, %v1771_v39  ;;  %v1808_v1 = vsel %vm1648_vm12, %v1739_v55, %v1771_v39 }
 0x379   :  { %v1549_v2 = vsel %vm1548_vm8, %v1545_v21, %v1547_v43  ;;  %1505 = vxpose.xlu1.b32.cont [8/16] (narrow) %v9483_v13, 8  ;;  %v1809_v20 = vsel %vm1649_vm11, %v1739_v55, %v1771_v39  ;;  %v7234_v14 = vsel %vm1651_vm13, %v1739_v55, %v1771_v39  ;;  %v7242_v56 = vpop.permute.xlu1 %2613  ;;  %v1801_v44 = vsel %vm1641_vm14, %v1739_v55, %v1771_v39  ;;  %v9501_v43 = vld [vmem:[#allocation42_spill] sm:$0xff]  ;;  %v9502_v21 = vld [vmem:[#allocation44_spill] sm:$0xff] }
 0x37a   :  { %1552 = vst.msk [vmem:[#allocation2 + $0x2] sm:$0x1] %vm1530_vm1, %v1549_v2  ;;  %v9504_v2 = vld [vmem:[#allocation48_spill] sm:$0xff]  ;;  %vm3192_vm14 = vcmask 785408  }
 0x37d   :  { %1506 = vxpose.xlu1.b32.cont [9/16] (narrow) %v7151_v25, 8  ;;  %v7247_v35 = vpop.permute.xlu1 %2621  ;;  %v7264_v25 = vld [vmem:[#allocation2 + $0x1] sm:$0x1] }
 0x380   :  { %1553 = vrot.lane.b32.xlu0 %v7159_v15, %s5761_s15 }
 0x381   :  { %1507 = vxpose.xlu1.b32.cont [10/16] (narrow) %v9484_v33, 8  ;;  %v7252_v36 = vpop.permute.xlu1 %2629 }
 0x384   :  { %2609 = vperm.xlu0 %5362, %v9485_v38  }
 0x385   :  { %1508 = vxpose.xlu1.b32.cont [11/16] (narrow) %v7153_v51, 8  ;;  %v7256_v27 = vpop.permute.xlu1 %2637 }
 0x388   :  { %2617 = vperm.xlu0 %5362, %v9486_v49  }
 0x389   :  { %1509 = vxpose.xlu1.b32.cont [12/16] (narrow) %v7127_v48, 8 }
 0x38c   :  { %2625 = vperm.xlu0 %5362, %v9487_v37  }
 0x38d   :  { %1510 = vxpose.xlu1.b32.cont [13/16] (narrow) %v7155_v41, 8 }
 0x390   :  { %2633 = vperm.xlu0 %5362, %v9488_v47  }
 0x391   :  { %1511 = vxpose.xlu1.b32.cont [14/16] (narrow) %v7130_v50, 8  ;;  %v9491_v50 = vld [vmem:[#allocation14_spill] sm:$0xff] }
 0x392   :  { %vm1650_vm15 = vcmp.ge.f32.partialorder %v9491_v50, 0.0  ;;  %v9507_v50 = vld [vmem:[#allocation61_spill] sm:$0xff] }
 0x393   :  { %v1810_v57 = vsel %vm1650_vm15, %v1739_v55, %v1771_v39  ;;  %v7290_v39 = vld [vmem:[#allocation2 + $0x2] sm:$0x1]  ;;  %vm1690_vm4 = vcmp.ge.f32.partialorder %v9507_v50, 0.0 }
 0x394   :  { %2641 = vperm.xlu0 %5362, %v9489_v31   ;;  %v1598_v55 = vsel %vm1530_vm1, %v7290_v39, -inf }
 0x395   :  { %1512 = vxpose.xlu1.b32.cont [15/16] (narrow) %v7157_v26, 8 }
 0x399   :  { %1513 = vxpose.xlu1.b32.end [16/16] (narrow) %v7134_v45, 8  ;;  %v1619_v45 = vsel %vm1530_vm1, %v7264_v25, inf }
 0x39b   :  { %v1482_v48 = vpop.trf.xlu0 }
 0x39c   :  { %1564 = vrot.lane.b32.xlu0 %v1482_v48, %s5759_s0 }
 0x39d   :  { %v1450_v42 = vpop.trf.xlu1 }
 0x39e   :  { %1559 = vst.msk [vmem:[#allocation2 + $0x4] sm:$0x1] %vm1530_vm1, %v1450_v42 }
 0x3a0   :  { %1951 = vperm.xlu0 %5362, %v1801_v44   ;;  %v9506_v44 = vld [vmem:[#allocation72_spill] sm:$0xff] }
 0x3a1   :  { %vm1699_vm3 = vcmp.ge.f32.partialorder %v9506_v44, 0.0 }
 0x3a4   :  { %1996 = vperm.xlu0 %5362, %v1810_v57  }
 0x3a5   :  { %v1588_v51 = vld [vmem:[#allocation2 + $0x4] sm:$0x1] }
 0x3a6   :  { %v1604_v41 = vsel %vm1530_vm1, %v1588_v51, -inf  ;;  %v1628_v15 = vsel %vm1530_vm1, %v1588_v51, inf  ;;  %v9508_v51 = vld [vmem:[#allocation63_spill] sm:$0xff] }
 0x3a7   :  { %vm1692_vm5 = vcmp.ge.f32.partialorder %v9508_v51, 0.0 }
 0x3b7   :  { %1562 = vrot.lane.b32.xlu1 %v1450_v42, %s5759_s0 }
 0x3c3   :  { %1620 = vmin.xlane.f32.xlu0 %v1619_v45 }
 0x3db   :  { %1605 = vmax.xlane.f32.xlu1 %v1604_v41 }
 0x3dd   :  { %v1514_v26 = vpop.trf.xlu1 }
 0x3de   :  { %1573 = vrot.lane.b32.xlu0 %v1514_v26, %s5760_s2 }
 0x3df   :  { %1629 = vmin.xlane.f32.xlu1 %v1628_v15 }
 0x3e2   :  { %2649 = vperm.xlu0 %5362, %v9492_v5  }
 0x3e6   :  { %2657 = vperm.xlu0 %5362, %v9493_v62  }
 0x3ea   :  { %2665 = vperm.xlu0 %5362, %v9494_v63  }
 0x3ee   :  { %2673 = vperm.xlu0 %5362, %v9495_v60  }
 0x3f0   :  { %1571 = vrot.lane.b32.xlu1 %v1482_v48, %s5760_s2 }
 0x3f2   :  { %2681 = vperm.xlu0 %5362, %v9496_v6   ;;  %v1554_v53 = vpop.permute.xlu0 %1553 }
 0x3f3   :  { %1557 = vst.msk [vmem:[#allocation2 + $0x3] sm:$0x1] %vm1530_vm1, %v1554_v53  ;;  %v9510_v53 = vld [vmem:[#allocation69_spill] sm:$0xff] }
 0x3f4   :  { %1946 = vperm.xlu1 %5361, %v7223_v19   ;;  %v1595_v19 = vsel %vm1530_vm1, %v7264_v25, -inf  ;;  %vm1696_vm7 = vcmp.ge.f32.partialorder %v9510_v53, 0.0 }
 0x3f6   :  { %2689 = vperm.xlu0 %5362, %v9497_v58  }
 0x3f8   :  { %1956 = vperm.xlu1 %5361, %v7225_v18   ;;  %v9498_v18 = vld [vmem:[#allocation36_spill] sm:$0xff] }
 0x3fa   :  { %v1587_v59 = vld [vmem:[#allocation2 + $0x3] sm:$0x1] }
 0x3fb   :  { %v1601_v17 = vsel %vm1530_vm1, %v1587_v59, -inf  ;;  %v1625_v32 = vsel %vm1530_vm1, %v1587_v59, inf }
 0x3fc   :  { %1961 = vperm.xlu1 %5361, %v1803_v34  }
 0x400   :  { %1966 = vperm.xlu1 %5361, %v1804_v16   ;;  %v9503_v16 = vld [vmem:[#allocation46_spill] sm:$0xff] }
 0x403   :  { %v7281_v11 = vpop.permute.xlu0 %2609 }
 0x404   :  { %1971 = vperm.xlu1 %5361, %v1805_v0  }
 0x407   :  { %v7283_v10 = vpop.permute.xlu0 %2617 }
 0x408   :  { %1976 = vperm.xlu1 %5361, %v1806_v24  }
 0x40b   :  { %v7288_v52 = vpop.permute.xlu0 %2625 }
 0x40c   :  { %1981 = vperm.xlu1 %5361, %v1807_v23  }
 0x40f   :  { %v7294_v46 = vpop.permute.xlu0 %2633 }
 0x410   :  { %1986 = vperm.xlu1 %5361, %v1808_v1  }
 0x413   :  { %v7296_v9 = vpop.permute.xlu0 %2641 }
 0x414   :  { %1991 = vperm.xlu1 %5361, %v1809_v20  }
 0x415   :  { %1602 = vmax.xlane.f32.xlu0 %v1601_v17  ;;  %v9511_v17 = vld [vmem:[#allocation73_spill] sm:$0xff] }
 0x417   :  { %v1565_v4 = vpop.permute.xlu0 %1564 }
 0x418   :  { %2001 = vperm.xlu1 %5361, %v7234_v14   ;;  %v9505_v14 = vld [vmem:[#allocation58_spill] sm:$0xff] }
 0x419   :  { %1626 = vmin.xlane.f32.xlu0 %v1625_v32 }
 0x41d   :  { %1599 = vmax.xlane.f32.xlu0 %v1598_v55  ;;  %v1622_v55 = vsel %vm1530_vm1, %v7290_v39, inf }
 0x41f   :  { %v7308_v34 = vpop.permute.xlu0 %1951 }
 0x423   :  { %v7311_v0 = vpop.permute.xlu0 %1996 }
 0x429   :  { %v1563_v54 = vpop.permute.xlu1 %1562 }
 0x42a   :  { %v1566_v7 = vsel %vm1538_vm2, %v1563_v54, %v1565_v4  ;;  %vm1688_vm2 = vcmp.ge.f32.partialorder %v9505_v14, 0.0 }
 0x42b   :  { %1569 = vst.msk [vmem:[#allocation2 + $0x5] sm:$0x1] %vm1530_vm1, %v1566_v7 }
 0x43c   :  { %1596 = vmax.xlane.f32.xlu1 %v1595_v19  ;;  %v9512_v19 = vld [vmem:[#allocation57_spill] sm:$0xff] }
 0x43d   :  { %vm1689_vm9 = vcmp.ge.f32.partialorder %v9512_v19, 0.0 }
 0x44d   :  { %1579 = vrot.lane.b32.xlu1 %v1514_v26, %s5761_s15  ;;  %v9509_v26 = vld [vmem:[#allocation67_spill] sm:$0xff] }
 0x44e   :  { %vm1694_vm6 = vcmp.ge.f32.partialorder %v9509_v26, 0.0  ;;  %v9519_v26 = vld [vmem:[#allocation59_spill] sm:$0xff] }
 0x450   :  { %v7314_v13 = vpop.xlane.xlu0 %1620 }
 0x451   :  { %2645 = vperm.xlu1 %5361, %v9498_v18  }
 0x454   :  { %v1574_v48 = vpop.permute.xlu0 %1573 }
 0x455   :  { %2653 = vperm.xlu1 %5361, %v9499_v28  }
 0x459   :  { %2661 = vperm.xlu1 %5361, %v9500_v30  }
 0x45d   :  { %2669 = vperm.xlu1 %5361, %v9501_v43  }
 0x461   :  { %2677 = vperm.xlu1 %5361, %v9502_v21  }
 0x465   :  { %2685 = vperm.xlu1 %5361, %v9503_v16  }
 0x468   :  { %v1606_v24 = vpop.xlane.xlu1 %1605 }
 0x469   :  { %2693 = vperm.xlu1 %5361, %v9504_v2   ;;  %v1755_v1 = vrot.slane %v1606_v24, %v7210_v8 }
 0x46c   :  { %v1630_v23 = vpop.xlane.xlu1 %1629 }
 0x46d   :  { %v1787_v20 = vrot.slane %v1630_v23, %v7210_v8  ;;  %v1589_v23 = vld [vmem:[#allocation2 + $0x5] sm:$0x1] }
 0x46f   :  { %v1848_v33 = vsel %vm1688_vm2, %v1755_v1, %v1787_v20  ;;  %v1859_v57 = vsel %vm1699_vm3, %v1755_v1, %v1787_v20  ;;  %v1850_v45 = vsel %vm1690_vm4, %v1755_v1, %v1787_v20  ;;  %v1852_v41 = vsel %vm1692_vm5, %v1755_v1, %v1787_v20 }
 0x470   :  { %v1572_v42 = vpop.permute.xlu1 %1571  ;;  %2186 = vperm.xlu0 %5362, %v1848_v33   ;;  %v1854_v15 = vsel %vm1694_vm6, %v1755_v1, %v1787_v20  ;;  %v1856_v59 = vsel %vm1696_vm7, %v1755_v1, %v1787_v20  ;;  %v1849_v24 = vsel %vm1689_vm9, %v1755_v1, %v1787_v20  ;;  %v9513_v33 = vld [vmem:[#allocation60_spill] sm:$0xff]  ;;  %vm1663_vm7 = vcmp.ge.f32.partialorder %v6341_v61, 0.0 }
 0x471   :  { %v1575_v29 = vsel %vm1548_vm8, %v1572_v42, %v1574_v48  ;;  %vm1698_vm8 = vcmp.ge.f32.partialorder %v9511_v17, 0.0  ;;  %vm1691_vm10 = vcmp.ge.f32.partialorder %v9513_v33, 0.0  ;;  %vm1677_vm9 = vcmp.ge.f32.partialorder %v9501_v43, 0.0 }
 0x472   :  { %1578 = vst.msk [vmem:[#allocation2 + $0x6] sm:$0x1] %vm1530_vm1, %v1575_v29  ;;  %v1858_v32 = vsel %vm1698_vm8, %v1755_v1, %v1787_v20  ;;  %v1851_v42 = vsel %vm1691_vm10, %v1755_v1, %v1787_v20  ;;  %v1607_v29 = vsel %vm1530_vm1, %v1589_v23, -inf }
 0x474   :  { %2196 = vperm.xlu0 %5362, %v1850_v45   ;;  %v1947_v4 = vpop.permute.xlu1 %1946  ;;  %v9514_v45 = vld [vmem:[#allocation62_spill] sm:$0xff] }
 0x475   :  { %vm1693_vm11 = vcmp.ge.f32.partialorder %v9514_v45, 0.0 }
 0x478   :  { %2206 = vperm.xlu0 %5362, %v1852_v41   ;;  %v1957_v54 = vpop.permute.xlu1 %1956  ;;  %v1853_v41 = vsel %vm1693_vm11, %v1755_v1, %v1787_v20  ;;  %vm1679_vm11 = vcmp.ge.f32.partialorder %v9502_v21, 0.0 }
 0x47c   :  { %2216 = vperm.xlu0 %5362, %v1854_v15   ;;  %v1962_v7 = vpop.permute.xlu1 %1961  ;;  %v1631_v15 = vsel %vm1530_vm1, %v1589_v23, inf  ;;  %v7350_v23 = vrot.slane %v7123_v40, %v7210_v8 }
 0x47e   :  { %v2426_v44 = vsub.f32 %v7350_v23, %v1957_v54  ;;  %v2427_v40 = vsub.f32 %v7350_v23, %v1962_v7 }
 0x480   :  { %2226 = vperm.xlu0 %5362, %v1856_v59   ;;  %v7331_v48 = vpop.permute.xlu1 %1966  ;;  %v2906_v51 = vmul.f32 %v9519_v26, %v2426_v44  ;;  %v7366_v44 = vpop.permute.xlu0 %2649 }
 0x484   :  { %2236 = vperm.xlu0 %5362, %v1858_v32   ;;  %v7336_v59 = vpop.permute.xlu1 %1971  ;;  %v9515_v32 = vld [vmem:[#allocation66_spill] sm:$0xff] }
 0x485   :  { %vm1695_vm12 = vcmp.ge.f32.partialorder %v9515_v32, 0.0 }
 0x488   :  { %v7340_v19 = vpop.permute.xlu1 %1976 }
 0x48d   :  { %1623 = vmin.xlane.f32.xlu1 %v1622_v55  ;;  %v1855_v55 = vsel %vm1695_vm12, %v1755_v1, %v1787_v20 }
 0x49e   :  { %2191 = vperm.xlu1 %5361, %v1849_v24   ;;  %v9516_v24 = vld [vmem:[#allocation68_spill] sm:$0xff] }
 0x49f   :  { %vm1697_vm13 = vcmp.ge.f32.partialorder %v9516_v24, 0.0 }
 0x4a2   :  { %2201 = vperm.xlu1 %5361, %v1851_v42   ;;  %v1857_v42 = vsel %vm1697_vm13, %v1755_v1, %v1787_v20  ;;  %v9517_v1 = vld [vmem:[#allocation50_spill] sm:$0xff]  ;;  %vm1681_vm13 = vcmp.ge.f32.partialorder %v9503_v16, 0.0 }
 0x4a3   :  { %1608 = vmax.xlane.f32.xlu0 %v1607_v29  ;;  %v7342_v29 = vpop.permute.xlu1 %1981 }
 0x4a6   :  { %2211 = vperm.xlu1 %5361, %v1853_v41  }
 0x4a7   :  { %1632 = vmin.xlane.f32.xlu0 %v1631_v15  ;;  %v7344_v45 = vpop.permute.xlu1 %1986  ;;  %v2425_v15 = vsub.f32 %v7350_v23, %v7308_v34  ;;  %v3004_v34 = vmul.f32 1.442695, %v2906_v51 }
 0x4a9   :  { %v2905_v20 = vmul.f32 %v9517_v1, %v2425_v15  ;;  %v1590_v15 = vld [vmem:[#allocation2 + $0x6] sm:$0x1] }
 0x4aa   :  { %2221 = vperm.xlu1 %5361, %v1855_v55   ;;  %v2424_v55 = vsub.f32 %v7350_v23, %v1947_v4  ;;  %v9520_v4 = vld [vmem:[#allocation55_spill] sm:$0xff]  ;;  %v1610_v54 = vsel %vm1530_vm1, %v1590_v15, -inf  ;;  %v1634_v26 = vsel %vm1530_vm1, %v1590_v15, inf }
 0x4ab   :  { %v7346_v41 = vpop.permute.xlu1 %1991  ;;  %v3002_v53 = vmul.f32 1.442695, %v2905_v20  ;;  %v2907_v50 = vmul.f32 %v9520_v4, %v2427_v40 }
 0x4ad   :  { %5363 = vpow2.f32 %v3002_v53 }
 0x4ae   :  { %2231 = vperm.xlu1 %5361, %v1857_v42  }
 0x4af   :  { %v7355_v24 = vpop.permute.xlu1 %2001 }
 0x4b2   :  { %2241 = vperm.xlu1 %5361, %v1859_v57   ;;  %v9518_v57 = vld [vmem:[#allocation56_spill] sm:$0xff] }
 0x4b3   :  { %v2904_v42 = vmul.f32 %v9518_v57, %v2424_v55  ;;  %v3006_v55 = vmul.f32 1.442695, %v2907_v50  ;;  %v7374_v50 = vpop.permute.xlu0 %2657 }
 0x4b5   :  { %v3000_v32 = vmul.f32 1.442695, %v2904_v42 }
 0x4b7   :  { %5365 = vpow2.f32 %v3000_v32  ;;  %v7369_v53 = vpop.eup %5363 }
 0x4b8   :  { %5367 = vpow2.f32 %v3004_v34  ;;  %v7386_v34 = vpop.permute.xlu0 %2665 }
 0x4b9   :  { %5369 = vpow2.f32 %v3006_v55  ;;  %9521 = vst [vmem:[#allocation130_spill] sm:$0xff] %v7386_v34 }
 0x4bc   :  { %v7390_v15 = vpop.permute.xlu0 %2673 }
 0x4bd   :  { %9522 = vst [vmem:[#allocation131_spill] sm:$0xff] %v7390_v15 }
 0x4c1   :  { %v7372_v7 = vpop.eup %5365 }
 0x4c2   :  { %v3193_v32 = vsel %vm3192_vm14, %v7372_v7, 0.0  ;;  %v7380_v57 = vpop.eup %5367 }
 0x4c3   :  { %v3199_v42 = vsel %vm3192_vm14, %v7380_v57, 0.0  ;;  %v7384_v40 = vpop.eup %5369 }
 0x4c4   :  { %v3202_v4 = vsel %vm3192_vm14, %v7384_v40, 0.0 }
 0x4c9   :  { %v1597_v17 = vpop.xlane.xlu1 %1596 }
 0x4ca   :  { %v1743_v55 = vrot.slane %v1597_v17, %v7210_v8 }
 0x4cd   :  { %v1580_v33 = vpop.permute.xlu1 %1579 }
 0x4ce   :  { %1583 = vst.msk [vmem:[#allocation2 + $0x7] sm:$0x1] %vm1530_vm1, %v1580_v33  ;;  %v3196_v33 = vsel %vm3192_vm14, %v7369_v53, 0.0 }
 0x4d5   :  { %v1591_v1 = vld [vmem:[#allocation2 + $0x7] sm:$0x1] }
 0x4d6   :  { %1611 = vmax.xlane.f32.xlu1 %v1610_v54  ;;  %v1613_v20 = vsel %vm1530_vm1, %v1591_v1, -inf  ;;  %v1637_v51 = vsel %vm1530_vm1, %v1591_v1, inf  ;;  %v1775_v54 = vrot.slane %v7314_v13, %v7210_v8  ;;  %v9523_v1 = vld [vmem:[#allocation15_spill] sm:$0xff] }
 0x4d7   :  { %1614 = vmax.xlane.f32.xlu0 %v1613_v20  ;;  %vm1653_vm1 = vcmp.ge.f32.partialorder %v9523_v1, 0.0  ;;  %v9528_v1 = vld [vmem:[#allocation24_spill] sm:$0xff] }
 0x4d8   :  { %v1813_v20 = vsel %vm1653_vm1, %v1743_v55, %v1775_v54  ;;  %vm1659_vm3 = vcmp.ge.f32.partialorder %v9528_v1, 0.0  ;;  %vm1662_vm1 = vcmp.ge.f32.partialorder %v9485_v38, 0.0 }
 0x4d9   :  { %v1819_v34 = vsel %vm1659_vm3, %v1743_v55, %v1775_v54  ;;  %v1822_v21 = vsel %vm1662_vm1, %v1743_v55, %v1775_v54  ;;  %vm1664_vm1 = vcmp.ge.f32.partialorder %v9486_v49, 0.0 }
 0x4da   :  { %1635 = vmin.xlane.f32.xlu1 %v1634_v26  ;;  %v7396_v26 = vpop.permute.xlu0 %2681 }
 0x4db   :  { %1638 = vmin.xlane.f32.xlu0 %v1637_v51  ;;  %9524 = vst [vmem:[#allocation4_spill] sm:$0xff] %v7396_v26  ;;  %v9525_v51 = vld [vmem:[#allocation18_spill] sm:$0xff]  ;;  %v9530_v26 = vld [vmem:[#allocation27_spill] sm:$0xff] }
 0x4dc   :  { %vm1655_vm15 = vcmp.ge.f32.partialorder %v9525_v51, 0.0  ;;  %vm1661_vm5 = vcmp.ge.f32.partialorder %v9530_v26, 0.0 }
 0x4de   :  { %3197 = vadd.xlane.f32.xlu1 %v3196_v33  ;;  %v7399_v33 = vpop.permute.xlu1 %2645 }
 0x4df   :  { %3194 = vadd.xlane.f32.xlu0 %v3193_v32  ;;  %v1815_v32 = vsel %vm1655_vm15, %v1743_v55, %v1775_v54  ;;  %vm1683_vm15 = vcmp.ge.f32.partialorder %v9504_v2, 0.0 }
 0x4e2   :  { %v7404_v15 = vpop.permute.xlu1 %2653 }
 0x4e3   :  { %3200 = vadd.xlane.f32.xlu0 %v3199_v42  ;;  %v7401_v42 = vpop.permute.xlu0 %2689 }
 0x4e4   :  { %9526 = vst [vmem:[#allocation6_spill] sm:$0xff] %v7401_v42  ;;  %v1821_v42 = vsel %vm1661_vm5, %v1743_v55, %v1775_v54 }
 0x4e7   :  { %3203 = vadd.xlane.f32.xlu0 %v3202_v4  ;;  %v9527_v4 = vld [vmem:[#allocation21_spill] sm:$0xff]  ;;  %v1603_v13 = vpop.xlane.xlu0 %1602 }
 0x4e8   :  { %vm1657_vm2 = vcmp.ge.f32.partialorder %v9527_v4, 0.0  ;;  %v9532_v4 = vld [vmem:[#allocation19_spill] sm:$0xff]  ;;  %v7418_v26 = vrot.slane %v1603_v13, %v7210_v8 }
 0x4e9   :  { %v1817_v17 = vsel %vm1657_vm2, %v1743_v55, %v1775_v54  ;;  %vm1654_vm6 = vcmp.ge.f32.partialorder %v9532_v4, 0.0  ;;  %v9534_v4 = vld [vmem:[#allocation25_spill] sm:$0xff]  ;;  %vm1676_vm2 = vcmp.ge.f32.partialorder %v9494_v63, 0.0 }
 0x4ea   :  { %vm1658_vm10 = vcmp.ge.f32.partialorder %v9534_v4, 0.0 }
 0x4eb   :  { %v1627_v14 = vpop.xlane.xlu0 %1626 }
 0x4ec   :  { %v7414_v1 = vrot.slane %v1627_v14, %v7210_v8  ;;  %v1818_v14 = vsel %vm1658_vm10, %v1743_v55, %v1775_v54 }
 0x4ee   :  { %v1839_v13 = vsel %vm1679_vm11, %v7418_v26, %v7414_v1  ;;  %v1841_v4 = vsel %vm1681_vm13, %v7418_v26, %v7414_v1  ;;  %vm1669_vm11 = vcmp.ge.f32.partialorder %v6381_v22, 0.0  ;;  %vm1671_vm13 = vcmp.ge.f32.partialorder %v9498_v18, 0.0  ;;  %v9565_v22 = vld [vmem:[#allocation80_spill] sm:$0xff] }
 0x4ef   :  { %2011 = vperm.xlu1 %5361, %v1813_v20   ;;  %v9529_v20 = vld [vmem:[#allocation16_spill] sm:$0xff] }
 0x4f0   :  { %vm1652_vm4 = vcmp.ge.f32.partialorder %v9529_v20, 0.0  ;;  %v9533_v20 = vld [vmem:[#allocation22_spill] sm:$0xff] }
 0x4f1   :  { %v1812_v51 = vsel %vm1652_vm4, %v1743_v55, %v1775_v54  ;;  %vm1656_vm8 = vcmp.ge.f32.partialorder %v9533_v20, 0.0  ;;  %vm1678_vm4 = vcmp.ge.f32.partialorder %v9495_v60, 0.0  ;;  %v9551_v60 = vld [vmem:[#allocation89_spill] sm:$0xff] }
 0x4f3   :  { %2021 = vperm.xlu1 %5361, %v1815_v32   ;;  %v7409_v32 = vpop.permute.xlu1 %2661 }
 0x4f4   :  { %9531 = vst [vmem:[#allocation5_spill] sm:$0xff] %v7409_v32  ;;  %v1816_v32 = vsel %vm1656_vm8, %v1743_v55, %v1775_v54  ;;  %vm1682_vm8 = vcmp.ge.f32.partialorder %v9497_v58, 0.0 }
 0x4f7   :  { %2031 = vperm.xlu1 %5361, %v1817_v17   ;;  %v1814_v17 = vsel %vm1654_vm6, %v1743_v55, %v1775_v54  ;;  %vm1680_vm6 = vcmp.ge.f32.partialorder %v9496_v6, 0.0 }
 0x4fb   :  { %2041 = vperm.xlu1 %5361, %v1819_v34   ;;  %v1823_v34 = vsel %vm1663_vm7, %v1743_v55, %v1775_v54  ;;  %vm1665_vm7 = vcmp.ge.f32.partialorder %v6353_v3, 0.0 }
 0x4fd   :  { %2006 = vperm.xlu0 %5362, %v1812_v51   ;;  %v7420_v51 = vpop.permute.xlu1 %2669 }
 0x4ff   :  { %2051 = vperm.xlu1 %5361, %v1821_v42   ;;  %v1837_v42 = vsel %vm1677_vm9, %v7418_v26, %v7414_v1  ;;  %vm1667_vm9 = vcmp.ge.f32.partialorder %v6367_v12, 0.0 }
 0x501   :  { %2016 = vperm.xlu0 %5362, %v1814_v17   ;;  %v1600_v17 = vpop.xlane.xlu0 %1599 }
 0x502   :  { %v7462_v2 = vrot.slane %v1600_v17, %v7210_v8 }
 0x503   :  { %2061 = vperm.xlu1 %5361, %v1823_v34   ;;  %v7427_v34 = vpop.permute.xlu1 %2677 }
 0x505   :  { %2026 = vperm.xlu0 %5362, %v1816_v32   ;;  %v9535_v32 = vld [vmem:[#allocation28_spill] sm:$0xff] }
 0x506   :  { %vm1660_vm12 = vcmp.ge.f32.partialorder %v9535_v32, 0.0 }
 0x507   :  { %2131 = vperm.xlu1 %5361, %v1837_v42   ;;  %v1820_v20 = vsel %vm1660_vm12, %v1743_v55, %v1775_v54  ;;  %v7433_v42 = vpop.permute.xlu0 %2186  ;;  %v1838_v55 = vsel %vm1678_vm4, %v7418_v26, %v7414_v1  ;;  %v9540_v54 = vld [vmem:[#allocation53_spill] sm:$0xff]  ;;  %vm1668_vm4 = vcmp.ge.f32.partialorder %v9488_v47, 0.0 }
 0x508   :  { %9536 = vst [vmem:[#allocation8_spill] sm:$0xff] %v7433_v42  ;;  %vm1687_vm5 = vcmp.ge.f32.partialorder %v9540_v54, 0.0  ;;  %v9566_v47 = vld [vmem:[#allocation81_spill] sm:$0xff] }
 0x509   :  { %2036 = vperm.xlu0 %5362, %v1818_v14   ;;  %v7438_v14 = vpop.permute.xlu1 %2685 }
 0x50b   :  { %2141 = vperm.xlu1 %5361, %v1839_v13   ;;  %v1843_v13 = vsel %vm1683_vm15, %v7418_v26, %v7414_v1  ;;  %v7444_v32 = vpop.permute.xlu0 %2196  ;;  %vm1673_vm15 = vcmp.ge.f32.partialorder %v9499_v28, 0.0 }
 0x50c   :  { %9537 = vst [vmem:[#allocation7_spill] sm:$0xff] %v7444_v32 }
 0x50d   :  { %2046 = vperm.xlu0 %5362, %v1820_v20   ;;  %v1836_v20 = vsel %vm1676_vm2, %v7418_v26, %v7414_v1  ;;  %v7449_v42 = vpop.permute.xlu1 %2693  ;;  %vm1666_vm2 = vcmp.ge.f32.partialorder %v9487_v37, 0.0 }
 0x50e   :  { %9539 = vst [vmem:[#allocation10_spill] sm:$0xff] %v7449_v42  ;;  %v2432_v42 = vsub.f32 %v7350_v23, %v7344_v45 }
 0x50f   :  { %2151 = vperm.xlu1 %5361, %v1841_v4   ;;  %v9538_v4 = vld [vmem:[#allocation51_spill] sm:$0xff] }
 0x510   :  { %vm1685_vm3 = vcmp.ge.f32.partialorder %v9538_v4, 0.0 }
 0x511   :  { %2056 = vperm.xlu0 %5362, %v1822_v21   ;;  %v1845_v21 = vsel %vm1685_vm3, %v7418_v26, %v7414_v1  ;;  %vm1675_vm3 = vcmp.ge.f32.partialorder %v9500_v30, 0.0 }
 0x513   :  { %2161 = vperm.xlu1 %5361, %v1843_v13   ;;  %v7457_v13 = vpop.permute.xlu0 %2206 }
 0x514   :  { %9541 = vst [vmem:[#allocation9_spill] sm:$0xff] %v7457_v13  ;;  %v9543_v13 = vld [vmem:[#allocation52_spill] sm:$0xff] }
 0x515   :  { %2126 = vperm.xlu0 %5362, %v1836_v20   ;;  %v1847_v20 = vsel %vm1687_vm5, %v7418_v26, %v7414_v1  ;;  %vm1684_vm10 = vcmp.ge.f32.partialorder %v9543_v13, 0.0  ;;  %vm1670_vm5 = vcmp.ge.f32.partialorder %v9489_v31, 0.0 }
 0x517   :  { %2171 = vperm.xlu1 %5361, %v1845_v21   ;;  %v1840_v21 = vsel %vm1680_vm6, %v7418_v26, %v7414_v1  ;;  %v7474_v17 = vpop.permute.xlu0 %2216 }
 0x518   :  { %9542 = vst [vmem:[#allocation11_spill] sm:$0xff] %v7474_v17 }
 0x519   :  { %2136 = vperm.xlu0 %5362, %v1838_v55  }
 0x51a   :  { %v1624_v32 = vpop.xlane.xlu1 %1623 }
 0x51b   :  { %v7465_v16 = vrot.slane %v1624_v32, %v7210_v8  ;;  %2181 = vperm.xlu1 %5361, %v1847_v20   ;;  %v1842_v32 = vsel %vm1682_vm8, %v7418_v26, %v7414_v1 }
 0x51d   :  { %2146 = vperm.xlu0 %5362, %v1840_v21   ;;  %v1825_v55 = vsel %vm1665_vm7, %v7462_v2, %v7465_v16  ;;  %v1827_v20 = vsel %vm1667_vm9, %v7462_v2, %v7465_v16  ;;  %v1844_v21 = vsel %vm1684_vm10, %v7418_v26, %v7414_v1  ;;  %v1829_v17 = vsel %vm1669_vm11, %v7462_v2, %v7465_v16 }
 0x51e   :  { %vm1672_vm7 = vcmp.ge.f32.partialorder %v9492_v5, 0.0  ;;  %vm1674_vm9 = vcmp.ge.f32.partialorder %v9493_v62, 0.0  ;;  %vm1707_vm11 = vcmp.ge.f32.partialorder %v9551_v60, 0.0 }
 0x51f   :  { %2071 = vperm.xlu1 %5361, %v1825_v55   ;;  %v7485_v55 = vpop.permute.xlu0 %2226 }
 0x520   :  { %9544 = vst [vmem:[#allocation12_spill] sm:$0xff] %v7485_v55  ;;  %v1824_v55 = vsel %vm1664_vm1, %v7462_v2, %v7465_v16 }
 0x521   :  { %2156 = vperm.xlu0 %5362, %v1842_v32   ;;  %v9545_v32 = vld [vmem:[#allocation54_spill] sm:$0xff] }
 0x522   :  { %vm1686_vm12 = vcmp.ge.f32.partialorder %v9545_v32, 0.0 }
 0x523   :  { %2081 = vperm.xlu1 %5361, %v1827_v20   ;;  %v1846_v58 = vsel %vm1686_vm12, %v7418_v26, %v7414_v1  ;;  %v1831_v20 = vsel %vm1671_vm13, %v7462_v2, %v7465_v16  ;;  %v1833_v1 = vsel %vm1673_vm15, %v7462_v2, %v7465_v16  ;;  %v1826_v26 = vsel %vm1666_vm2, %v7462_v2, %v7465_v16 }
 0x525   :  { %2166 = vperm.xlu0 %5362, %v1844_v21   ;;  %v7496_v21 = vpop.permute.xlu0 %2236 }
 0x526   :  { %9546 = vst [vmem:[#allocation13_spill] sm:$0xff] %v7496_v21  ;;  %v1830_v21 = vsel %vm1670_vm5, %v7462_v2, %v7465_v16 }
 0x527   :  { %2091 = vperm.xlu1 %5361, %v1829_v17   ;;  %v1835_v17 = vsel %vm1675_vm3, %v7462_v2, %v7465_v16 }
 0x529   :  { %2176 = vperm.xlu0 %5362, %v1846_v58  }
 0x52b   :  { %2101 = vperm.xlu1 %5361, %v1831_v20   ;;  %v1828_v20 = vsel %vm1668_vm4, %v7462_v2, %v7465_v16 }
 0x52d   :  { %2066 = vperm.xlu0 %5362, %v1824_v55  }
 0x52f   :  { %2111 = vperm.xlu1 %5361, %v1833_v1  }
 0x530   :  { %v1609_v58 = vpop.xlane.xlu0 %1608 }
 0x531   :  { %2076 = vperm.xlu0 %5362, %v1826_v26   ;;  %v1759_v26 = vrot.slane %v1609_v58, %v7210_v8  ;;  %v1834_v58 = vsel %vm1674_vm9, %v7462_v2, %v7465_v16 }
 0x533   :  { %2121 = vperm.xlu1 %5361, %v1835_v17   ;;  %v9547_v17 = vld [vmem:[#allocation74_spill] sm:$0xff] }
 0x534   :  { %v1633_v55 = vpop.xlane.xlu0 %1632  ;;  %vm1701_vm6 = vcmp.ge.f32.partialorder %v9547_v17, 0.0  ;;  %v9550_v17 = vld [vmem:[#allocation82_spill] sm:$0xff] }
 0x535   :  { %2086 = vperm.xlu0 %5362, %v1828_v20   ;;  %v1791_v1 = vrot.slane %v1633_v55, %v7210_v8  ;;  %v1832_v20 = vsel %vm1672_vm7, %v7462_v2, %v7465_v16  ;;  %v9548_v55 = vld [vmem:[#allocation78_spill] sm:$0xff]  ;;  %vm1705_vm10 = vcmp.ge.f32.partialorder %v9550_v17, 0.0  ;;  %v9554_v16 = vld [vmem:[#allocation92_spill] sm:$0xff]  ;;  %vm1724_vm7 = vcmp.ge.f32.partialorder %v9566_v47, 0.0 }
 0x536   :  { %vm1703_vm8 = vcmp.ge.f32.partialorder %v9548_v55, 0.0  ;;  %vm1709_vm13 = vcmp.ge.f32.partialorder %v9554_v16, 0.0  ;;  %v9557_v17 = vld [vmem:[#allocation96_spill] sm:$0xff]  ;;  %v9570_v47 = vld [vmem:[#allocation110_spill] sm:$0xff] }
 0x537   :  { %2697 = vperm.xlu1 %5361, %v9543_v13   ;;  %v1861_v6 = vsel %vm1701_vm6, %v1759_v26, %v1791_v1  ;;  %v1863_v13 = vsel %vm1703_vm8, %v1759_v26, %v1791_v1  ;;  %v1869_v2 = vsel %vm1709_vm13, %v1759_v26, %v1791_v1  ;;  %vm1711_vm15 = vcmp.ge.f32.partialorder %v9557_v17, 0.0  ;;  %v9572_v17 = vld [vmem:[#allocation116_spill] sm:$0xff] }
 0x538   :  { %vm1725_vm6 = vcmp.ge.f32.partialorder %v9565_v22, 0.0  ;;  %v9569_v22 = vld [vmem:[#allocation113_spill] sm:$0xff]  ;;  %vm1730_vm13 = vcmp.ge.f32.partialorder %v9572_v17, 0.0 }
 0x539   :  { %2096 = vperm.xlu0 %5362, %v1830_v21   ;;  %v7526_v21 = vpop.permute.xlu1 %2191 }
 0x53a   :  { %9549 = vst [vmem:[#allocation132_spill] sm:$0xff] %v7526_v21 }
 0x53b   :  { %2251 = vperm.xlu1 %5361, %v1861_v6   ;;  %v1865_v6 = vsel %vm1705_vm10, %v1759_v26, %v1791_v1  ;;  %vm1729_vm10 = vcmp.ge.f32.partialorder %v9569_v22, 0.0 }
 0x53d   :  { %2106 = vperm.xlu0 %5362, %v1832_v20   ;;  %v1867_v20 = vsel %vm1707_vm11, %v1759_v26, %v1791_v1  ;;  %v7531_v43 = vpop.permute.xlu1 %2201  ;;  %vm1728_vm11 = vcmp.ge.f32.partialorder %v9570_v47, 0.0 }
 0x53e   :  { %9552 = vst [vmem:[#allocation133_spill] sm:$0xff] %v7531_v43  ;;  %v9558_v43 = vld [vmem:[#allocation83_spill] sm:$0xff] }
 0x53f   :  { %2261 = vperm.xlu1 %5361, %v1863_v13   ;;  %v9553_v13 = vld [vmem:[#allocation75_spill] sm:$0xff]  ;;  %vm1704_vm2 = vcmp.ge.f32.partialorder %v9558_v43, 0.0 }
 0x540   :  { %vm1700_vm12 = vcmp.ge.f32.partialorder %v9553_v13, 0.0 }
 0x541   :  { %2116 = vperm.xlu0 %5362, %v1834_v58   ;;  %v1860_v63 = vsel %vm1700_vm12, %v1759_v26, %v1791_v1  ;;  %v9555_v58 = vld [vmem:[#allocation79_spill] sm:$0xff] }
 0x542   :  { %vm1702_vm1 = vcmp.ge.f32.partialorder %v9555_v58, 0.0 }
 0x543   :  { %2271 = vperm.xlu1 %5361, %v1865_v6   ;;  %v1862_v21 = vsel %vm1702_vm1, %v1759_v26, %v1791_v1  ;;  %v7536_v6 = vpop.permute.xlu1 %2211 }
 0x544   :  { %9556 = vst [vmem:[#allocation30_spill] sm:$0xff] %v7536_v6 }
 0x545   :  { %2701 = vperm.xlu0 %5362, %v9538_v4   ;;  %v1871_v4 = vsel %vm1711_vm15, %v1759_v26, %v1791_v1 }
 0x547   :  { %2281 = vperm.xlu1 %5361, %v1867_v20   ;;  %v1864_v20 = vsel %vm1704_vm2, %v1759_v26, %v1791_v1  ;;  %v7540_v30 = vpop.permute.xlu1 %2221 }
 0x548   :  { %9559 = vst [vmem:[#allocation31_spill] sm:$0xff] %v7540_v30 }
 0x549   :  { %2246 = vperm.xlu0 %5362, %v1860_v63   ;;  %v9560_v63 = vld [vmem:[#allocation90_spill] sm:$0xff] }
 0x54a   :  { %vm1706_vm3 = vcmp.ge.f32.partialorder %v9560_v63, 0.0 }
 0x54b   :  { %2291 = vperm.xlu1 %5361, %v1869_v2   ;;  %v1866_v16 = vsel %vm1706_vm3, %v1759_v26, %v1791_v1  ;;  %v9561_v2 = vld [vmem:[#allocation93_spill] sm:$0xff]  ;;  %v7544_v28 = vpop.permute.xlu1 %2231 }
 0x54c   :  { %vm1708_vm4 = vcmp.ge.f32.partialorder %v9561_v2, 0.0  ;;  %9562 = vst [vmem:[#allocation3_spill] sm:$0xff] %v7544_v28  ;;  %v9573_v2 = vld [vmem:[#allocation123_spill] sm:$0xff] }
 0x54d   :  { %2256 = vperm.xlu0 %5362, %v1862_v21   ;;  %v1868_v62 = vsel %vm1708_vm4, %v1759_v26, %v1791_v1  ;;  %v9563_v21 = vld [vmem:[#allocation97_spill] sm:$0xff]  ;;  %vm1733_vm1 = vcmp.ge.f32.partialorder %v9573_v2, 0.0 }
 0x54e   :  { %vm1710_vm5 = vcmp.ge.f32.partialorder %v9563_v21, 0.0 }
 0x54f   :  { %2301 = vperm.xlu1 %5361, %v1871_v4   ;;  %v1870_v6 = vsel %vm1710_vm5, %v1759_v26, %v1791_v1  ;;  %v7547_v4 = vpop.permute.xlu1 %2241  ;;  %v9567_v26 = vld [vmem:[#allocation85_spill] sm:$0xff] }
 0x550   :  { %9564 = vst [vmem:[#allocation14_spill] sm:$0xff] %v7547_v4  ;;  %vm1727_vm8 = vcmp.ge.f32.partialorder %v9567_v26, 0.0  ;;  %v9571_v26 = vld [vmem:[#allocation120_spill] sm:$0xff] }
 0x551   :  { %2266 = vperm.xlu0 %5362, %v1864_v20   ;;  %vm1731_vm12 = vcmp.ge.f32.partialorder %v9571_v26, 0.0 }
 0x555   :  { %2276 = vperm.xlu0 %5362, %v1866_v16  }
 0x559   :  { %2286 = vperm.xlu0 %5362, %v1868_v62  }
 0x55d   :  { %2296 = vperm.xlu0 %5362, %v1870_v6   ;;  %v9568_v6 = vld [vmem:[#allocation88_spill] sm:$0xff] }
 0x55e   :  { %vm1726_vm9 = vcmp.ge.f32.partialorder %v9568_v6, 0.0 }
 0x563   :  { %v7549_v5 = vpop.xlane.xlu1 %1611 }
 0x564   :  { %v1615_v20 = vpop.xlane.xlu0 %1614 }
 0x565   :  { %v1767_v31 = vrot.slane %v1615_v20, %v7210_v8 }
 0x567   :  { %v1636_v30 = vpop.xlane.xlu1 %1635 }
 0x568   :  { %v1639_v18 = vpop.xlane.xlu0 %1638 }
 0x569   :  { %v1799_v16 = vrot.slane %v1639_v18, %v7210_v8 }
 0x56b   :  { %v3198_v62 = vpop.xlane.xlu1 %3197  ;;  %v1885_v28 = vsel %vm1725_vm6, %v1767_v31, %v1799_v16  ;;  %v1884_v12 = vsel %vm1724_vm7, %v1767_v31, %v1799_v16  ;;  %v1887_v20 = vsel %vm1727_vm8, %v1767_v31, %v1799_v16  ;;  %v1886_v18 = vsel %vm1726_vm9, %v1767_v31, %v1799_v16 }
 0x56c   :  { %5371 = vrcp.f32 %v3198_v62  ;;  %v3195_v1 = vpop.xlane.xlu0 %3194  ;;  %2371 = vperm.xlu1 %5361, %v1885_v28   ;;  %2366 = vperm.xlu0 %5362, %v1884_v12   ;;  %v1889_v12 = vsel %vm1729_vm10, %v1767_v31, %v1799_v16  ;;  %v1888_v28 = vsel %vm1728_vm11, %v1767_v31, %v1799_v16  ;;  %v1891_v22 = vsel %vm1731_vm12, %v1767_v31, %v1799_v16 }
 0x56d   :  { %5373 = vrcp.f32 %v3195_v1  ;;  %v1890_v21 = vsel %vm1730_vm13, %v1767_v31, %v1799_v16  ;;  %v1893_v26 = vsel %vm1733_vm1, %v1767_v31, %v1799_v16 }
 0x56f   :  { %v7557_v4 = vpop.permute.xlu1 %2011 }
 0x570   :  { %v3201_v37 = vpop.xlane.xlu0 %3200  ;;  %2381 = vperm.xlu1 %5361, %v1887_v20   ;;  %2376 = vperm.xlu0 %5362, %v1886_v18  }
 0x571   :  { %5375 = vrcp.f32 %v3201_v37 }
 0x573   :  { %v7561_v62 = vpop.permute.xlu1 %2021 }
 0x574   :  { %v3204_v1 = vpop.xlane.xlu0 %3203  ;;  %2391 = vperm.xlu1 %5361, %v1889_v12   ;;  %2386 = vperm.xlu0 %5362, %v1888_v28   ;;  %v9574_v12 = vld [vmem:[#allocation121_spill] sm:$0xff] }
 0x575   :  { %5377 = vrcp.f32 %v3204_v1  ;;  %vm1732_vm15 = vcmp.ge.f32.partialorder %v9574_v12, 0.0 }
 0x576   :  { %v5372_v6 = vpop.eup %5371  ;;  %v1892_v17 = vsel %vm1732_vm15, %v1767_v31, %v1799_v16 }
 0x577   :  { %v5374_v20 = vpop.eup %5373  ;;  %v7565_v18 = vpop.permute.xlu1 %2031  ;;  %v3578_v37 = vmul.f32 %v5372_v6, %v7369_v53  ;;  %v9576_v53 = vld [vmem:[#allocation128_spill] sm:$0xff] }
 0x578   :  { %2401 = vperm.xlu1 %5361, %v1891_v22   ;;  %2396 = vperm.xlu0 %5362, %v1890_v21   ;;  %v3577_v47 = vmul.f32 %v5374_v20, %v7372_v7  ;;  %v9575_v22 = vld [vmem:[#allocation127_spill] sm:$0xff]  ;;  %vm1734_vm3 = vcmp.ge.f32.partialorder %v9576_v53, 0.0  ;;  %v7579_v21 = vrot.slane %v1636_v30, %v7210_v8  ;;  %v9577_v53 = vld [vmem:[#allocation98_spill] sm:$0xff] }
 0x579   :  { %vm1735_vm2 = vcmp.ge.f32.partialorder %v9575_v22, 0.0  ;;  %v1894_v20 = vsel %vm1734_vm3, %v1767_v31, %v1799_v16  ;;  %vm1713_vm4 = vcmp.ge.f32.partialorder %v9577_v53, 0.0  ;;  %v9578_v22 = vld [vmem:[#allocation99_spill] sm:$0xff] }
 0x57a   :  { %v3673_v28 = vpack.c.bf16 %v3578_v37, %v3577_v47  ;;  %v1895_v6 = vsel %vm1735_vm2, %v1767_v31, %v1799_v16  ;;  %vm1712_vm5 = vcmp.ge.f32.partialorder %v9578_v22, 0.0 }
 0x57b   :  { %v7571_v1 = vpop.permute.xlu1 %2041  ;;  %v5376_v63 = vpop.eup %5375 }
 0x57c   :  { %v7573_v60 = vpop.permute.xlu0 %2006  ;;  %2411 = vperm.xlu1 %5361, %v1893_v26   ;;  %2406 = vperm.xlu0 %5362, %v1892_v17   ;;  %v3579_v17 = vmul.f32 %v5376_v63, %v7380_v57  ;;  %v9579_v57 = vld [vmem:[#allocation17_spill] sm:$0xff]  ;;  %v9582_v63 = vld [vmem:[#allocation20_spill] sm:$0xff] }
 0x57d   :  { %5160 = vmatprep.mubr.msk.bf16.mxu1 %vm3192_vm14, %v3673_v28  ;;  %v1763_v28 = vrot.slane %v7549_v5, %v7210_v8  ;;  %v9580_v5 = vld [vmem:[#allocation102_spill] sm:$0xff] }
 0x57e   :  { %vm1715_vm6 = vcmp.ge.f32.partialorder %v9580_v5, 0.0 }
 0x57f   :  { %v5378_v7 = vpop.eup %5377  ;;  %v7581_v47 = vpop.permute.xlu1 %2051  ;;  %v1873_v31 = vsel %vm1713_vm4, %v1763_v28, %v7579_v21  ;;  %v1872_v16 = vsel %vm1712_vm5, %v1763_v28, %v7579_v21 }
 0x580   :  { %v7583_v37 = vpop.permute.xlu0 %2016  ;;  %2421 = vperm.xlu1 %5361, %v1895_v6   ;;  %2416 = vperm.xlu0 %5362, %v1894_v20   ;;  %v3580_v26 = vmul.f32 %v5378_v7, %v7384_v40  ;;  %v9581_v40 = vld [vmem:[#allocation103_spill] sm:$0xff]  ;;  %v1875_v20 = vsel %vm1715_vm6, %v1763_v28, %v7579_v21 }
 0x581   :  { %vm1714_vm7 = vcmp.ge.f32.partialorder %v9581_v40, 0.0 }
 0x582   :  { %v3674_v30 = vpack.c.bf16 %v3580_v26, %v3579_v17  ;;  %v1874_v17 = vsel %vm1714_vm7, %v1763_v28, %v7579_v21 }
 0x583   :  { %v7591_v2 = vpop.permute.xlu1 %2061 }
 0x584   :  { %v7595_v6 = vpop.permute.xlu0 %2026  ;;  %2311 = vperm.xlu1 %5361, %v1873_v31   ;;  %2306 = vperm.xlu0 %5362, %v1872_v16   ;;  %v9584_v31 = vld [vmem:[#allocation105_spill] sm:$0xff]  ;;  %v9585_v16 = vld [vmem:[#allocation23_spill] sm:$0xff] }
 0x585   :  { %5161 = vmatmul.mubr.msk.bf16.vlgmr.msra.gmra.mrb[0].mxu1 %vm3192_vm14, %v3674_v30  ;;  %v9583_v30 = vld [vmem:[#allocation104_spill] sm:$0xff]  ;;  %vm1716_vm9 = vcmp.ge.f32.partialorder %v9584_v31, 0.0 }
 0x586   :  { %5173 = vmatpush3.bf16.msra.mxu1 %v9579_v57  ;;  %vm1717_vm8 = vcmp.ge.f32.partialorder %v9583_v30, 0.0  ;;  %v1876_v12 = vsel %vm1716_vm9, %v1763_v28, %v7579_v21 }
 0x587   :  { %5174 = vmatprep.subr.bf16.mxu1 %v9582_v63  ;;  %v7602_v7 = vpop.permute.xlu1 %2131  ;;  %v1877_v53 = vsel %vm1717_vm8, %v1763_v28, %v7579_v21 }
 0x588   :  { %v7606_v26 = vpop.permute.xlu0 %2036  ;;  %2321 = vperm.xlu1 %5361, %v1875_v20   ;;  %2316 = vperm.xlu0 %5362, %v1874_v17   ;;  %v9586_v20 = vld [vmem:[#allocation108_spill] sm:$0xff]  ;;  %v9588_v17 = vld [vmem:[#allocation26_spill] sm:$0xff] }
 0x589   :  { %vm1719_vm10 = vcmp.ge.f32.partialorder %v9586_v20, 0.0 }
 0x58a   :  { %5175 = vmatpush3.bf16.msra.mxu1 %v9582_v63  ;;  %v9587_v63 = vld [vmem:[#allocation109_spill] sm:$0xff]  ;;  %v1879_v31 = vsel %vm1719_vm10, %v1763_v28, %v7579_v21 }
 0x58b   :  { %5176 = vmatprep.subr.bf16.mxu1 %v9585_v16  ;;  %v7612_v57 = vpop.permute.xlu1 %2141  ;;  %vm1718_vm11 = vcmp.ge.f32.partialorder %v9587_v63, 0.0 }
 0x58c   :  { %v7616_v5 = vpop.permute.xlu0 %2046  ;;  %2331 = vperm.xlu1 %5361, %v1877_v53   ;;  %2326 = vperm.xlu0 %5362, %v1876_v12   ;;  %v1878_v40 = vsel %vm1718_vm11, %v1763_v28, %v7579_v21  ;;  %v9589_v12 = vld [vmem:[#allocation111_spill] sm:$0xff]  ;;  %v9590_v53 = vld [vmem:[#allocation112_spill] sm:$0xff] }
 0x58d   :  { %vm1721_vm12 = vcmp.ge.f32.partialorder %v9589_v12, 0.0  ;;  %vm1720_vm13 = vcmp.ge.f32.partialorder %v9590_v53, 0.0 }
 0x58e   :  { %5177 = vmatpush3.bf16.msra.mxu1 %v9585_v16  ;;  %v9591_v16 = vld [vmem:[#allocation29_spill] sm:$0xff]  ;;  %v1881_v63 = vsel %vm1721_vm12, %v1763_v28, %v7579_v21  ;;  %v1880_v43 = vsel %vm1720_vm13, %v1763_v28, %v7579_v21 }
 0x58f   :  { %5178 = vmatprep.subr.bf16.mxu1 %v9588_v17  ;;  %v7622_v30 = vpop.permute.xlu1 %2151 }
 0x590   :  { %v7626_v22 = vpop.permute.xlu0 %2056  ;;  %2341 = vperm.xlu1 %5361, %v1879_v31   ;;  %2336 = vperm.xlu0 %5362, %v1878_v40   ;;  %v3732_v40 = vpack.c.bf16 %v6341_v61, %v9485_v38  ;;  %v9593_v31 = vld [vmem:[#allocation118_spill] sm:$0xff]  ;;  %v7651_v61 = vpack.c.bf16 %v6353_v3, %v9486_v49  ;;  %v2428_v38 = vsub.f32 %v7350_v23, %v7331_v48  ;;  %v9599_v48 = vld [vmem:[#allocation71_spill] sm:$0xff] }
 0x591   :  { %vm1723_vm1 = vcmp.ge.f32.partialorder %v9593_v31, 0.0  ;;  %v2429_v3 = vsub.f32 %v7350_v23, %v7336_v59  ;;  %v2431_v49 = vsub.f32 %v7350_v23, %v7342_v29  ;;  %v7680_v59 = vrot.slane %v7264_v25, %v7210_v8 }
 0x592   :  { %5179 = vmatpush3.bf16.msra.mxu1 %v9588_v17  ;;  %v9594_v17 = vld [vmem:[#allocation119_spill] sm:$0xff]  ;;  %v1883_v53 = vsel %vm1723_vm1, %v1763_v28, %v7579_v21  ;;  %9595 = vst [vmem:[#allocation56_spill] sm:$0xff] %v7651_v61 }
 0x593   :  { %5180 = vmatprep.subr.bf16.mxu1 %v9591_v16  ;;  %v7632_v20 = vpop.permute.xlu1 %2161  ;;  %vm1722_vm15 = vcmp.ge.f32.partialorder %v9594_v17, 0.0 }
 0x594   :  { %9592 = vst [vmem:[#allocation50_spill] sm:$0xff] %v7632_v20  ;;  %v7636_v55 = vpop.permute.xlu0 %2126  ;;  %2351 = vperm.xlu1 %5361, %v1881_v63   ;;  %2346 = vperm.xlu0 %5362, %v1880_v43   ;;  %v1882_v58 = vsel %vm1722_vm15, %v1763_v28, %v7579_v21  ;;  %v2430_v28 = vsub.f32 %v7350_v23, %v7340_v19  ;;  %v9602_v19 = vld [vmem:[#allocation70_spill] sm:$0xff] }
 0x596   :  { %5181 = vmatpush3.bf16.msra.mxu1 %v9591_v16  ;;  %v9597_v16 = vld [vmem:[#allocation65_spill] sm:$0xff] }
 0x597   :  { %5182 = vmatprep.subr.bf16.mxu1 %v3732_v40  ;;  %v7643_v12 = vpop.permute.xlu1 %2171  ;;  %v2908_v21 = vmul.f32 %v9597_v16, %v2428_v38  ;;  %v2433_v38 = vsub.f32 %v7350_v23, %v7346_v41  ;;  %v2911_v16 = vmul.f32 %v9602_v19, %v2431_v49  ;;  %v2437_v41 = vsub.f32 %v7680_v59, %v7557_v4  ;;  %v9605_v19 = vld [vmem:[#allocation77_spill] sm:$0xff] }
 0x598   :  { %v7647_v13 = vpop.permute.xlu0 %2136  ;;  %2361 = vperm.xlu1 %5361, %v1883_v53   ;;  %2356 = vperm.xlu0 %5362, %v1882_v58   ;;  %v2434_v49 = vsub.f32 %v7350_v23, %v7311_v0  ;;  %v2435_v0 = vsub.f32 %v7350_v23, %v7355_v24  ;;  %v2436_v24 = vsub.f32 %v7680_v59, %v7573_v60 }
 0x599   :  { %v3014_v45 = vmul.f32 1.442695, %v2911_v16 }
 0x59a   :  { %5183 = vmatpush3.bf16.msra.mxu1 %v3732_v40  ;;  %v3008_v40 = vmul.f32 1.442695, %v2908_v21 }
 0x59b   :  { %5196 = vmatprep.subr.bf16.mxu1 %v7651_v61  ;;  %v7658_v63 = vpop.permute.xlu1 %2181  ;;  %v2910_v61 = vmul.f32 %v9599_v48, %v2430_v28 }
 0x59c   :  { %v7656_v43 = vpop.permute.xlu0 %2146  ;;  %9596 = vst [vmem:[#allocation59_spill] sm:$0xff] %v7658_v63  ;;  %v9601_v63 = vld [vmem:[#allocation64_spill] sm:$0xff]  ;;  %5379 = vpow2.f32 %v3008_v40  ;;  %v9606_v40 = vld [vmem:[#allocation94_spill] sm:$0xff] }
 0x59d   :  { %v2909_v17 = vmul.f32 %v9601_v63, %v2429_v3  ;;  %v3012_v29 = vmul.f32 1.442695, %v2910_v61  ;;  %v9604_v63 = vld [vmem:[#allocation76_spill] sm:$0xff] }
 0x59e   :  { %v2913_v3 = vmul.f32 %v9604_v63, %v2433_v38  ;;  %v9607_v38 = vld [vmem:[#allocation87_spill] sm:$0xff] }
 0x59f   :  { %v2072_v53 = vpop.permute.xlu1 %2071  ;;  %v3010_v48 = vmul.f32 1.442695, %v2909_v17  ;;  %5381 = vpow2.f32 %v3012_v29  ;;  %v2441_v17 = vsub.f32 %v7680_v59, %v7565_v18  ;;  %v2914_v63 = vmul.f32 %v9607_v38, %v2434_v49  ;;  %v9608_v29 = vld [vmem:[#allocation106_spill] sm:$0xff]  ;;  %v9611_v38 = vld [vmem:[#allocation95_spill] sm:$0xff] }
 0x5a0   :  { %v7663_v58 = vpop.permute.xlu0 %2156  ;;  %v3018_v61 = vmul.f32 1.442695, %v2913_v3  ;;  %v2445_v3 = vsub.f32 %v7680_v59, %v7581_v47  ;;  %v9609_v49 = vld [vmem:[#allocation86_spill] sm:$0xff] }
 0x5a1   :  { %9598 = vst [vmem:[#allocation55_spill] sm:$0xff] %v7663_v58  ;;  %5383 = vpow2.f32 %v3010_v48  ;;  %v2921_v48 = vmul.f32 %v9608_v29, %v2441_v17  ;;  %v3020_v18 = vmul.f32 1.442695, %v2914_v63  ;;  %v2916_v63 = vmul.f32 %v9611_v38, %v2436_v24 }
 0x5a2   :  { %5385 = vpow2.f32 %v3014_v45  ;;  %v2915_v45 = vmul.f32 %v9609_v49, %v2435_v0  ;;  %v2439_v24 = vsub.f32 %v7680_v59, %v7561_v62 }
 0x5a3   :  { %v7684_v28 = vpop.permute.xlu1 %2081  ;;  %5387 = vpow2.f32 %v3018_v61  ;;  %v3034_v47 = vmul.f32 1.442695, %v2921_v48  ;;  %v9610_v61 = vld [vmem:[#allocation124_spill] sm:$0xff] }
 0x5a4   :  { %v7670_v31 = vpop.permute.xlu0 %2166  ;;  %v3022_v60 = vmul.f32 1.442695, %v2915_v45 }
 0x5a5   :  { %9600 = vst [vmem:[#allocation15_spill] sm:$0xff] %v7670_v31  ;;  %v2912_v31 = vmul.f32 %v9605_v19, %v2432_v42 }
 0x5a6   :  { %v7702_v42 = vpop.eup %5379 }
 0x5a7   :  { %v3016_v4 = vmul.f32 1.442695, %v2912_v31  ;;  %v2092_v20 = vpop.permute.xlu1 %2091  ;;  %v7709_v31 = vrot.slane %v7290_v39, %v7210_v8 }
 0x5a8   :  { %v7682_v21 = vpop.permute.xlu0 %2176 }
 0x5a9   :  { %9603 = vst [vmem:[#allocation18_spill] sm:$0xff] %v7682_v21  ;;  %v2917_v21 = vmul.f32 %v9606_v40, %v2437_v41  ;;  %5389 = vpow2.f32 %v3016_v4  ;;  %v7720_v19 = vpop.eup %5381  ;;  %v2925_v40 = vmul.f32 %v9610_v61, %v2445_v3  ;;  %v2449_v8 = vsub.f32 %v7709_v31, %v2072_v53 }
 0x5aa   :  { %v2438_v4 = vsub.f32 %v7680_v59, %v7583_v37  ;;  %v2453_v48 = vsub.f32 %v7709_v31, %v2092_v20 }
 0x5ab   :  { %v3026_v16 = vmul.f32 1.442695, %v2917_v21  ;;  %v7716_v23 = vpop.permute.xlu1 %2101  ;;  %v3205_v21 = vsel %vm3192_vm14, %v7702_v42, 0.0  ;;  %v7724_v39 = vpop.eup %5383  ;;  %v3042_v29 = vmul.f32 1.442695, %v2925_v40  ;;  %v2929_v53 = vmul.f32 %v7247_v35, %v2449_v8 }
 0x5ac   :  { %v7692_v25 = vpop.permute.xlu0 %2066  ;;  %v7726_v17 = vpop.eup %5385  ;;  %v3024_v35 = vmul.f32 1.442695, %v2916_v63  ;;  %v2933_v61 = vmul.f32 %v7256_v27, %v2453_v48 }
 0x5ad   :  { %5391 = vpow2.f32 %v3026_v16  ;;  %v3211_v16 = vsel %vm3192_vm14, %v7720_v19, 0.0  ;;  %v7739_v49 = vpop.eup %5387  ;;  %v3214_v37 = vsel %vm3192_vm14, %v7726_v17, 0.0 }
 0x5ae   :  { %5393 = vpow2.f32 %v3020_v18  ;;  %v3208_v18 = vsel %vm3192_vm14, %v7724_v39, 0.0  ;;  %v3220_v38 = vsel %vm3192_vm14, %v7739_v49, 0.0 }
 0x5af   :  { %5395 = vpow2.f32 %v3034_v47  ;;  %v2112_v3 = vpop.permute.xlu1 %2111  ;;  %v3050_v47 = vmul.f32 1.442695, %v2929_v53  ;;  %v2440_v53 = vsub.f32 %v7680_v59, %v7595_v6  ;;  %v9614_v6 = vld [vmem:[#allocation107_spill] sm:$0xff] }
 0x5b0   :  { %v7698_v58 = vpop.permute.xlu0 %2076  ;;  %5397 = vpow2.f32 %v3022_v60  ;;  %v2457_v40 = vsub.f32 %v7709_v31, %v2112_v3  ;;  %v7756_v60 = vld [vmem:[#allocation2 + $0x3] ss:$0 sm:$0xff]  ;;  %v3058_v3 = vmul.f32 1.442695, %v2933_v61 }
 0x5b1   :  { %5399 = vpow2.f32 %v3042_v29  ;;  %v2461_v48 = vsub.f32 %v7756_v60, %v7602_v7  ;;  %v2442_v7 = vsub.f32 %v7680_v59, %v7606_v26  ;;  %v2465_v61 = vsub.f32 %v7756_v60, %v7622_v30 }
 0x5b2   :  { %5401 = vpow2.f32 %v3024_v35  ;;  %v2443_v26 = vsub.f32 %v7680_v59, %v7571_v1  ;;  %v2469_v1 = vsub.f32 %v7756_v60, %v7643_v12 }
 0x5b3   :  { %v7743_v45 = vpop.eup %5389  ;;  %5403 = vpow2.f32 %v3050_v47  ;;  %v2945_v30 = vmul.f32 %v7438_v14, %v2465_v61 }
 0x5b4   :  { %v7711_v41 = vpop.permute.xlu0 %2086  ;;  %v3217_v62 = vsel %vm3192_vm14, %v7743_v45, 0.0 }
 0x5b7   :  { %3206 = vadd.xlane.f32.xlu0 %v3205_v21  ;;  %v9612_v21 = vld [vmem:[#allocation101_spill] sm:$0xff] }
 0x5b8   :  { %v7731_v0 = vpop.permute.xlu0 %2096  ;;  %v2918_v20 = vmul.f32 %v9612_v21, %v2438_v4  ;;  %v9613_v4 = vld [vmem:[#allocation100_spill] sm:$0xff] }
 0x5b9   :  { %v2919_v27 = vmul.f32 %v9613_v4, %v2439_v24 }
 0x5ba   :  { %v3028_v29 = vmul.f32 1.442695, %v2918_v20  ;;  %v2920_v20 = vmul.f32 %v9614_v6, %v2440_v53 }
 0x5bb   :  { %3212 = vadd.xlane.f32.xlu0 %v3211_v16  ;;  %v7754_v16 = vpop.eup %5391  ;;  %v3030_v35 = vmul.f32 1.442695, %v2919_v27 }
 0x5bc   :  { %3209 = vadd.xlane.f32.xlu1 %v3208_v18  ;;  %v7750_v8 = vpop.permute.xlu0 %2106  ;;  %v7760_v63 = vpop.eup %5393  ;;  %v2937_v18 = vmul.f32 %v7404_v15, %v2457_v40  ;;  %5405 = vpow2.f32 %v3028_v29  ;;  %v2941_v15 = vmul.f32 %v7420_v51, %v2461_v48  ;;  %v3032_v27 = vmul.f32 1.442695, %v2920_v20  ;;  %v9615_v51 = vld [vmem:[#allocation115_spill] sm:$0xff] }
 0x5bd   :  { %v7770_v21 = vpop.eup %5395  ;;  %v3223_v24 = vsel %vm3192_vm14, %v7760_v63, 0.0  ;;  %5407 = vpow2.f32 %v3058_v3  ;;  %v2922_v29 = vmul.f32 %v9615_v51, %v2442_v7  ;;  %v2444_v20 = vsub.f32 %v7680_v59, %v7616_v5 }
 0x5be   :  { %v3066_v40 = vmul.f32 1.442695, %v2937_v18  ;;  %5409 = vpow2.f32 %v3030_v35  ;;  %v3074_v53 = vmul.f32 1.442695, %v2941_v15  ;;  %v9616_v35 = vld [vmem:[#allocation114_spill] sm:$0xff]  ;;  %v2446_v5 = vsub.f32 %v7680_v59, %v7626_v22 }
 0x5bf   :  { %3215 = vadd.xlane.f32.xlu0 %v3214_v37  ;;  %v3232_v37 = vsel %vm3192_vm14, %v7754_v16, 0.0  ;;  %v2923_v6 = vmul.f32 %v9616_v35, %v2443_v26  ;;  %v3036_v14 = vmul.f32 1.442695, %v2922_v29  ;;  %v3082_v7 = vmul.f32 1.442695, %v2945_v30  ;;  %v7827_v35 = vpop.permute.xlu1 %2121 }
 0x5c0   :  { %3221 = vadd.xlane.f32.xlu1 %v3220_v38  ;;  %v7777_v47 = vpop.permute.xlu0 %2116  ;;  %v7782_v38 = vpop.eup %5397  ;;  %5411 = vpow2.f32 %v3066_v40  ;;  %v2926_v22 = vmul.f32 %v7281_v11, %v2446_v5  ;;  %v2448_v11 = vsub.f32 %v7709_v31, %v7692_v25  ;;  %v2450_v5 = vsub.f32 %v7709_v31, %v7698_v58 }
 0x5c1   :  { %v7786_v4 = vpop.eup %5399  ;;  %v3226_v48 = vsel %vm3192_vm14, %v7782_v38, 0.0  ;;  %5413 = vpow2.f32 %v3032_v27  ;;  %v3038_v26 = vmul.f32 1.442695, %v2923_v6  ;;  %v9617_v27 = vld [vmem:[#allocation125_spill] sm:$0xff] }
 0x5c2   :  { %v7794_v3 = vpop.eup %5401  ;;  %5415 = vpow2.f32 %v3074_v53  ;;  %v2924_v51 = vmul.f32 %v9617_v27, %v2444_v20  ;;  %v2928_v25 = vmul.f32 %v7283_v10, %v2448_v11 }
 0x5c3   :  { %3218 = vadd.xlane.f32.xlu0 %v3217_v62  ;;  %v3244_v62 = vsel %vm3192_vm14, %v7770_v21, 0.0  ;;  %v3229_v61 = vsel %vm3192_vm14, %v7794_v3, 0.0  ;;  %5417 = vpow2.f32 %v3036_v14 }
 0x5c4   :  { %3233 = vadd.xlane.f32.xlu1 %v3232_v37  ;;  %v2702_v18 = vpop.permute.xlu0 %2701  ;;  %v3256_v37 = vsel %vm3192_vm14, %v7786_v4, 0.0  ;;  %5419 = vpow2.f32 %v3082_v7  ;;  %v3048_v10 = vmul.f32 1.442695, %v2928_v25 }
 0x5c5   :  { %v2949_v15 = vmul.f32 %v2702_v18, %v2469_v1  ;;  %5421 = vpow2.f32 %v3038_v26  ;;  %v3040_v1 = vmul.f32 1.442695, %v2924_v51 }
 0x5c7   :  { %3224 = vadd.xlane.f32.xlu0 %v3223_v24  ;;  %v7798_v24 = vpop.eup %5403  ;;  %v3090_v29 = vmul.f32 1.442695, %v2949_v15 }
 0x5c8   :  { %3245 = vadd.xlane.f32.xlu1 %v3244_v62  ;;  %v7807_v40 = vpop.eup %5405  ;;  %v3268_v12 = vsel %vm3192_vm14, %v7798_v24, 0.0  ;;  %v7850_v51 = vpop.permute.xlu0 %2246 }
 0x5c9   :  { %v7811_v62 = vpop.eup %5407  ;;  %v3235_v53 = vsel %vm3192_vm14, %v7807_v40, 0.0  ;;  %5423 = vpow2.f32 %v3090_v29  ;;  %9618 = vst [vmem:[#allocation21_spill] sm:$0xff] %v7850_v51  ;;  %v9675_v51 = vld [vmem:[#allocation89_spill] sm:$0xff] }
 0x5ca   :  { %v7818_v30 = vpop.eup %5409  ;;  %5425 = vpow2.f32 %v3040_v1  ;;  %v2451_v1 = vsub.f32 %v7709_v31, %v7684_v28 }
 0x5cb   :  { %3227 = vadd.xlane.f32.xlu0 %v3226_v48  ;;  %v3280_v48 = vsel %vm3192_vm14, %v7811_v62, 0.0  ;;  %v7822_v18 = vpop.eup %5411  ;;  %v3238_v6 = vsel %vm3192_vm14, %v7818_v30, 0.0 }
 0x5cc   :  { %3257 = vadd.xlane.f32.xlu1 %v3256_v37  ;;  %v2447_v37 = vsub.f32 %v7680_v59, %v7591_v2  ;;  %v7831_v14 = vpop.eup %5413  ;;  %v3292_v20 = vsel %vm3192_vm14, %v7822_v18, 0.0  ;;  %v3044_v59 = vmul.f32 1.442695, %v2926_v22  ;;  %v2930_v22 = vmul.f32 %v7288_v52, %v2450_v5 }
 0x5cd   :  { %v7835_v7 = vpop.eup %5415  ;;  %v3241_v15 = vsel %vm3192_vm14, %v7831_v14, 0.0  ;;  %v2931_v11 = vmul.f32 %v7252_v36, %v2451_v1  ;;  %v2452_v52 = vsub.f32 %v7709_v31, %v7711_v41  ;;  %v2454_v36 = vsub.f32 %v7709_v31, %v7731_v0 }
 0x5ce   :  { %v2927_v2 = vmul.f32 %v7242_v56, %v2447_v37  ;;  %v3304_v26 = vsel %vm3192_vm14, %v7835_v7, 0.0  ;;  %5427 = vpow2.f32 %v3044_v59  ;;  %v3052_v28 = vmul.f32 1.442695, %v2930_v22 }
 0x5cf   :  { %3230 = vadd.xlane.f32.xlu0 %v3229_v61  ;;  %v7842_v61 = vpop.eup %5417  ;;  %v3054_v5 = vmul.f32 1.442695, %v2931_v11  ;;  %v2455_v1 = vsub.f32 %v7709_v31, %v7716_v23  ;;  %v2934_v22 = vmul.f32 %v7296_v9, %v2454_v36  ;;  %v2456_v23 = vsub.f32 %v7709_v31, %v7750_v8 }
 0x5d0   :  { %3269 = vadd.xlane.f32.xlu1 %v3268_v12  ;;  %v7844_v12 = vpop.permute.xlu1 %2697  ;;  %v7848_v27 = vpop.eup %5419  ;;  %v3046_v56 = vmul.f32 1.442695, %v2927_v2  ;;  %v3247_v29 = vsel %vm3192_vm14, %v7842_v61, 0.0 }
 0x5d1   :  { %v2935_v11 = vmul.f32 %v7399_v33, %v2455_v1  ;;  %v2936_v36 = vmul.f32 %v7366_v44, %v2456_v23  ;;  %v2458_v33 = vsub.f32 %v7709_v31, %v7777_v47  ;;  %v2459_v1 = vsub.f32 %v7709_v31, %v7827_v35  ;;  %v9630_v23 = vld [vmem:[#allocation5_spill] sm:$0xff] }
 0x5d2   :  { %5429 = vpow2.f32 %v3046_v56 }
 0x5d3   :  { %3236 = vadd.xlane.f32.xlu0 %v3235_v53  ;;  %v7857_v53 = vpop.eup %5421  ;;  %5431 = vpow2.f32 %v3048_v10  ;;  %v2939_v31 = vmul.f32 %v9630_v23, %v2459_v1 }
 0x5d4   :  { %3281 = vadd.xlane.f32.xlu1 %v3280_v48  ;;  %v3316_v48 = vsel %vm3192_vm14, %v7848_v27, 0.0  ;;  %v7861_v37 = vpop.eup %5423  ;;  %v7866_v58 = vpop.permute.xlu1 %2251  ;;  %5433 = vpow2.f32 %v3052_v28  ;;  %v3060_v28 = vmul.f32 1.442695, %v2934_v22  ;;  %v2938_v22 = vmul.f32 %v7374_v50, %v2458_v33  ;;  %v9631_v50 = vld [vmem:[#allocation58_spill] sm:$0xff] }
 0x5d5   :  { %9619 = vst [vmem:[#allocation24_spill] sm:$0xff] %v7861_v37  ;;  %9620 = vst [vmem:[#allocation16_spill] sm:$0xff] %v7866_v58  ;;  %v7872_v2 = vpop.eup %5425  ;;  %v3328_v59 = vsel %vm3192_vm14, %v7861_v37, 0.0  ;;  %5435 = vpow2.f32 %v3054_v5  ;;  %v3070_v1 = vmul.f32 1.442695, %v2939_v31  ;;  %v9639_v31 = vld [vmem:[#allocation60_spill] sm:$0xff] }
 0x5d6   :  { %v3068_v35 = vmul.f32 1.442695, %v2938_v22 }
 0x5d7   :  { %3239 = vadd.xlane.f32.xlu0 %v3238_v6  ;;  %v7868_v6 = vpop.permute.xlu0 %2256 }
 0x5d8   :  { %3293 = vadd.xlane.f32.xlu1 %v3292_v20  ;;  %9621 = vst [vmem:[#allocation27_spill] sm:$0xff] %v7868_v6  ;;  %v3250_v20 = vsel %vm3192_vm14, %v7857_v53, 0.0  ;;  %v7883_v56 = vpop.permute.xlu1 %2261 }
 0x5d9   :  { %9622 = vst [vmem:[#allocation19_spill] sm:$0xff] %v7883_v56 }
 0x5db   :  { %3242 = vadd.xlane.f32.xlu0 %v3241_v15  ;;  %v3253_v15 = vsel %vm3192_vm14, %v7872_v2, 0.0  ;;  %v7885_v25 = vpop.permute.xlu0 %2266 }
 0x5dc   :  { %3305 = vadd.xlane.f32.xlu1 %v3304_v26  ;;  %v7881_v26 = vpop.eup %5427  ;;  %9623 = vst [vmem:[#allocation22_spill] sm:$0xff] %v7885_v25 }
 0x5dd   :  { %v3259_v41 = vsel %vm3192_vm14, %v7881_v26, 0.0 }
 0x5df   :  { %3248 = vadd.xlane.f32.xlu0 %v3247_v29  ;;  %v2932_v29 = vmul.f32 %v7294_v46, %v2452_v52 }
 0x5e0   :  { %3317 = vadd.xlane.f32.xlu1 %v3316_v48  ;;  %v7892_v48 = vpop.eup %5429 }
 0x5e1   :  { %v3056_v10 = vmul.f32 1.442695, %v2932_v29  ;;  %v3262_v46 = vsel %vm3192_vm14, %v7892_v48, 0.0  ;;  %v7903_v0 = vpop.eup %5431  ;;  %v3062_v29 = vmul.f32 1.442695, %v2935_v11 }
 0x5e2   :  { %v3265_v9 = vsel %vm3192_vm14, %v7903_v0, 0.0  ;;  %v7910_v52 = vpop.eup %5433 }
 0x5e3   :  { %3251 = vadd.xlane.f32.xlu0 %v3250_v20  ;;  %v7897_v20 = vpop.permute.xlu1 %2271  ;;  %5437 = vpow2.f32 %v3056_v10  ;;  %v3271_v8 = vsel %vm3192_vm14, %v7910_v52, 0.0  ;;  %v3064_v10 = vmul.f32 1.442695, %v2936_v36 }
 0x5e4   :  { %3329 = vadd.xlane.f32.xlu1 %v3328_v59  ;;  %9624 = vst [vmem:[#allocation25_spill] sm:$0xff] %v7897_v20  ;;  %v7899_v59 = vpop.permute.xlu0 %2276  ;;  %5439 = vpow2.f32 %v3060_v28  ;;  %v2460_v28 = vsub.f32 %v7756_v60, %v7636_v55  ;;  %v2462_v55 = vsub.f32 %v7756_v60, %v7647_v13  ;;  %v9651_v20 = vld [vmem:[#allocation10_spill] sm:$0xff] }
 0x5e5   :  { %9625 = vst [vmem:[#allocation28_spill] sm:$0xff] %v7899_v59  ;;  %5441 = vpow2.f32 %v3062_v29 }
 0x5e6   :  { %5443 = vpow2.f32 %v3064_v10  ;;  %v9635_v10 = vld [vmem:[#allocation61_spill] sm:$0xff] }
 0x5e7   :  { %3254 = vadd.xlane.f32.xlu0 %v3253_v15  ;;  %v7912_v15 = vpop.permute.xlu1 %2281  ;;  %5445 = vpow2.f32 %v3068_v35 }
 0x5e8   :  { %9626 = vst [vmem:[#allocation53_spill] sm:$0xff] %v7912_v15  ;;  %v7914_v5 = vpop.permute.xlu0 %2286  ;;  %5447 = vpow2.f32 %v3070_v1 }
 0x5e9   :  { %9627 = vst [vmem:[#allocation54_spill] sm:$0xff] %v7914_v5 }
 0x5eb   :  { %3260 = vadd.xlane.f32.xlu0 %v3259_v41  ;;  %v7922_v41 = vpop.eup %5435 }
 0x5ec   :  { %v7930_v44 = vpop.permute.xlu0 %2296  ;;  %v3274_v47 = vsel %vm3192_vm14, %v7922_v41, 0.0 }
 0x5ed   :  { %9629 = vst [vmem:[#allocation20_spill] sm:$0xff] %v7930_v44  ;;  %v7934_v11 = vpop.eup %5437 }
 0x5ee   :  { %v3277_v29 = vsel %vm3192_vm14, %v7934_v11, 0.0  ;;  %v7944_v36 = vpop.eup %5439 }
 0x5ef   :  { %3263 = vadd.xlane.f32.xlu0 %v3262_v46  ;;  %v7927_v46 = vpop.permute.xlu1 %2291  ;;  %v3283_v22 = vsel %vm3192_vm14, %v7944_v36, 0.0  ;;  %v7954_v23 = vpop.eup %5441 }
 0x5f0   :  { %9628 = vst [vmem:[#allocation17_spill] sm:$0xff] %v7927_v46  ;;  %v3286_v35 = vsel %vm3192_vm14, %v7954_v23, 0.0 }
 0x5f3   :  { %3266 = vadd.xlane.f32.xlu0 %v3265_v9  ;;  %v7940_v9 = vpop.permute.xlu0 %2366  ;;  %v7946_v33 = vpop.permute.xlu1 %2301 }
 0x5f4   :  { %9632 = vst [vmem:[#allocation23_spill] sm:$0xff] %v7940_v9  ;;  %9633 = vst [vmem:[#allocation26_spill] sm:$0xff] %v7946_v33  ;;  %v7966_v33 = vpop.eup %5443 }
 0x5f5   :  { %2705 = vperm.xlu1 %5361, %v9545_v32   ;;  %v3289_v1 = vsel %vm3192_vm14, %v7966_v33, 0.0 }
 0x5f7   :  { %3272 = vadd.xlane.f32.xlu0 %v3271_v8  ;;  %v9634_v8 = vld [vmem:[#allocation130_spill] sm:$0xff]  ;;  %v7956_v9 = vpop.permute.xlu1 %2371  ;;  %v7958_v44 = vpop.permute.xlu0 %2376 }
 0x5f8   :  { %9636 = vst [vmem:[#allocation29_spill] sm:$0xff] %v7956_v9  ;;  %9637 = vst [vmem:[#allocation65_spill] sm:$0xff] %v7958_v44  ;;  %v2464_v44 = vsub.f32 %v7756_v60, %v7656_v43  ;;  %v9645_v43 = vld [vmem:[#allocation67_spill] sm:$0xff] }
 0x5f9   :  { %2709 = vperm.xlu1 %5361, %v9540_v54  }
 0x5fb   :  { %3275 = vadd.xlane.f32.xlu0 %v3274_v47  ;;  %v2940_v47 = vmul.f32 %v9634_v8, %v2460_v28  ;;  %v2463_v28 = vsub.f32 %v7756_v60, %v7612_v57  ;;  %v9638_v8 = vld [vmem:[#allocation131_spill] sm:$0xff]  ;;  %v7971_v57 = vpop.permute.xlu1 %2381 }
 0x5fc   :  { %v2942_v13 = vmul.f32 %v9638_v8, %v2462_v55  ;;  %9640 = vst [vmem:[#allocation71_spill] sm:$0xff] %v7971_v57  ;;  %v7974_v55 = vpop.permute.xlu0 %2386  ;;  %v7978_v8 = vpop.eup %5445 }
 0x5fd   :  { %2713 = vperm.xlu1 %5361, %v9631_v50   ;;  %v2943_v9 = vmul.f32 %v7427_v34, %v2463_v28  ;;  %9642 = vst [vmem:[#allocation64_spill] sm:$0xff] %v7974_v55  ;;  %v9643_v34 = vld [vmem:[#allocation4_spill] sm:$0xff]  ;;  %v3295_v57 = vsel %vm3192_vm14, %v7978_v8, 0.0  ;;  %v7986_v46 = vpop.eup %5447 }
 0x5fe   :  { %v2944_v28 = vmul.f32 %v9643_v34, %v2464_v44  ;;  %v3298_v15 = vsel %vm3192_vm14, %v7986_v46, 0.0 }
 0x5ff   :  { %3278 = vadd.xlane.f32.xlu0 %v3277_v29  ;;  %v3072_v29 = vmul.f32 1.442695, %v2940_v47  ;;  %v9641_v47 = vld [vmem:[#allocation63_spill] sm:$0xff]  ;;  %v7988_v55 = vpop.permute.xlu1 %2391 }
 0x600   :  { %9646 = vst [vmem:[#allocation70_spill] sm:$0xff] %v7988_v55  ;;  %v7990_v5 = vpop.permute.xlu0 %2396  ;;  %v3080_v44 = vmul.f32 1.442695, %v2944_v28 }
 0x601   :  { %2721 = vperm.xlu1 %5361, %v9635_v10   ;;  %5449 = vpow2.f32 %v3072_v29  ;;  %v9644_v29 = vld [vmem:[#allocation55_spill] sm:$0xff]  ;;  %9647 = vst [vmem:[#allocation76_spill] sm:$0xff] %v7990_v5 }
 0x603   :  { %3284 = vadd.xlane.f32.xlu0 %v3283_v22  ;;  %v3076_v22 = vmul.f32 1.442695, %v2942_v13  ;;  %v2466_v13 = vsub.f32 %v7756_v60, %v9644_v29  ;;  %v9650_v29 = vld [vmem:[#allocation66_spill] sm:$0xff]  ;;  %v8001_v5 = vpop.permute.xlu1 %2401 }
 0x604   :  { %9652 = vst [vmem:[#allocation77_spill] sm:$0xff] %v8001_v5 }
 0x605   :  { %2725 = vperm.xlu1 %5361, %v9639_v31   ;;  %5451 = vpow2.f32 %v3076_v22 }
 0x607   :  { %3287 = vadd.xlane.f32.xlu0 %v3286_v35  ;;  %v3078_v35 = vmul.f32 1.442695, %v2943_v9  ;;  %v9648_v9 = vld [vmem:[#allocation50_spill] sm:$0xff] }
 0x608   :  { %v2467_v22 = vsub.f32 %v7756_v60, %v9648_v9  ;;  %v8004_v9 = vpop.permute.xlu0 %2406 }
 0x609   :  { %2729 = vperm.xlu1 %5361, %v9641_v47   ;;  %5453 = vpow2.f32 %v3078_v35  ;;  %v9653_v35 = vld [vmem:[#allocation69_spill] sm:$0xff]  ;;  %9654 = vst [vmem:[#allocation94_spill] sm:$0xff] %v8004_v9  ;;  %v8018_v9 = vpop.permute.xlu1 %2411 }
 0x60a   :  { %v2947_v55 = vmul.f32 %v9651_v20, %v2467_v22  ;;  %5455 = vpow2.f32 %v3080_v44  ;;  %v9656_v22 = vld [vmem:[#allocation73_spill] sm:$0xff]  ;;  %9657 = vst [vmem:[#allocation87_spill] sm:$0xff] %v8018_v9 }
 0x60b   :  { %3290 = vadd.xlane.f32.xlu0 %v3289_v1  ;;  %v9649_v1 = vld [vmem:[#allocation6_spill] sm:$0xff]  ;;  %v7998_v59 = vpop.eup %5449 }
 0x60c   :  { %v2946_v34 = vmul.f32 %v9649_v1, %v2466_v13  ;;  %v3301_v28 = vsel %vm3192_vm14, %v7998_v59, 0.0  ;;  %v9655_v1 = vld [vmem:[#allocation15_spill] sm:$0xff]  ;;  %v8020_v5 = vpop.permute.xlu0 %2416 }
 0x60d   :  { %2737 = vperm.xlu1 %5361, %v9645_v43   ;;  %v2468_v25 = vsub.f32 %v7756_v60, %v9655_v1  ;;  %9658 = vst [vmem:[#allocation106_spill] sm:$0xff] %v8020_v5  ;;  %v9659_v1 = vld [vmem:[#allocation72_spill] sm:$0xff] }
 0x60f   :  { %3296 = vadd.xlane.f32.xlu0 %v3295_v57  ;;  %v3084_v57 = vmul.f32 1.442695, %v2946_v34  ;;  %v8008_v13 = vpop.eup %5451  ;;  %v2948_v20 = vmul.f32 %v7844_v12, %v2468_v25  ;;  %v8027_v25 = vpop.permute.xlu1 %2421 }
 0x610   :  { %v3307_v44 = vsel %vm3192_vm14, %v8008_v13, 0.0  ;;  %9660 = vst [vmem:[#allocation86_spill] sm:$0xff] %v8027_v25  ;;  %v9667_v25 = vld [vmem:[#allocation78_spill] sm:$0xff] }
 0x611   :  { %2741 = vperm.xlu1 %5361, %v9650_v29   ;;  %5457 = vpow2.f32 %v3084_v57  ;;  %v3088_v56 = vmul.f32 1.442695, %v2948_v20  ;;  %v9661_v57 = vld [vmem:[#allocation75_spill] sm:$0xff] }
 0x612   :  { %v9663_v20 = vld [vmem:[#allocation79_spill] sm:$0xff] }
 0x613   :  { %3299 = vadd.xlane.f32.xlu0 %v3298_v15  ;;  %v3086_v15 = vmul.f32 1.442695, %v2947_v55  ;;  %v8016_v34 = vpop.eup %5453 }
 0x614   :  { %v3310_v55 = vsel %vm3192_vm14, %v8016_v34, 0.0  ;;  %v8025_v12 = vpop.eup %5455 }
 0x615   :  { %2745 = vperm.xlu1 %5361, %v9653_v35   ;;  %5459 = vpow2.f32 %v3086_v15 }
 0x616   :  { %5461 = vpow2.f32 %v3088_v56  ;;  %v8041_v56 = vpop.permute.xlu1 %2311 }
 0x617   :  { %3302 = vadd.xlane.f32.xlu0 %v3301_v28  ;;  %v8030_v28 = vpop.permute.xlu0 %2306  ;;  %9665 = vst [vmem:[#allocation101_spill] sm:$0xff] %v8041_v56 }
 0x618   :  { %9662 = vst [vmem:[#allocation124_spill] sm:$0xff] %v8030_v28 }
 0x619   :  { %2753 = vperm.xlu1 %5361, %v9656_v22  }
 0x61b   :  { %3308 = vadd.xlane.f32.xlu0 %v3307_v44  ;;  %v3313_v44 = vsel %vm3192_vm14, %v8025_v12, 0.0  ;;  %v8034_v15 = vpop.eup %5457 }
 0x61c   :  { %v3319_v5 = vsel %vm3192_vm14, %v8034_v15, 0.0 }
 0x61d   :  { %2757 = vperm.xlu1 %5361, %v9659_v1  }
 0x61f   :  { %3311 = vadd.xlane.f32.xlu0 %v3310_v55  ;;  %v8039_v9 = vpop.eup %5459  ;;  %v8043_v55 = vpop.permute.xlu0 %2316 }
 0x620   :  { %9664 = vst [vmem:[#allocation95_spill] sm:$0xff] %v8039_v9  ;;  %9666 = vst [vmem:[#allocation100_spill] sm:$0xff] %v8043_v55  ;;  %v3322_v28 = vsel %vm3192_vm14, %v8039_v9, 0.0  ;;  %v8048_v6 = vpop.eup %5461 }
 0x621   :  { %2761 = vperm.xlu1 %5361, %v9661_v57   ;;  %9668 = vst [vmem:[#allocation107_spill] sm:$0xff] %v8048_v6  ;;  %v3325_v56 = vsel %vm3192_vm14, %v8048_v6, 0.0  ;;  %v9688_v6 = vld [vmem:[#allocation109_spill] sm:$0xff] }
 0x623   :  { %3314 = vadd.xlane.f32.xlu0 %v3313_v44  ;;  %v8050_v44 = vpop.permute.xlu1 %2321  ;;  %v8053_v58 = vpop.permute.xlu0 %2326 }
 0x624   :  { %9669 = vst [vmem:[#allocation115_spill] sm:$0xff] %v8050_v44  ;;  %9671 = vst [vmem:[#allocation114_spill] sm:$0xff] %v8053_v58 }
 0x625   :  { %2769 = vperm.xlu1 %5361, %v9663_v20   ;;  %v9670_v20 = vld [vmem:[#allocation83_spill] sm:$0xff] }
 0x627   :  { %3320 = vadd.xlane.f32.xlu0 %v3319_v5  ;;  %v9672_v5 = vld [vmem:[#allocation90_spill] sm:$0xff]  ;;  %v8058_v55 = vpop.permute.xlu1 %2331 }
 0x628   :  { %9673 = vst [vmem:[#allocation125_spill] sm:$0xff] %v8058_v55 }
 0x629   :  { %2773 = vperm.xlu1 %5361, %v9667_v25   ;;  %v8060_v25 = vpop.permute.xlu0 %2336 }
 0x62a   :  { %9674 = vst [vmem:[#allocation5_spill] sm:$0xff] %v8060_v25  ;;  %v9684_v25 = vld [vmem:[#allocation99_spill] sm:$0xff] }
 0x62b   :  { %3323 = vadd.xlane.f32.xlu0 %v3322_v28  ;;  %v8063_v57 = vpop.permute.xlu1 %2341  ;;  %v9677_v28 = vld [vmem:[#allocation93_spill] sm:$0xff] }
 0x62c   :  { %9676 = vst [vmem:[#allocation58_spill] sm:$0xff] %v8063_v57  ;;  %v9685_v57 = vld [vmem:[#allocation103_spill] sm:$0xff] }
 0x62d   :  { %2777 = vperm.xlu1 %5361, %v9670_v20   ;;  %v8066_v44 = vpop.permute.xlu0 %2346  ;;  %v9679_v20 = vld [vmem:[#allocation97_spill] sm:$0xff] }
 0x62e   :  { %9678 = vst [vmem:[#allocation130_spill] sm:$0xff] %v8066_v44 }
 0x62f   :  { %3326 = vadd.xlane.f32.xlu0 %v3325_v56  ;;  %v8069_v58 = vpop.permute.xlu1 %2351  ;;  %v9682_v56 = vld [vmem:[#allocation96_spill] sm:$0xff] }
 0x630   :  { %9680 = vst [vmem:[#allocation61_spill] sm:$0xff] %v8069_v58 }
 0x631   :  { %2785 = vperm.xlu1 %5361, %v9672_v5   ;;  %v8071_v1 = vpop.permute.xlu0 %2356 }
 0x632   :  { %9681 = vst [vmem:[#allocation131_spill] sm:$0xff] %v8071_v1 }
 0x633   :  { %v8074_v55 = vpop.permute.xlu1 %2361 }
 0x634   :  { %9683 = vst [vmem:[#allocation60_spill] sm:$0xff] %v8074_v55 }
 0x635   :  { %2789 = vperm.xlu1 %5361, %v9675_v51  }
 0x639   :  { %2793 = vperm.xlu1 %5361, %v9677_v28  }
 0x63d   :  { %2801 = vperm.xlu1 %5361, %v9679_v20   ;;  %v9686_v20 = vld [vmem:[#allocation102_spill] sm:$0xff] }
 0x641   :  { %2805 = vperm.xlu1 %5361, %v9682_v56   ;;  %v9687_v56 = vld [vmem:[#allocation105_spill] sm:$0xff] }
 0x644   :  { %v3207_v5 = vpop.xlane.xlu0 %3206 }
 0x645   :  { %2809 = vperm.xlu1 %5361, %v9684_v25   ;;  %5463 = vrcp.f32 %v3207_v5 }
 0x648   :  { %v3213_v51 = vpop.xlane.xlu0 %3212 }
 0x649   :  { %2817 = vperm.xlu1 %5361, %v9685_v57   ;;  %v3210_v28 = vpop.xlane.xlu1 %3209 }
 0x64a   :  { %5465 = vrcp.f32 %v3210_v28 }
 0x64b   :  { %5467 = vrcp.f32 %v3213_v51 }
 0x64c   :  { %v3216_v44 = vpop.xlane.xlu0 %3215 }
 0x64d   :  { %5469 = vrcp.f32 %v3216_v44  ;;  %2821 = vperm.xlu1 %5361, %v9686_v20   ;;  %v3222_v58 = vpop.xlane.xlu1 %3221 }
 0x64e   :  { %5471 = vrcp.f32 %v3222_v58 }
 0x64f   :  { %v5464_v22 = vpop.eup %5463 }
 0x650   :  { %v3219_v1 = vpop.xlane.xlu0 %3218  ;;  %v3581_v51 = vmul.f32 %v5464_v22, %v7702_v42  ;;  %v9689_v42 = vld [vmem:[#allocation108_spill] sm:$0xff] }
 0x651   :  { %5473 = vrcp.f32 %v3219_v1  ;;  %2825 = vperm.xlu1 %5361, %v9687_v56   ;;  %v3234_v55 = vpop.xlane.xlu1 %3233 }
 0x654   :  { %v5466_v25 = vpop.eup %5465  ;;  %v3225_v5 = vpop.xlane.xlu0 %3224 }
 0x655   :  { %v5468_v37 = vpop.eup %5467  ;;  %2833 = vperm.xlu1 %5361, %v9688_v6   ;;  %v3246_v57 = vpop.xlane.xlu1 %3245  ;;  %v3582_v44 = vmul.f32 %v5466_v25, %v7724_v39  ;;  %5475 = vrcp.f32 %v3225_v5 }
 0x656   :  { %v3583_v1 = vmul.f32 %v5468_v37, %v7720_v19 }
 0x657   :  { %v5470_v28 = vpop.eup %5469  ;;  %v3675_v20 = vpack.c.bf16 %v3582_v44, %v3581_v51  ;;  %v9691_v44 = vld [vmem:[#allocation119_spill] sm:$0xff] }
 0x658   :  { %v5162_v58 = vpop.f32.mrb[0].mxu1  ;;  %v3228_v35 = vpop.xlane.xlu0 %3227  ;;  %v3584_v56 = vmul.f32 %v5470_v28, %v7726_v17 }
 0x659   :  { %v5472_v9 = vpop.eup %5471  ;;  %4563 = vst.msk [vmem:[%s9125_s3 + $0x10] sm:$0xff] %vm120_vm0, %v5162_v58  ;;  %5477 = vrcp.f32 %v3228_v35  ;;  %v3821_v6 = vpop.f32.mrb[1].mxu1  ;;  %2837 = vperm.xlu1 %5361, %v9689_v42   ;;  %5164 = vmatprep.mubr.msk.bf16.mxu1 %vm3192_vm14, %v3675_v20  ;;  %v9690_v20 = vld [vmem:[#allocation112_spill] sm:$0xff] }
 0x65a   :  { %v3258_v39 = vpop.xlane.xlu1 %3257  ;;  %4561 = vst.msk [vmem:[%s9125_s3] sm:$0xff] %vm120_vm0, %v3821_v6  ;;  %v5163_v19 = vpop.f32.mrb[2].mxu1  ;;  %v3676_v17 = vpack.c.bf16 %v3584_v56, %v3583_v1  ;;  %5479 = vrcp.f32 %v3234_v55  ;;  %v3586_v25 = vmul.f32 %v5472_v9, %v7739_v49 }
 0x65b   :  { %v5474_v37 = vpop.eup %5473  ;;  %4564 = vst.msk [vmem:[%s9125_s3 + $0x18] sm:$0xff] %vm120_vm0, %v5163_v19  ;;  %v3824_v35 = vpop.f32.mrb[3].mxu1  ;;  %v9692_v19 = vld [vmem:[#allocation118_spill] sm:$0xff] }
 0x65c   :  { %4562 = vst.msk [vmem:[%s9125_s3 + $0x8] sm:$0xff] %vm120_vm0, %v3824_v35  ;;  %v3231_v22 = vpop.xlane.xlu0 %3230  ;;  %5165 = vmatmul.mubr.msk.bf16.gmra.mrb[4].mxu1 %vm3192_vm14, %v3676_v17  ;;  %v3585_v6 = vmul.f32 %v5474_v37, %v7743_v45 }
 0x65d   :  { %5481 = vrcp.f32 %v3231_v22  ;;  %2841 = vperm.xlu1 %5361, %v9690_v20  }
 0x65e   :  { %v8107_v55 = vpop.xlane.xlu1 %3269  ;;  %v3677_v56 = vpack.c.bf16 %v3586_v25, %v3585_v6 }
 0x65f   :  { %v5476_v51 = vpop.eup %5475 }
 0x660   :  { %v3237_v5 = vpop.xlane.xlu0 %3236  ;;  %5168 = vmatprep.mubr.msk.bf16.mxu1 %vm3192_vm14, %v3677_v56  ;;  %v3587_v45 = vmul.f32 %v5476_v51, %v7760_v63  ;;  %v9693_v63 = vld [vmem:[#allocation110_spill] sm:$0xff] }
 0x661   :  { %2849 = vperm.xlu1 %5361, %v9691_v44   ;;  %5483 = vrcp.f32 %v3237_v5 }
 0x662   :  { %v8111_v28 = vpop.xlane.xlu1 %3281 }
 0x663   :  { %v5478_v58 = vpop.eup %5477 }
 0x664   :  { %v3240_v1 = vpop.xlane.xlu0 %3239  ;;  %v3588_v49 = vmul.f32 %v5478_v58, %v7782_v38  ;;  %v5480_v9 = vpop.eup %5479  ;;  %v9694_v58 = vld [vmem:[#allocation116_spill] sm:$0xff] }
 0x665   :  { %5485 = vrcp.f32 %v3240_v1  ;;  %2853 = vperm.xlu1 %5361, %v9692_v19   ;;  %v3590_v25 = vmul.f32 %v5480_v9, %v7754_v16  ;;  %v9695_v9 = vld [vmem:[#allocation120_spill] sm:$0xff] }
 0x666   :  { %v8116_v17 = vpop.xlane.xlu1 %3293  ;;  %v3678_v37 = vpack.c.bf16 %v3588_v49, %v3587_v45  ;;  %5487 = vrcp.f32 %v3246_v57 }
 0x667   :  { %v5482_v35 = vpop.eup %5481 }
 0x668   :  { %v3243_v22 = vpop.xlane.xlu0 %3242  ;;  %5169 = vmatmul.mubr.msk.bf16.gmra.mrb[8].mxu1 %vm3192_vm14, %v3678_v37  ;;  %v3589_v6 = vmul.f32 %v5482_v35, %v7794_v3 }
 0x669   :  { %5489 = vrcp.f32 %v3243_v22  ;;  %2873 = vperm.xlu1 %5361, %v9693_v63  }
 0x66a   :  { %v8122_v38 = vpop.xlane.xlu1 %3305  ;;  %v3679_v56 = vpack.c.bf16 %v3590_v25, %v3589_v6  ;;  %v9696_v6 = vld [vmem:[#allocation18_spill] sm:$0xff] }
 0x66b   :  { %v5484_v51 = vpop.eup %5483  ;;  %v2470_v25 = vsub.f32 %v7756_v60, %v9696_v6 }
 0x66c   :  { %v3249_v5 = vpop.xlane.xlu0 %3248  ;;  %5184 = vmatprep.mubr.msk.bf16.mxu1 %vm3192_vm14, %v3679_v56  ;;  %v3591_v3 = vmul.f32 %v5484_v51, %v7807_v40  ;;  %v9697_v56 = vld [vmem:[#allocation33_spill] sm:$0xff]  ;;  %v9698_v40 = vld [vmem:[#allocation32_spill] sm:$0xff] }
 0x66d   :  { %2881 = vperm.xlu1 %5361, %v9694_v58   ;;  %5491 = vrcp.f32 %v3249_v5  ;;  %v3734_v5 = vpack.c.bf16 %v9698_v40, %v9697_v56  ;;  %v9699_v58 = vld [vmem:[#allocation56_spill] sm:$0xff]  ;;  %v9702_v56 = vld [vmem:[#allocation35_spill] sm:$0xff] }
 0x66e   :  { %v8126_v57 = vpop.xlane.xlu1 %3317 }
 0x66f   :  { %v5486_v1 = vpop.eup %5485 }
 0x670   :  { %v3592_v16 = vmul.f32 %v5486_v1, %v7818_v30  ;;  %v3252_v45 = vpop.xlane.xlu0 %3251  ;;  %v5488_v49 = vpop.eup %5487  ;;  %v9700_v1 = vld [vmem:[#allocation81_spill] sm:$0xff] }
 0x671   :  { %5493 = vrcp.f32 %v3252_v45  ;;  %2885 = vperm.xlu1 %5361, %v9695_v9   ;;  %v3594_v51 = vmul.f32 %v5488_v49, %v7770_v21  ;;  %v9701_v45 = vld [vmem:[#allocation59_spill] sm:$0xff]  ;;  %v9704_v49 = vld [vmem:[#allocation121_spill] sm:$0xff] }
 0x672   :  { %v8131_v37 = vpop.xlane.xlu1 %3329  ;;  %v3680_v35 = vpack.c.bf16 %v3592_v16, %v3591_v3  ;;  %5495 = vrcp.f32 %v3258_v39  ;;  %v2471_v9 = vsub.f32 %v7756_v60, %v9701_v45  ;;  %v9705_v60 = vld [vmem:[#allocation37_spill] sm:$0xff] }
 0x673   :  { %v5490_v22 = vpop.eup %5489 }
 0x674   :  { %v3255_v63 = vpop.xlane.xlu0 %3254  ;;  %5185 = vmatmul.mubr.msk.bf16.vlgmr.msra.gmra.mrb[12].mxu1 %vm3192_vm14, %v3680_v35  ;;  %v3593_v30 = vmul.f32 %v5490_v22, %v7831_v14  ;;  %v9703_v14 = vld [vmem:[#allocation34_spill] sm:$0xff] }
 0x675   :  { %5497 = vrcp.f32 %v3255_v63  ;;  %5197 = vmatpush3.bf16.msra.mxu1 %v9699_v58  ;;  %2857 = vperm.xlu1 %5361, %v9700_v1   ;;  %v3735_v22 = vpack.c.bf16 %v9703_v14, %v9702_v56  ;;  %v9706_v58 = vld [vmem:[#allocation36_spill] sm:$0xff]  ;;  %v9709_v56 = vld [vmem:[#allocation38_spill] sm:$0xff] }
 0x676   :  { %v2706_v3 = vpop.permute.xlu1 %2705  ;;  %5198 = vmatprep.subr.bf16.mxu1 %v3734_v5  ;;  %v3681_v16 = vpack.c.bf16 %v3594_v51, %v3593_v30  ;;  %v3736_v1 = vpack.c.bf16 %v9706_v58, %v9705_v60 }
 0x677   :  { %v2950_v39 = vmul.f32 %v2706_v3, %v2470_v25  ;;  %v5492_v21 = vpop.eup %5491 }
 0x678   :  { %v3261_v6 = vpop.xlane.xlu0 %3260  ;;  %5188 = vmatprep.mubr.msk.bf16.mxu1 %vm3192_vm14, %v3681_v16  ;;  %v3595_v3 = vmul.f32 %v5492_v21, %v7842_v61 }
 0x679   :  { %v3092_v35 = vmul.f32 1.442695, %v2950_v39  ;;  %5199 = vmatpush3.bf16.msra.mxu1 %v3734_v5  ;;  %2889 = vperm.xlu1 %5361, %v9704_v49   ;;  %v9707_v5 = vld [vmem:[#allocation123_spill] sm:$0xff] }
 0x67a   :  { %v2710_v63 = vpop.permute.xlu1 %2709  ;;  %5200 = vmatprep.subr.bf16.mxu1 %v3735_v22 }
 0x67b   :  { %5499 = vpow2.f32 %v3092_v35  ;;  %v2951_v40 = vmul.f32 %v2710_v63, %v2471_v9  ;;  %v5494_v25 = vpop.eup %5493 }
 0x67c   :  { %5501 = vrcp.f32 %v3261_v6  ;;  %v3264_v51 = vpop.xlane.xlu0 %3263  ;;  %v3596_v39 = vmul.f32 %v5494_v25, %v7857_v53  ;;  %v5496_v16 = vpop.eup %5495  ;;  %v9708_v6 = vld [vmem:[#allocation39_spill] sm:$0xff] }
 0x67d   :  { %v3094_v30 = vmul.f32 1.442695, %v2951_v40  ;;  %5503 = vrcp.f32 %v3264_v51  ;;  %5201 = vmatpush3.bf16.msra.mxu1 %v3735_v22  ;;  %2893 = vperm.xlu1 %5361, %v9707_v5   ;;  %v3737_v14 = vpack.c.bf16 %v9709_v56, %v9708_v6  ;;  %v3598_v53 = vmul.f32 %v5496_v16, %v7786_v4  ;;  %v9710_v22 = vld [vmem:[#allocation85_spill] sm:$0xff]  ;;  %v9712_v40 = vld [vmem:[#allocation40_spill] sm:$0xff]  ;;  %v9713_v51 = vld [vmem:[#allocation127_spill] sm:$0xff] }
 0x67e   :  { %5202 = vmatprep.subr.bf16.mxu1 %v3736_v1  ;;  %v3682_v45 = vpack.c.bf16 %v3596_v39, %v3595_v3  ;;  %v9715_v3 = vld [vmem:[#allocation42_spill] sm:$0xff] }
 0x67f   :  { %5505 = vpow2.f32 %v3094_v30  ;;  %v5498_v9 = vpop.eup %5497 }
 0x680   :  { %5507 = vrcp.f32 %v8107_v55  ;;  %v3267_v35 = vpop.xlane.xlu0 %3266  ;;  %5189 = vmatmul.mubr.msk.bf16.gmra.mrb[16].mxu1 %vm3192_vm14, %v3682_v45  ;;  %v3597_v61 = vmul.f32 %v5498_v9, %v7872_v2  ;;  %v9711_v55 = vld [vmem:[#allocation41_spill] sm:$0xff] }
 0x681   :  { %5509 = vrcp.f32 %v3267_v35  ;;  %5203 = vmatpush3.bf16.msra.mxu1 %v3736_v1  ;;  %2869 = vperm.xlu1 %5361, %v9710_v22   ;;  %v3738_v25 = vpack.c.bf16 %v9712_v40, %v9711_v55  ;;  %v9714_v1 = vld [vmem:[#allocation43_spill] sm:$0xff] }
 0x682   :  { %5204 = vmatprep.subr.bf16.mxu1 %v3737_v14  ;;  %v3683_v21 = vpack.c.bf16 %v3598_v53, %v3597_v61  ;;  %v3739_v39 = vpack.c.bf16 %v9715_v3, %v9714_v1  ;;  %v9719_v1 = vld [vmem:[#allocation46_spill] sm:$0xff] }
 0x684   :  { %v3273_v63 = vpop.xlane.xlu0 %3272  ;;  %5192 = vmatprep.mubr.msk.bf16.mxu1 %vm3192_vm14, %v3683_v21 }
 0x685   :  { %v8160_v49 = vpop.eup %5499  ;;  %5205 = vmatpush3.bf16.msra.mxu1 %v3737_v14  ;;  %2901 = vperm.xlu1 %5361, %v9713_v51   ;;  %5511 = vrcp.f32 %v3273_v63 }
 0x686   :  { %v5502_v30 = vpop.eup %5501  ;;  %v3331_v4 = vsel %vm3192_vm14, %v8160_v49, 0.0  ;;  %5206 = vmatprep.subr.bf16.mxu1 %v3738_v25 }
 0x687   :  { %3332 = vadd.xlane.f32.xlu0 %v3331_v4  ;;  %v5504_v2 = vpop.eup %5503  ;;  %v3599_v16 = vmul.f32 %v5502_v30, %v7881_v26  ;;  %v9717_v30 = vld [vmem:[#allocation44_spill] sm:$0xff] }
 0x688   :  { %v3276_v58 = vpop.xlane.xlu0 %3275  ;;  %v3600_v5 = vmul.f32 %v5504_v2, %v7892_v48 }
 0x689   :  { %v8168_v60 = vpop.eup %5505  ;;  %5513 = vrcp.f32 %v3276_v58  ;;  %5207 = vmatpush3.bf16.msra.mxu1 %v3738_v25  ;;  %v9718_v58 = vld [vmem:[#allocation47_spill] sm:$0xff] }
 0x68a   :  { %v5508_v45 = vpop.eup %5507  ;;  %v3334_v9 = vsel %vm3192_vm14, %v8168_v60, 0.0  ;;  %5220 = vmatprep.subr.bf16.mxu1 %v3739_v39  ;;  %v3684_v35 = vpack.c.bf16 %v3600_v5, %v3599_v16  ;;  %5515 = vrcp.f32 %v8111_v28 }
 0x68b   :  { %3335 = vadd.xlane.f32.xlu0 %v3334_v9  ;;  %v5510_v6 = vpop.eup %5509  ;;  %v3602_v26 = vmul.f32 %v5508_v45, %v7798_v24  ;;  %v9720_v45 = vld [vmem:[#allocation57_spill] sm:$0xff] }
 0x68c   :  { %v3279_v56 = vpop.xlane.xlu0 %3278  ;;  %5193 = vmatmul.mubr.msk.bf16.gmra.mrb[20].mxu1 %vm3192_vm14, %v3684_v35  ;;  %v3601_v14 = vmul.f32 %v5510_v6, %v7903_v0  ;;  %v9716_v0 = vld [vmem:[#allocation45_spill] sm:$0xff] }
 0x68d   :  { %5517 = vrcp.f32 %v3279_v56  ;;  %v3740_v51 = vpack.c.bf16 %v9717_v30, %v9716_v0  ;;  %v8197_v56 = vpop.permute.xlu1 %2713  ;;  %v3745_v0 = vpack.c.bf16 %v9720_v45, %v9631_v50 }
 0x68e   :  { %v3685_v48 = vpack.c.bf16 %v3602_v26, %v3601_v14 }
 0x68f   :  { %v5512_v53 = vpop.eup %5511 }
 0x690   :  { %v3285_v61 = vpop.xlane.xlu0 %3284  ;;  %5208 = vmatprep.mubr.msk.bf16.mxu1 %vm3192_vm14, %v3685_v48  ;;  %v3603_v21 = vmul.f32 %v5512_v53, %v7910_v52  ;;  %v9724_v53 = vld [vmem:[#allocation52_spill] sm:$0xff] }
 0x691   :  { %5519 = vrcp.f32 %v3285_v61  ;;  %v9723_v61 = vld [vmem:[#allocation62_spill] sm:$0xff] }
 0x693   :  { %v5514_v22 = vpop.eup %5513 }
 0x694   :  { %v3604_v63 = vmul.f32 %v5514_v22, %v7922_v41  ;;  %v3288_v28 = vpop.xlane.xlu0 %3287  ;;  %v5516_v55 = vpop.eup %5515  ;;  %v9725_v22 = vld [vmem:[#allocation51_spill] sm:$0xff] }
 0x695   :  { %5521 = vrcp.f32 %v3288_v28  ;;  %v3606_v2 = vmul.f32 %v5516_v55, %v7811_v62  ;;  %v9722_v62 = vld [vmem:[#allocation48_spill] sm:$0xff]  ;;  %v8206_v28 = vpop.permute.xlu1 %2721 }
 0x696   :  { %v3686_v40 = vpack.c.bf16 %v3604_v63, %v3603_v21  ;;  %5523 = vrcp.f32 %v8116_v17  ;;  %v3741_v17 = vpack.c.bf16 %v9719_v1, %v9718_v58 }
 0x697   :  { %v5518_v25 = vpop.eup %5517 }
 0x698   :  { %v3291_v24 = vpop.xlane.xlu0 %3290  ;;  %5209 = vmatmul.mubr.msk.bf16.vlgmr.msra.gmra.mrb[24].mxu1 %vm3192_vm14, %v3686_v40  ;;  %v3605_v4 = vmul.f32 %v5518_v25, %v7934_v11  ;;  %v9721_v11 = vld [vmem:[#allocation49_spill] sm:$0xff]  ;;  %v3744_v40 = vpack.c.bf16 %v9540_v54, %v9545_v32 }
 0x699   :  { %5525 = vrcp.f32 %v3291_v24  ;;  %5221 = vmatpush3.bf16.msra.mxu1 %v3739_v39  ;;  %v3742_v9 = vpack.c.bf16 %v9722_v62, %v9721_v11  ;;  %v9727_v24 = vld [vmem:[#allocation74_spill] sm:$0xff] }
 0x69a   :  { %5222 = vmatprep.subr.bf16.mxu1 %v3740_v51  ;;  %v3687_v52 = vpack.c.bf16 %v3606_v2, %v3605_v4  ;;  %v8217_v2 = vpop.permute.xlu1 %2725 }
 0x69b   :  { %v5520_v3 = vpop.eup %5519 }
 0x69c   :  { %v3297_v41 = vpop.xlane.xlu0 %3296  ;;  %5212 = vmatprep.mubr.msk.bf16.mxu1 %vm3192_vm14, %v3687_v52  ;;  %v3607_v39 = vmul.f32 %v5520_v3, %v7944_v36  ;;  %v3743_v36 = vpack.c.bf16 %v9725_v22, %v9724_v53  ;;  %v9734_v22 = vld [vmem:[#allocation95_spill] sm:$0xff] }
 0x69d   :  { %5223 = vmatpush3.bf16.msra.mxu1 %v3740_v51  ;;  %5527 = vrcp.f32 %v3297_v41  ;;  %v9728_v41 = vld [vmem:[#allocation82_spill] sm:$0xff] }
 0x69e   :  { %5224 = vmatprep.subr.bf16.mxu1 %v3741_v17  ;;  %v8224_v58 = vpop.permute.xlu1 %2729 }
 0x69f   :  { %v5522_v16 = vpop.eup %5521 }
 0x6a0   :  { %v3300_v5 = vpop.xlane.xlu0 %3299  ;;  %v3608_v35 = vmul.f32 %v5522_v16, %v7954_v23  ;;  %v5524_v6 = vpop.eup %5523 }
 0x6a1   :  { %2717 = vperm.xlu0 %5362, %v9720_v45   ;;  %5529 = vrcp.f32 %v3300_v5  ;;  %5225 = vmatpush3.bf16.msra.mxu1 %v3741_v17  ;;  %v3610_v21 = vmul.f32 %v5524_v6, %v7822_v18  ;;  %v9729_v17 = vld [vmem:[#allocation92_spill] sm:$0xff] }
 0x6a2   :  { %5226 = vmatprep.subr.bf16.mxu1 %v3742_v9  ;;  %v3688_v14 = vpack.c.bf16 %v3608_v35, %v3607_v39  ;;  %5531 = vrcp.f32 %v8122_v38  ;;  %v9726_v38 = vld [vmem:[#allocation68_spill] sm:$0xff]  ;;  %v8231_v11 = vpop.permute.xlu1 %2737 }
 0x6a3   :  { %v5526_v26 = vpop.eup %5525  ;;  %v9731_v35 = vld [vmem:[#allocation104_spill] sm:$0xff] }
 0x6a4   :  { %v3303_v48 = vpop.xlane.xlu0 %3302  ;;  %5213 = vmatmul.mubr.msk.bf16.gmra.mrb[28].mxu1 %vm3192_vm14, %v3688_v14  ;;  %v3609_v23 = vmul.f32 %v5526_v26, %v7966_v33 }
 0x6a5   :  { %2733 = vperm.xlu0 %5362, %v9723_v61   ;;  %5533 = vrcp.f32 %v3303_v48  ;;  %5227 = vmatpush3.bf16.msra.mxu1 %v3742_v9  ;;  %v3747_v48 = vpack.c.bf16 %v9723_v61, %v9641_v47  ;;  %v9735_v61 = vld [vmem:[#allocation80_spill] sm:$0xff] }
 0x6a6   :  { %5228 = vmatprep.subr.bf16.mxu1 %v3743_v36  ;;  %v3689_v63 = vpack.c.bf16 %v3610_v21, %v3609_v23  ;;  %v8240_v26 = vpop.permute.xlu1 %2741 }
 0x6a7   :  { %v5528_v25 = vpop.eup %5527 }
 0x6a8   :  { %v3309_v55 = vpop.xlane.xlu0 %3308  ;;  %5216 = vmatprep.mubr.msk.bf16.mxu1 %vm3192_vm14, %v3689_v63  ;;  %v3611_v30 = vmul.f32 %v5528_v25, %v7978_v8  ;;  %v9737_v25 = vld [vmem:[#allocation107_spill] sm:$0xff] }
 0x6a9   :  { %2749 = vperm.xlu0 %5362, %v9726_v38   ;;  %5229 = vmatpush3.bf16.msra.mxu1 %v3743_v36  ;;  %5535 = vrcp.f32 %v3309_v55  ;;  %v9736_v55 = vld [vmem:[#allocation69_spill] sm:$0xff] }
 0x6aa   :  { %5230 = vmatprep.subr.bf16.mxu1 %v3744_v40  ;;  %v8251_v21 = vpop.permute.xlu1 %2745 }
 0x6ab   :  { %v5530_v33 = vpop.eup %5529 }
 0x6ac   :  { %v3312_v18 = vpop.xlane.xlu0 %3311  ;;  %v3612_v51 = vmul.f32 %v5530_v33, %v7986_v46  ;;  %v5532_v4 = vpop.eup %5531 }
 0x6ad   :  { %2765 = vperm.xlu0 %5362, %v9727_v24   ;;  %5537 = vrcp.f32 %v3312_v18  ;;  %5231 = vmatpush3.bf16.msra.mxu1 %v3744_v40  ;;  %v3614_v8 = vmul.f32 %v5532_v4, %v7835_v7  ;;  %v3749_v40 = vpack.c.bf16 %v9726_v38, %v9736_v55  ;;  %v9743_v38 = vld [vmem:[#allocation75_spill] sm:$0xff]  ;;  %v9747_v55 = vld [vmem:[#allocation9_spill] sm:$0xff] }
 0x6ae   :  { %5244 = vmatprep.subr.bf16.mxu1 %v3745_v0  ;;  %v3690_v54 = vpack.c.bf16 %v3612_v51, %v3611_v30  ;;  %5539 = vrcp.f32 %v8126_v57  ;;  %v8259_v18 = vpop.permute.xlu1 %2753  ;;  %v9740_v30 = vld [vmem:[#allocation73_spill] sm:$0xff]  ;;  %v9741_v51 = vld [vmem:[#allocation72_spill] sm:$0xff] }
 0x6af   :  { %v5534_v32 = vpop.eup %5533  ;;  %v3750_v4 = vpack.c.bf16 %v9741_v51, %v9740_v30  ;;  %v9750_v51 = vld [vmem:[#allocation31_spill] sm:$0xff] }
 0x6b0   :  { %v3315_v52 = vpop.xlane.xlu0 %3314  ;;  %5217 = vmatmul.mubr.msk.bf16.gmra.mrb[32].mxu1 %vm3192_vm14, %v3690_v54  ;;  %v3613_v50 = vmul.f32 %v5534_v32, %v7998_v59  ;;  %v9730_v59 = vld [vmem:[#allocation98_spill] sm:$0xff]  ;;  %v9742_v54 = vld [vmem:[#allocation128_spill] sm:$0xff]  ;;  %v8268_v32 = vpack.c.bf16 %v9727_v24, %v9743_v38 }
 0x6b1   :  { %2781 = vperm.xlu0 %5362, %v9728_v41   ;;  %5541 = vrcp.f32 %v3315_v52 }
 0x6b2   :  { %v3691_v46 = vpack.c.bf16 %v3614_v8, %v3613_v50  ;;  %v8270_v52 = vpop.permute.xlu1 %2757  ;;  %v8273_v50 = vld [vmem:[#allocation2 + $0x4] ss:$0 sm:$0xff]  ;;  %v9744_v8 = vld [vmem:[#allocation8_spill] sm:$0xff] }
 0x6b3   :  { %v5536_v3 = vpop.eup %5535 }
 0x6b4   :  { %v3321_v1 = vpop.xlane.xlu0 %3320  ;;  %5232 = vmatprep.mubr.msk.bf16.mxu1 %vm3192_vm14, %v3691_v46  ;;  %v3615_v16 = vmul.f32 %v5536_v3, %v8008_v13  ;;  %v3746_v13 = vpack.c.bf16 %v9639_v31, %v9635_v10  ;;  %v9733_v31 = vld [vmem:[#allocation113_spill] sm:$0xff]  ;;  %v2472_v46 = vsub.f32 %v8273_v50, %v9744_v8 }
 0x6b5   :  { %2797 = vperm.xlu0 %5362, %v9729_v17   ;;  %5543 = vrcp.f32 %v3321_v1 }
 0x6b6   :  { %v8277_v1 = vpop.permute.xlu1 %2761  ;;  %v2952_v3 = vmul.f32 %v8197_v56, %v2472_v46 }
 0x6b7   :  { %v5538_v57 = vpop.eup %5537 }
 0x6b8   :  { %v3616_v5 = vmul.f32 %v5538_v57, %v8016_v34  ;;  %v3324_v45 = vpop.xlane.xlu0 %3323  ;;  %v5540_v7 = vpop.eup %5539  ;;  %v9745_v57 = vld [vmem:[#allocation7_spill] sm:$0xff] }
 0x6b9   :  { %2813 = vperm.xlu0 %5362, %v9730_v59   ;;  %5545 = vrcp.f32 %v3324_v45  ;;  %v3618_v6 = vmul.f32 %v5540_v7, %v7848_v27  ;;  %v3748_v27 = vpack.c.bf16 %v9650_v29, %v9645_v43  ;;  %v9738_v29 = vld [vmem:[#allocation24_spill] sm:$0xff]  ;;  %v9746_v7 = vld [vmem:[#allocation133_spill] sm:$0xff] }
 0x6ba   :  { %v3692_v62 = vpack.c.bf16 %v3616_v5, %v3615_v16  ;;  %5547 = vrcp.f32 %v8131_v37  ;;  %v9732_v37 = vld [vmem:[#allocation111_spill] sm:$0xff]  ;;  %v2474_v16 = vsub.f32 %v8273_v50, %v9745_v57  ;;  %v3096_v5 = vmul.f32 1.442695, %v2952_v3  ;;  %v8283_v45 = vpop.permute.xlu1 %2769  ;;  %v9751_v3 = vld [vmem:[#allocation30_spill] sm:$0xff] }
 0x6bb   :  { %v5542_v9 = vpop.eup %5541  ;;  %v2477_v57 = vsub.f32 %v8273_v50, %v9751_v3 }
 0x6bc   :  { %v3327_v39 = vpop.xlane.xlu0 %3326  ;;  %5233 = vmatmul.mubr.msk.bf16.vlgmr.msra.gmra.mrb[36].mxu1 %vm3192_vm14, %v3692_v62  ;;  %v3617_v34 = vmul.f32 %v5542_v9, %v8025_v12  ;;  %v2954_v24 = vmul.f32 %v8206_v28, %v2474_v16  ;;  %v2475_v62 = vsub.f32 %v8273_v50, %v9746_v7 }
 0x6bd   :  { %2829 = vperm.xlu0 %5362, %v9731_v35   ;;  %5549 = vrcp.f32 %v3327_v39  ;;  %5245 = vmatpush3.bf16.msra.mxu1 %v3745_v0  ;;  %v9739_v0 = vld [vmem:[#allocation88_spill] sm:$0xff] }
 0x6be   :  { %5246 = vmatprep.subr.bf16.mxu1 %v3746_v13  ;;  %v3693_v14 = vpack.c.bf16 %v3618_v6, %v3617_v34  ;;  %5551 = vpow2.f32 %v3096_v5  ;;  %v3100_v9 = vmul.f32 1.442695, %v2954_v24  ;;  %v2955_v39 = vmul.f32 %v8217_v2, %v2475_v62  ;;  %v9752_v24 = vld [vmem:[#allocation12_spill] sm:$0xff] }
 0x6bf   :  { %v5544_v53 = vpop.eup %5543  ;;  %v2480_v7 = vsub.f32 %v8273_v50, %v9752_v24 }
 0x6c0   :  { %5236 = vmatprep.mubr.msk.bf16.mxu1 %vm3192_vm14, %v3693_v14  ;;  %v3619_v12 = vmul.f32 %v5544_v53, %v8034_v15  ;;  %5553 = vpow2.f32 %v3100_v9  ;;  %v3102_v34 = vmul.f32 1.442695, %v2955_v39 }
 0x6c1   :  { %2845 = vperm.xlu0 %5362, %v9732_v37   ;;  %5247 = vmatpush3.bf16.msra.mxu1 %v3746_v13  ;;  %v8288_v13 = vpop.permute.xlu1 %2773 }
 0x6c2   :  { %5248 = vmatprep.subr.bf16.mxu1 %v3747_v48  ;;  %5555 = vpow2.f32 %v3102_v34 }
 0x6c3   :  { %v5546_v10 = vpop.eup %5545 }
 0x6c4   :  { %v3620_v36 = vmul.f32 %v5546_v10, %v9734_v22  ;;  %v5548_v23 = vpop.eup %5547 }
 0x6c5   :  { %2877 = vperm.xlu0 %5362, %v9733_v31   ;;  %5249 = vmatpush3.bf16.msra.mxu1 %v3747_v48  ;;  %v3622_v15 = vmul.f32 %v5548_v23, %v9738_v29  ;;  %v8290_v56 = vpop.permute.xlu1 %2777 }
 0x6c6   :  { %5250 = vmatprep.subr.bf16.mxu1 %v3748_v27  ;;  %v3694_v63 = vpack.c.bf16 %v3620_v36, %v3619_v12 }
 0x6c7   :  { %v5550_v47 = vpop.eup %5549 }
 0x6c8   :  { %5237 = vmatmul.mubr.msk.bf16.gmra.mrb[40].mxu1 %vm3192_vm14, %v3694_v63  ;;  %v3621_v43 = vmul.f32 %v5550_v47, %v9737_v25  ;;  %v8292_v6 = vpop.eup %5551  ;;  %v9748_v25 = vld [vmem:[#allocation132_spill] sm:$0xff] }
 0x6c9   :  { %2861 = vperm.xlu0 %5362, %v9735_v61   ;;  %5251 = vmatpush3.bf16.msra.mxu1 %v3748_v27  ;;  %v3337_v28 = vsel %vm3192_vm14, %v8292_v6, 0.0  ;;  %v8298_v48 = vpop.permute.xlu1 %2785 }
 0x6ca   :  { %5252 = vmatprep.subr.bf16.mxu1 %v3749_v40  ;;  %v3695_v33 = vpack.c.bf16 %v3622_v15, %v3621_v43  ;;  %v8296_v14 = vpop.eup %5553  ;;  %v2473_v43 = vsub.f32 %v8273_v50, %v9748_v25  ;;  %v9749_v15 = vld [vmem:[#allocation11_spill] sm:$0xff] }
 0x6cb   :  { %v3343_v2 = vsel %vm3192_vm14, %v8296_v14, 0.0 }
 0x6cc   :  { %5240 = vmatprep.mubr.msk.bf16.mxu1 %vm3192_vm14, %v3695_v33  ;;  %v8302_v53 = vpop.eup %5555  ;;  %v2478_v33 = vsub.f32 %v8273_v50, %v9749_v15 }
 0x6cd   :  { %2865 = vperm.xlu0 %5362, %v9739_v0   ;;  %5253 = vmatpush3.bf16.msra.mxu1 %v3749_v40  ;;  %v8304_v10 = vpop.permute.xlu1 %2789  ;;  %v3346_v31 = vsel %vm3192_vm14, %v8302_v53, 0.0  ;;  %v2476_v40 = vsub.f32 %v8273_v50, %v9747_v55 }
 0x6ce   :  { %5254 = vmatprep.subr.bf16.mxu1 %v3750_v4  ;;  %v2958_v8 = vmul.f32 %v8231_v11, %v2478_v33  ;;  %v2960_v11 = vmul.f32 %v8251_v21, %v2480_v7 }
 0x6cf   :  { %v2956_v29 = vmul.f32 %v8224_v58, %v2476_v40  ;;  %v9754_v40 = vld [vmem:[#allocation13_spill] sm:$0xff] }
 0x6d0   :  { %v2482_v25 = vsub.f32 %v8273_v50, %v9754_v40  ;;  %v3112_v15 = vmul.f32 1.442695, %v2960_v11  ;;  %v9760_v40 = vld [vmem:[#allocation22_spill] sm:$0xff] }
 0x6d1   :  { %2897 = vperm.xlu0 %5362, %v9742_v54   ;;  %5255 = vmatpush3.bf16.msra.mxu1 %v3750_v4  ;;  %v8308_v27 = vpop.permute.xlu1 %2793  ;;  %v2479_v4 = vsub.f32 %v8273_v50, %v9750_v51  ;;  %v3104_v16 = vmul.f32 1.442695, %v2956_v29  ;;  %v8349_v29 = vld [vmem:[#allocation2 + $0x5] ss:$0 sm:$0xff]  ;;  %v9756_v51 = vld [vmem:[#allocation21_spill] sm:$0xff] }
 0x6d2   :  { %5268 = vmatprep.subr.bf16.mxu1 %v8268_v32  ;;  %v2962_v33 = vmul.f32 %v8259_v18, %v2482_v25  ;;  %v2488_v25 = vsub.f32 %v8349_v29, %v9760_v40 }
 0x6d3   :  { %v2959_v58 = vmul.f32 %v8240_v26, %v2479_v4  ;;  %v2484_v4 = vsub.f32 %v8349_v29, %v9756_v51 }
 0x6d4   :  { %v3116_v3 = vmul.f32 1.442695, %v2962_v33 }
 0x6d5   :  { %v8310_v12 = vpop.permute.xlu1 %2801  ;;  %v3110_v26 = vmul.f32 1.442695, %v2959_v58 }
 0x6d9   :  { %v8312_v22 = vpop.permute.xlu1 %2805 }
 0x6dd   :  { %v8314_v36 = vpop.permute.xlu1 %2809 }
 0x6e1   :  { %v8316_v63 = vpop.permute.xlu1 %2817 }
 0x6e5   :  { %v8318_v61 = vpop.permute.xlu1 %2821 }
 0x6e9   :  { %v8329_v54 = vpop.permute.xlu1 %2825 }
 0x6f0   :  { %3338 = vadd.xlane.f32.xlu0 %v3337_v28  ;;  %v3108_v28 = vmul.f32 1.442695, %v2958_v8  ;;  %v9757_v8 = vld [vmem:[#allocation16_spill] sm:$0xff] }
 0x6f4   :  { %3344 = vadd.xlane.f32.xlu0 %v3343_v2 }
 0x6f8   :  { %3347 = vadd.xlane.f32.xlu0 %v3346_v31  ;;  %v9753_v31 = vld [vmem:[#allocation3_spill] sm:$0xff] }
 0x714   :  { %v3333_v23 = vpop.xlane.xlu0 %3332 }
 0x715   :  { %5557 = vrcp.f32 %v3333_v23  ;;  %v2481_v23 = vsub.f32 %v8273_v50, %v9753_v31 }
 0x718   :  { %v3336_v47 = vpop.xlane.xlu0 %3335 }
 0x719   :  { %5559 = vrcp.f32 %v3336_v47  ;;  %v8342_v47 = vpop.permute.xlu1 %2833 }
 0x71f   :  { %v5558_v30 = vpop.eup %5557 }
 0x720   :  { %v2718_v0 = vpop.permute.xlu0 %2717  ;;  %v3623_v9 = vmul.f32 %v5558_v30, %v8160_v49 }
 0x721   :  { %v2953_v38 = vmul.f32 %v2718_v0, %v2473_v43 }
 0x723   :  { %v5560_v46 = vpop.eup %5559  ;;  %v3098_v5 = vmul.f32 1.442695, %v2953_v38 }
 0x724   :  { %v2734_v62 = vpop.permute.xlu0 %2733  ;;  %v3624_v39 = vmul.f32 %v5560_v46, %v8168_v60  ;;  %v9755_v60 = vld [vmem:[#allocation14_spill] sm:$0xff]  ;;  %v2485_v46 = vsub.f32 %v8349_v29, %v9757_v8 }
 0x725   :  { %5561 = vpow2.f32 %v3098_v5  ;;  %v2957_v34 = vmul.f32 %v2734_v62, %v2477_v57  ;;  %v2483_v43 = vsub.f32 %v8273_v50, %v9755_v60  ;;  %v8357_v50 = vpop.permute.xlu1 %2837  ;;  %v2964_v57 = vmul.f32 %v8277_v1, %v2484_v4 }
 0x726   :  { %v3696_v2 = vpack.c.bf16 %v3624_v39, %v3623_v9  ;;  %5563 = vpow2.f32 %v3104_v16  ;;  %v9759_v9 = vld [vmem:[#allocation19_spill] sm:$0xff] }
 0x727   :  { %v3106_v55 = vmul.f32 1.442695, %v2957_v34  ;;  %v2963_v0 = vmul.f32 %v8270_v52, %v2483_v43  ;;  %v9758_v52 = vld [vmem:[#allocation27_spill] sm:$0xff]  ;;  %v2487_v39 = vsub.f32 %v8349_v29, %v9759_v9  ;;  %v3120_v34 = vmul.f32 1.442695, %v2964_v57 }
 0x728   :  { %5241 = vmatmul.mubr.msk.bf16.gmra.mrb[44].mxu1 %vm3192_vm14, %v3696_v2  ;;  %v2750_v49 = vpop.permute.xlu0 %2749  ;;  %v2486_v5 = vsub.f32 %v8349_v29, %v9758_v52 }
 0x729   :  { %5565 = vpow2.f32 %v3106_v55  ;;  %v2961_v21 = vmul.f32 %v2750_v49, %v2481_v23  ;;  %v3118_v18 = vmul.f32 1.442695, %v2963_v0  ;;  %v2967_v31 = vmul.f32 %v8288_v13, %v2487_v39  ;;  %v8382_v23 = vpop.permute.xlu1 %2841  ;;  %v9764_v39 = vld [vmem:[#allocation54_spill] sm:$0xff] }
 0x72a   :  { %5567 = vpow2.f32 %v3108_v28  ;;  %v2966_v28 = vmul.f32 %v8283_v45, %v2486_v5  ;;  %v2968_v0 = vmul.f32 %v8290_v56, %v2488_v25 }
 0x72b   :  { %5569 = vpow2.f32 %v3110_v26  ;;  %v3114_v30 = vmul.f32 1.442695, %v2961_v21  ;;  %v9761_v21 = vld [vmem:[#allocation25_spill] sm:$0xff] }
 0x72c   :  { %v2766_v38 = vpop.permute.xlu0 %2765  ;;  %5571 = vpow2.f32 %v3112_v15  ;;  %v2489_v15 = vsub.f32 %v8349_v29, %v9761_v21  ;;  %v3124_v33 = vmul.f32 1.442695, %v2966_v28  ;;  %v3128_v52 = vmul.f32 1.442695, %v2968_v0 }
 0x72d   :  { %5573 = vpow2.f32 %v3114_v30  ;;  %v2965_v58 = vmul.f32 %v2766_v38, %v2485_v46  ;;  %v3126_v30 = vmul.f32 1.442695, %v2967_v31  ;;  %v9762_v38 = vld [vmem:[#allocation28_spill] sm:$0xff]  ;;  %v8417_v56 = vpop.permute.xlu1 %2849 }
 0x72e   :  { %5575 = vpow2.f32 %v3116_v3  ;;  %v2490_v8 = vsub.f32 %v8349_v29, %v9762_v38 }
 0x72f   :  { %v8360_v16 = vpop.eup %5561  ;;  %v5166_v24 = vpop.f32.mrb[4].mxu1  ;;  %5577 = vpow2.f32 %v3118_v18  ;;  %v3122_v26 = vmul.f32 1.442695, %v2965_v58  ;;  %v9763_v18 = vld [vmem:[#allocation53_spill] sm:$0xff] }
 0x730   :  { %v3340_v7 = vsel %vm3192_vm14, %v8360_v16, 0.0  ;;  %v8366_v62 = vpop.eup %5563  ;;  %4567 = vst.msk [vmem:[%s9125_s3 + $0x30] sm:$0xff] %vm120_vm0, %v5166_v24  ;;  %v3837_v1 = vpop.f32.mrb[5].mxu1  ;;  %5579 = vpow2.f32 %v3120_v34  ;;  %v2491_v58 = vsub.f32 %v8349_v29, %v9763_v18  ;;  %v2970_v5 = vmul.f32 %v8298_v48, %v2490_v8  ;;  %v9765_v48 = vld [vmem:[#allocation17_spill] sm:$0xff]  ;;  %v9767_v8 = vld [vmem:[#allocation26_spill] sm:$0xff] }
 0x731   :  { %3341 = vadd.xlane.f32.xlu1 %v3340_v7  ;;  %4565 = vst.msk [vmem:[%s9125_s3 + $0x20] sm:$0xff] %vm120_vm0, %v3837_v1  ;;  %v5167_v11 = vpop.f32.mrb[6].mxu1  ;;  %v2782_v49 = vpop.permute.xlu0 %2781  ;;  %v3349_v60 = vsel %vm3192_vm14, %v8366_v62, 0.0  ;;  %5581 = vpow2.f32 %v3122_v26  ;;  %v2492_v1 = vsub.f32 %v8349_v29, %v9764_v39 }
 0x732   :  { %4568 = vst.msk [vmem:[%s9125_s3 + $0x38] sm:$0xff] %vm120_vm0, %v5167_v11  ;;  %v3840_v45 = vpop.f32.mrb[7].mxu1  ;;  %v2969_v51 = vmul.f32 %v2782_v49, %v2489_v15  ;;  %5583 = vpow2.f32 %v3124_v33  ;;  %v2971_v24 = vmul.f32 %v8304_v10, %v2491_v58  ;;  %v3132_v40 = vmul.f32 1.442695, %v2970_v5 }
 0x733   :  { %v8379_v2 = vpop.eup %5565  ;;  %4566 = vst.msk [vmem:[%s9125_s3 + $0x28] sm:$0xff] %vm120_vm0, %v3840_v45  ;;  %5585 = vpow2.f32 %v3126_v30  ;;  %v2493_v45 = vsub.f32 %v8349_v29, %v9765_v48  ;;  %v2972_v25 = vmul.f32 %v8308_v27, %v2492_v1  ;;  %v9766_v27 = vld [vmem:[#allocation20_spill] sm:$0xff] }
 0x734   :  { %v8388_v55 = vpop.eup %5567  ;;  %v3352_v13 = vsel %vm3192_vm14, %v8379_v2, 0.0  ;;  %v3130_v7 = vmul.f32 1.442695, %v2969_v51  ;;  %5587 = vpow2.f32 %v3128_v52  ;;  %v2494_v0 = vsub.f32 %v8349_v29, %v9766_v27 }
 0x735   :  { %v8400_v43 = vpop.eup %5569  ;;  %3353 = vadd.xlane.f32.xlu0 %v3352_v13  ;;  %3350 = vadd.xlane.f32.xlu1 %v3349_v60  ;;  %v3355_v46 = vsel %vm3192_vm14, %v8388_v55, 0.0  ;;  %v2798_v34 = vpop.permute.xlu0 %2797  ;;  %v3134_v13 = vmul.f32 1.442695, %v2971_v24  ;;  %v3136_v18 = vmul.f32 1.442695, %v2972_v25  ;;  %v9770_v25 = vld [vmem:[#allocation100_spill] sm:$0xff] }
 0x736   :  { %v8405_v4 = vpop.eup %5571  ;;  %v3358_v3 = vsel %vm3192_vm14, %v8400_v43, 0.0  ;;  %v8442_v60 = vpop.permute.xlu1 %2853  ;;  %5589 = vpow2.f32 %v3130_v7  ;;  %v2973_v21 = vmul.f32 %v2798_v34, %v2493_v45  ;;  %v2974_v58 = vmul.f32 %v8310_v12, %v2494_v0  ;;  %v9768_v7 = vld [vmem:[#allocation124_spill] sm:$0xff]  ;;  %v9771_v0 = vld [vmem:[#allocation115_spill] sm:$0xff] }
 0x737   :  { %v8413_v57 = vpop.eup %5573  ;;  %v3361_v31 = vsel %vm3192_vm14, %v8405_v4, 0.0  ;;  %5591 = vpow2.f32 %v3132_v40 }
 0x738   :  { %v8421_v9 = vpop.eup %5575  ;;  %v3364_v11 = vsel %vm3192_vm14, %v8413_v57, 0.0  ;;  %5593 = vpow2.f32 %v3134_v13  ;;  %v3138_v5 = vmul.f32 1.442695, %v2973_v21 }
 0x739   :  { %3356 = vadd.xlane.f32.xlu1 %v3355_v46  ;;  %3359 = vadd.xlane.f32.xlu0 %v3358_v3  ;;  %v8429_v26 = vpop.eup %5577  ;;  %v3367_v30 = vsel %vm3192_vm14, %v8421_v9, 0.0  ;;  %v2495_v46 = vsub.f32 %v8349_v29, %v9767_v8  ;;  %v8464_v3 = vld [vmem:[#allocation2 + $0x6] ss:$0 sm:$0xff]  ;;  %v2814_v1 = vpop.permute.xlu0 %2813  ;;  %5595 = vpow2.f32 %v3136_v18 }
 0x73a   :  { %v8448_v33 = vpop.eup %5579  ;;  %v3370_v51 = vsel %vm3192_vm14, %v8429_v26, 0.0  ;;  %v2496_v39 = vsub.f32 %v8464_v3, %v9768_v7  ;;  %5597 = vpow2.f32 %v3138_v5 }
 0x73b   :  { %v5170_v28 = vpop.f32.mrb[8].mxu1  ;;  %v8460_v38 = vpop.eup %5581  ;;  %v2975_v52 = vmul.f32 %v8312_v22, %v2495_v46  ;;  %v3373_v34 = vsel %vm3192_vm14, %v8448_v33, 0.0  ;;  %v3140_v22 = vmul.f32 1.442695, %v2974_v58 }
 0x73c   :  { %4571 = vst.msk [vmem:[%s9125_s3 + $0x50] sm:$0xff] %vm120_vm0, %v5170_v28  ;;  %v3853_v10 = vpop.f32.mrb[9].mxu1  ;;  %v8468_v24 = vpop.eup %5583  ;;  %v3376_v29 = vsel %vm3192_vm14, %v8460_v38, 0.0  ;;  %v2976_v48 = vmul.f32 %v8314_v36, %v2496_v39  ;;  %v2499_v36 = vsub.f32 %v8464_v3, %v9771_v0 }
 0x73d   :  { %3365 = vadd.xlane.f32.xlu0 %v3364_v11  ;;  %3362 = vadd.xlane.f32.xlu1 %v3361_v31  ;;  %4569 = vst.msk [vmem:[%s9125_s3 + $0x40] sm:$0xff] %vm120_vm0, %v3853_v10  ;;  %v5171_v49 = vpop.f32.mrb[10].mxu1  ;;  %v8476_v28 = vpop.eup %5585  ;;  %v9769_v11 = vld [vmem:[#allocation101_spill] sm:$0xff]  ;;  %v3142_v45 = vmul.f32 1.442695, %v2975_v52  ;;  %v3379_v21 = vsel %vm3192_vm14, %v8468_v24, 0.0  ;;  %5599 = vpow2.f32 %v3140_v22 }
 0x73e   :  { %4572 = vst.msk [vmem:[%s9125_s3 + $0x58] sm:$0xff] %vm120_vm0, %v5171_v49  ;;  %v3856_v15 = vpop.f32.mrb[11].mxu1  ;;  %v2497_v12 = vsub.f32 %v8464_v3, %v9769_v11  ;;  %v8480_v31 = vpop.permute.xlu1 %2873  ;;  %v2498_v49 = vsub.f32 %v8464_v3, %v9770_v25  ;;  %v2979_v18 = vmul.f32 %v8318_v61, %v2499_v36  ;;  %v9773_v11 = vld [vmem:[#allocation125_spill] sm:$0xff]  ;;  %v9775_v36 = vld [vmem:[#allocation58_spill] sm:$0xff] }
 0x73f   :  { %4570 = vst.msk [vmem:[%s9125_s3 + $0x48] sm:$0xff] %vm120_vm0, %v3856_v15  ;;  %v8483_v40 = vpop.eup %5587  ;;  %v3382_v15 = vsel %vm3192_vm14, %v8476_v28, 0.0  ;;  %5601 = vpow2.f32 %v3142_v45 }
 0x740   :  { %v2977_v10 = vmul.f32 %v2814_v1, %v2497_v12  ;;  %v8491_v27 = vpop.eup %5589  ;;  %v2978_v8 = vmul.f32 %v8316_v63, %v2498_v49  ;;  %v9772_v63 = vld [vmem:[#allocation114_spill] sm:$0xff]  ;;  %v2830_v1 = vpop.permute.xlu0 %2829  ;;  %v2501_v12 = vsub.f32 %v8464_v3, %v9773_v11  ;;  %v3150_v45 = vmul.f32 1.442695, %v2979_v18  ;;  %v9774_v49 = vld [vmem:[#allocation5_spill] sm:$0xff] }
 0x741   :  { %3368 = vadd.xlane.f32.xlu1 %v3367_v30  ;;  %3371 = vadd.xlane.f32.xlu0 %v3370_v51  ;;  %v3144_v51 = vmul.f32 1.442695, %v2976_v48  ;;  %v8511_v7 = vpop.eup %5591  ;;  %v2500_v39 = vsub.f32 %v8464_v3, %v9772_v63  ;;  %v3388_v61 = vsel %vm3192_vm14, %v8491_v27, 0.0 }
 0x742   :  { %v8505_v58 = vpop.permute.xlu1 %2881  ;;  %v3146_v52 = vmul.f32 1.442695, %v2977_v10  ;;  %v3148_v22 = vmul.f32 1.442695, %v2978_v8  ;;  %v2981_v10 = vmul.f32 %v2830_v1, %v2501_v12 }
 0x743   :  { %5603 = vpow2.f32 %v3144_v51  ;;  %v2980_v48 = vmul.f32 %v8329_v54, %v2500_v39 }
 0x744   :  { %5605 = vpow2.f32 %v3146_v52  ;;  %v3154_v18 = vmul.f32 1.442695, %v2981_v10  ;;  %v2846_v39 = vpop.permute.xlu0 %2845 }
 0x745   :  { %3377 = vadd.xlane.f32.xlu0 %v3376_v29  ;;  %3374 = vadd.xlane.f32.xlu1 %v3373_v34  ;;  %v3385_v29 = vsel %vm3192_vm14, %v8483_v40, 0.0  ;;  %v8523_v34 = vpop.eup %5593  ;;  %5607 = vpow2.f32 %v3148_v22  ;;  %v3152_v51 = vmul.f32 1.442695, %v2980_v48 }
 0x746   :  { %v8528_v25 = vpop.eup %5595  ;;  %v8540_v54 = vpop.permute.xlu1 %2885  ;;  %5609 = vpow2.f32 %v3150_v45 }
 0x747   :  { %v5186_v13 = vpop.f32.mrb[12].mxu1  ;;  %v8536_v0 = vpop.eup %5597  ;;  %5611 = vpow2.f32 %v3152_v51 }
 0x748   :  { %4575 = vst.msk [vmem:[%s9125_s3 + $0x70] sm:$0xff] %vm120_vm0, %v5186_v13  ;;  %v3920_v30 = vpop.f32.mrb[13].mxu1  ;;  %v2502_v13 = vsub.f32 %v8464_v3, %v9774_v49  ;;  %v8544_v52 = vpop.eup %5599  ;;  %5613 = vpow2.f32 %v3154_v18 }
 0x749   :  { %3380 = vadd.xlane.f32.xlu1 %v3379_v21  ;;  %3383 = vadd.xlane.f32.xlu0 %v3382_v15  ;;  %4573 = vst.msk [vmem:[%s9125_s3 + $0x60] sm:$0xff] %vm120_vm0, %v3920_v30  ;;  %v5187_v46 = vpop.f32.mrb[14].mxu1  ;;  %v3391_v21 = vsel %vm3192_vm14, %v8511_v7, 0.0  ;;  %v3394_v15 = vsel %vm3192_vm14, %v8523_v34, 0.0  ;;  %v2503_v30 = vsub.f32 %v8464_v3, %v9775_v36  ;;  %v8552_v11 = vpop.eup %5601 }
 0x74a   :  { %4576 = vst.msk [vmem:[%s9125_s3 + $0x78] sm:$0xff] %vm120_vm0, %v5187_v46  ;;  %v3923_v5 = vpop.f32.mrb[15].mxu1  ;;  %v2982_v8 = vmul.f32 %v8342_v47, %v2502_v13  ;;  %v9777_v47 = vld [vmem:[#allocation61_spill] sm:$0xff]  ;;  %v8565_v49 = vpop.permute.xlu1 %2857  ;;  %v3406_v51 = vsel %vm3192_vm14, %v8552_v11, 0.0 }
 0x74b   :  { %4574 = vst.msk [vmem:[%s9125_s3 + $0x68] sm:$0xff] %vm120_vm0, %v3923_v5  ;;  %v2983_v46 = vmul.f32 %v8357_v50, %v2503_v30  ;;  %v9776_v5 = vld [vmem:[#allocation130_spill] sm:$0xff]  ;;  %v2505_v12 = vsub.f32 %v8464_v3, %v9777_v47  ;;  %v3403_v30 = vsel %vm3192_vm14, %v8544_v52, 0.0  ;;  %v9780_v47 = vld [vmem:[#allocation64_spill] sm:$0xff] }
 0x74c   :  { %v2504_v63 = vsub.f32 %v8464_v3, %v9776_v5  ;;  %v3156_v22 = vmul.f32 1.442695, %v2982_v8  ;;  %v8587_v5 = vld [vmem:[#allocation2 + $0x7] ss:$0 sm:$0xff] }
 0x74d   :  { %3389 = vadd.xlane.f32.xlu0 %v3388_v61  ;;  %3386 = vadd.xlane.f32.xlu1 %v3385_v29  ;;  %v3400_v61 = vsel %vm3192_vm14, %v8536_v0, 0.0  ;;  %v3397_v29 = vsel %vm3192_vm14, %v8528_v25, 0.0  ;;  %v3158_v10 = vmul.f32 1.442695, %v2983_v46  ;;  %v2985_v13 = vmul.f32 %v2846_v39, %v2505_v12  ;;  %v9779_v46 = vld [vmem:[#allocation60_spill] sm:$0xff] }
 0x74e   :  { %v2984_v48 = vmul.f32 %v8382_v23, %v2504_v63  ;;  %v9778_v23 = vld [vmem:[#allocation131_spill] sm:$0xff]  ;;  %v2507_v18 = vsub.f32 %v8464_v3, %v9779_v46  ;;  %5615 = vpow2.f32 %v3156_v22  ;;  %v2512_v12 = vsub.f32 %v8587_v5, %v9780_v47 }
 0x74f   :  { %v2506_v36 = vsub.f32 %v8464_v3, %v9778_v23  ;;  %5617 = vpow2.f32 %v3158_v10  ;;  %v2890_v10 = vpop.permute.xlu1 %2889 }
 0x750   :  { %v3160_v63 = vmul.f32 1.442695, %v2984_v48  ;;  %v9781_v48 = vld [vmem:[#allocation70_spill] sm:$0xff] }
 0x751   :  { %3392 = vadd.xlane.f32.xlu1 %v3391_v21  ;;  %3395 = vadd.xlane.f32.xlu0 %v3394_v15  ;;  %v8571_v15 = vpop.eup %5603  ;;  %v2986_v39 = vmul.f32 %v8417_v56, %v2506_v36  ;;  %v2513_v56 = vsub.f32 %v8587_v5, %v9781_v48 }
 0x752   :  { %v8583_v8 = vpop.eup %5605  ;;  %5619 = vpow2.f32 %v3160_v63  ;;  %v9784_v63 = vld [vmem:[#allocation77_spill] sm:$0xff] }
 0x753   :  { %v5190_v1 = vpop.f32.mrb[16].mxu1  ;;  %v3412_v3 = vsel %vm3192_vm14, %v8583_v8, 0.0 }
 0x754   :  { %4579 = vst.msk [vmem:[%s9125_s3 + $0x90] sm:$0xff] %vm120_vm0, %v5190_v1  ;;  %v3936_v50 = vpop.f32.mrb[17].mxu1  ;;  %v2987_v1 = vmul.f32 %v8442_v60, %v2507_v18  ;;  %v3164_v60 = vmul.f32 1.442695, %v2986_v39 }
 0x755   :  { %3401 = vadd.xlane.f32.xlu0 %v3400_v61  ;;  %3398 = vadd.xlane.f32.xlu1 %v3397_v29  ;;  %4577 = vst.msk [vmem:[%s9125_s3 + $0x80] sm:$0xff] %vm120_vm0, %v3936_v50  ;;  %v5191_v45 = vpop.f32.mrb[18].mxu1  ;;  %v3162_v61 = vmul.f32 1.442695, %v2985_v13  ;;  %v8591_v29 = vpop.eup %5607  ;;  %v2992_v13 = vmul.f32 %v8480_v31, %v2512_v12  ;;  %v2515_v31 = vsub.f32 %v8587_v5, %v9784_v63 }
 0x756   :  { %4580 = vst.msk [vmem:[%s9125_s3 + $0x98] sm:$0xff] %vm120_vm0, %v5191_v45  ;;  %v3939_v21 = vpop.f32.mrb[19].mxu1  ;;  %v2878_v50 = vpop.permute.xlu0 %2877  ;;  %v3409_v45 = vsel %vm3192_vm14, %v8571_v15, 0.0  ;;  %v3415_v18 = vsel %vm3192_vm14, %v8591_v29, 0.0 }
 0x757   :  { %4578 = vst.msk [vmem:[%s9125_s3 + $0x88] sm:$0xff] %vm120_vm0, %v3939_v21  ;;  %v8599_v22 = vpop.eup %5609  ;;  %v3166_v21 = vmul.f32 1.442695, %v2987_v1  ;;  %5621 = vpow2.f32 %v3162_v61  ;;  %v2993_v23 = vmul.f32 %v2878_v50, %v2513_v56  ;;  %v3176_v1 = vmul.f32 1.442695, %v2992_v13 }
 0x758   :  { %v8604_v36 = vpop.eup %5611  ;;  %v3418_v47 = vsel %vm3192_vm14, %v8599_v22, 0.0  ;;  %5623 = vpow2.f32 %v3164_v60  ;;  %v2995_v50 = vmul.f32 %v8540_v54, %v2515_v31 }
 0x759   :  { %3404 = vadd.xlane.f32.xlu1 %v3403_v30  ;;  %3407 = vadd.xlane.f32.xlu0 %v3406_v51  ;;  %9782 = vst [vmem:[#allocation63_spill] sm:$0xff] %v8604_v36  ;;  %v9783_v30 = vld [vmem:[#allocation76_spill] sm:$0xff]  ;;  %5625 = vpow2.f32 %v3166_v21  ;;  %v3178_v48 = vmul.f32 1.442695, %v2993_v23  ;;  %v3421_v21 = vsel %vm3192_vm14, %v8604_v36, 0.0 }
 0x75a   :  { %v2514_v51 = vsub.f32 %v8587_v5, %v9783_v30  ;;  %v2862_v30 = vpop.permute.xlu0 %2861  ;;  %5627 = vpow2.f32 %v3176_v1  ;;  %v3182_v63 = vmul.f32 1.442695, %v2995_v50  ;;  %v9790_v1 = vld [vmem:[#allocation87_spill] sm:$0xff] }
 0x75b   :  { %5629 = vpow2.f32 %v3178_v48 }
 0x75c   :  { %v2994_v61 = vmul.f32 %v8505_v58, %v2514_v51  ;;  %v9786_v58 = vld [vmem:[#allocation23_spill] sm:$0xff]  ;;  %v9788_v51 = vld [vmem:[#allocation29_spill] sm:$0xff] }
 0x75d   :  { %3413 = vadd.xlane.f32.xlu0 %v3412_v3  ;;  %3410 = vadd.xlane.f32.xlu1 %v3409_v45  ;;  %v8612_v3 = vpop.eup %5613  ;;  %v2894_v45 = vpop.permute.xlu1 %2893  ;;  %v2508_v13 = vsub.f32 %v8587_v5, %v9786_v58 }
 0x75e   :  { %v8630_v60 = vpop.eup %5615  ;;  %v3424_v54 = vsel %vm3192_vm14, %v8612_v3, 0.0 }
 0x75f   :  { %v5194_v46 = vpop.f32.mrb[20].mxu1  ;;  %9785 = vst [vmem:[#allocation4_spill] sm:$0xff] %v8630_v60  ;;  %v8642_v23 = vpop.eup %5617  ;;  %v3427_v58 = vsel %vm3192_vm14, %v8630_v60, 0.0 }
 0x760   :  { %4583 = vst.msk [vmem:[%s9125_s3 + $0xb0] sm:$0xff] %vm120_vm0, %v5194_v46  ;;  %v3952_v39 = vpop.f32.mrb[21].mxu1  ;;  %9787 = vst [vmem:[#allocation55_spill] sm:$0xff] %v8642_v23  ;;  %v2509_v46 = vsub.f32 %v8587_v5, %v9788_v51  ;;  %v3430_v51 = vsel %vm3192_vm14, %v8642_v23, 0.0 }
 0x761   :  { %3416 = vadd.xlane.f32.xlu1 %v3415_v18  ;;  %3419 = vadd.xlane.f32.xlu0 %v3418_v47  ;;  %4581 = vst.msk [vmem:[%s9125_s3 + $0xa0] sm:$0xff] %vm120_vm0, %v3952_v39  ;;  %v5195_v12 = vpop.f32.mrb[22].mxu1  ;;  %v3180_v18 = vmul.f32 1.442695, %v2994_v61  ;;  %v2988_v47 = vmul.f32 %v8565_v49, %v2508_v13  ;;  %v8647_v39 = vpop.eup %5619  ;;  %v2517_v61 = vsub.f32 %v8587_v5, %v9790_v1 }
 0x762   :  { %4584 = vst.msk [vmem:[%s9125_s3 + $0xb8] sm:$0xff] %vm120_vm0, %v5195_v12  ;;  %v3955_v56 = vpop.f32.mrb[23].mxu1  ;;  %v2989_v31 = vmul.f32 %v2862_v30, %v2509_v46  ;;  %v9789_v12 = vld [vmem:[#allocation94_spill] sm:$0xff]  ;;  %v2870_v49 = vpop.permute.xlu1 %2869 }
 0x763   :  { %4582 = vst.msk [vmem:[%s9125_s3 + $0xa8] sm:$0xff] %vm120_vm0, %v3955_v56  ;;  %v2516_v56 = vsub.f32 %v8587_v5, %v9789_v12  ;;  %5631 = vpow2.f32 %v3180_v18  ;;  %v3168_v50 = vmul.f32 1.442695, %v2988_v47  ;;  %v2866_v13 = vpop.permute.xlu0 %2865  ;;  %v2997_v30 = vmul.f32 %v2894_v45, %v2517_v61  ;;  %v9792_v12 = vld [vmem:[#allocation71_spill] sm:$0xff]  ;;  %v9793_v18 = vld [vmem:[#allocation65_spill] sm:$0xff] }
 0x764   :  { %5633 = vpow2.f32 %v3182_v63  ;;  %v2511_v60 = vsub.f32 %v8587_v5, %v9792_v12 }
 0x765   :  { %3425 = vadd.xlane.f32.xlu0 %v3424_v54  ;;  %3422 = vadd.xlane.f32.xlu1 %v3421_v21  ;;  %v8655_v54 = vpop.eup %5621  ;;  %v2996_v48 = vmul.f32 %v2890_v10, %v2516_v56  ;;  %v3170_v21 = vmul.f32 1.442695, %v2989_v31  ;;  %v2510_v10 = vsub.f32 %v8587_v5, %v9793_v18  ;;  %5635 = vpow2.f32 %v3168_v50  ;;  %v9794_v50 = vld [vmem:[#allocation86_spill] sm:$0xff] }
 0x766   :  { %v8659_v46 = vpop.eup %5623  ;;  %v3436_v36 = vsel %vm3192_vm14, %v8655_v54, 0.0  ;;  %v2991_v63 = vmul.f32 %v2870_v49, %v2511_v60  ;;  %v3186_v56 = vmul.f32 1.442695, %v2997_v30  ;;  %v2902_v1 = vpop.permute.xlu1 %2901  ;;  %v2519_v60 = vsub.f32 %v8587_v5, %v9794_v50 }
 0x767   :  { %9791 = vst [vmem:[#allocation67_spill] sm:$0xff] %v8659_v46  ;;  %v3184_v47 = vmul.f32 1.442695, %v2996_v48  ;;  %5637 = vpow2.f32 %v3170_v21  ;;  %v2990_v61 = vmul.f32 %v2866_v13, %v2510_v10  ;;  %v2898_v49 = vpop.permute.xlu0 %2897  ;;  %v3439_v48 = vsel %vm3192_vm14, %v8659_v46, 0.0  ;;  %v9795_v21 = vld [vmem:[#allocation106_spill] sm:$0xff] }
 0x768   :  { %v2518_v12 = vsub.f32 %v8587_v5, %v9795_v21  ;;  %v2999_v18 = vmul.f32 %v2902_v1, %v2519_v60 }
 0x769   :  { %3428 = vadd.xlane.f32.xlu1 %v3427_v58  ;;  %3431 = vadd.xlane.f32.xlu0 %v3430_v51  ;;  %v3433_v58 = vsel %vm3192_vm14, %v8647_v39, 0.0  ;;  %v8667_v51 = vpop.eup %5625  ;;  %5639 = vpow2.f32 %v3184_v47  ;;  %v3172_v10 = vmul.f32 1.442695, %v2990_v61 }
 0x76a   :  { %v3442_v13 = vsel %vm3192_vm14, %v8667_v51, 0.0  ;;  %5641 = vpow2.f32 %v3186_v56  ;;  %v3190_v5 = vmul.f32 1.442695, %v2999_v18 }
 0x76b   :  { %v5210_v23 = vpop.f32.mrb[24].mxu1 }
 0x76c   :  { %4587 = vst.msk [vmem:[%s9125_s3 + $0xd0] sm:$0xff] %vm120_vm0, %v5210_v23  ;;  %v4019_v45 = vpop.f32.mrb[25].mxu1  ;;  %v8683_v23 = vpop.eup %5627 }
 0x76d   :  { %3437 = vadd.xlane.f32.xlu0 %v3436_v36  ;;  %3434 = vadd.xlane.f32.xlu1 %v3433_v58  ;;  %4585 = vst.msk [vmem:[%s9125_s3 + $0xc0] sm:$0xff] %vm120_vm0, %v4019_v45  ;;  %v5211_v31 = vpop.f32.mrb[26].mxu1  ;;  %v8695_v30 = vpop.eup %5629  ;;  %v3174_v58 = vmul.f32 1.442695, %v2991_v63  ;;  %v2998_v45 = vmul.f32 %v2898_v49, %v2518_v12  ;;  %v3457_v50 = vsel %vm3192_vm14, %v8683_v23, 0.0 }
 0x76e   :  { %4588 = vst.msk [vmem:[%s9125_s3 + $0xd8] sm:$0xff] %vm120_vm0, %v5211_v31  ;;  %v4022_v36 = vpop.f32.mrb[27].mxu1  ;;  %v8699_v31 = vpop.eup %5631 }
 0x76f   :  { %4586 = vst.msk [vmem:[%s9125_s3 + $0xc8] sm:$0xff] %vm120_vm0, %v4022_v36  ;;  %v3460_v36 = vsel %vm3192_vm14, %v8695_v30, 0.0  ;;  %v8705_v46 = vpop.eup %5633  ;;  %5643 = vpow2.f32 %v3174_v58  ;;  %v3188_v47 = vmul.f32 1.442695, %v2998_v45  ;;  %v3463_v1 = vsel %vm3192_vm14, %v8699_v31, 0.0 }
 0x770   :  { %5645 = vpow2.f32 %v3172_v10  ;;  %v8707_v63 = vpop.eup %5635  ;;  %v3466_v61 = vsel %vm3192_vm14, %v8705_v46, 0.0 }
 0x771   :  { %3440 = vadd.xlane.f32.xlu1 %v3439_v48  ;;  %3443 = vadd.xlane.f32.xlu0 %v3442_v13  ;;  %v8713_v60 = vpop.eup %5637  ;;  %5647 = vpow2.f32 %v3190_v5  ;;  %v3445_v58 = vsel %vm3192_vm14, %v8707_v63, 0.0 }
 0x772   :  { %5649 = vpow2.f32 %v3188_v47  ;;  %v3448_v12 = vsel %vm3192_vm14, %v8713_v60, 0.0 }
 0x773   :  { %v8727_v21 = vpop.eup %5639 }
 0x774   :  { %9796 = vst [vmem:[#allocation50_spill] sm:$0xff] %v8727_v21  ;;  %v8737_v18 = vpop.eup %5641  ;;  %v3469_v45 = vsel %vm3192_vm14, %v8727_v21, 0.0 }
 0x775   :  { %3461 = vadd.xlane.f32.xlu0 %v3460_v36  ;;  %3458 = vadd.xlane.f32.xlu1 %v3457_v50  ;;  %9797 = vst [vmem:[#allocation6_spill] sm:$0xff] %v8737_v18  ;;  %v3472_v36 = vsel %vm3192_vm14, %v8737_v18, 0.0 }
 0x777   :  { %v5214_v56 = vpop.f32.mrb[28].mxu1 }
 0x778   :  { %4591 = vst.msk [vmem:[%s9125_s3 + $0xf0] sm:$0xff] %vm120_vm0, %v5214_v56  ;;  %v4035_v49 = vpop.f32.mrb[29].mxu1 }
 0x779   :  { %3464 = vadd.xlane.f32.xlu1 %v3463_v1  ;;  %3467 = vadd.xlane.f32.xlu0 %v3466_v61  ;;  %4589 = vst.msk [vmem:[%s9125_s3 + $0xe0] sm:$0xff] %vm120_vm0, %v4035_v49  ;;  %v5215_v48 = vpop.f32.mrb[30].mxu1  ;;  %v8739_v10 = vpop.eup %5643 }
 0x77a   :  { %4592 = vst.msk [vmem:[%s9125_s3 + $0xf8] sm:$0xff] %vm120_vm0, %v5215_v48  ;;  %v4038_v13 = vpop.f32.mrb[31].mxu1  ;;  %9798 = vst [vmem:[#allocation66_spill] sm:$0xff] %v8739_v10  ;;  %v8745_v50 = vpop.eup %5645  ;;  %v3454_v1 = vsel %vm3192_vm14, %v8739_v10, 0.0 }
 0x77b   :  { %4590 = vst.msk [vmem:[%s9125_s3 + $0xe8] sm:$0xff] %vm120_vm0, %v4038_v13  ;;  %9799 = vst [vmem:[#allocation10_spill] sm:$0xff] %v8745_v50  ;;  %v8747_v5 = vpop.eup %5647  ;;  %v3451_v56 = vsel %vm3192_vm14, %v8745_v50, 0.0 }
 0x77c   :  { %9800 = vst [vmem:[#allocation15_spill] sm:$0xff] %v8747_v5  ;;  %v8753_v61 = vpop.eup %5649 }
 0x77d   :  { %3449 = vadd.xlane.f32.xlu0 %v3448_v12  ;;  %3446 = vadd.xlane.f32.xlu1 %v3445_v58  ;;  %9801 = vst [vmem:[#allocation108_spill] sm:$0xff] %v8753_v61  ;;  %v3475_v12 = vsel %vm3192_vm14, %v8753_v61, 0.0  ;;  %v3478_v58 = vsel %vm3192_vm14, %v8747_v5, 0.0 }
 0x781   :  { %3470 = vadd.xlane.f32.xlu1 %v3469_v45  ;;  %3473 = vadd.xlane.f32.xlu0 %v3472_v36 }
 0x783   :  { %v5218_v47 = vpop.f32.mrb[32].mxu1 }
 0x784   :  { %4595 = vst.msk [vmem:[%s9125_s3 + $0x110] sm:$0xff] %vm120_vm0, %v5218_v47  ;;  %v4051_v49 = vpop.f32.mrb[33].mxu1 }
 0x785   :  { %3452 = vadd.xlane.f32.xlu1 %v3451_v56  ;;  %3455 = vadd.xlane.f32.xlu0 %v3454_v1  ;;  %4593 = vst.msk [vmem:[%s9125_s3 + $0x100] sm:$0xff] %vm120_vm0, %v4051_v49  ;;  %v5219_v48 = vpop.f32.mrb[34].mxu1 }
 0x786   :  { %4596 = vst.msk [vmem:[%s9125_s3 + $0x118] sm:$0xff] %vm120_vm0, %v5219_v48  ;;  %v4054_v13 = vpop.f32.mrb[35].mxu1 }
 0x787   :  { %4594 = vst.msk [vmem:[%s9125_s3 + $0x108] sm:$0xff] %vm120_vm0, %v4054_v13 }
 0x789   :  { %3476 = vadd.xlane.f32.xlu1 %v3475_v12  ;;  %3479 = vadd.xlane.f32.xlu0 %v3478_v58  ;;  %v3339_v12 = vpop.xlane.xlu0 %3338 }
 0x78d   :  { %v3345_v58 = vpop.xlane.xlu0 %3344 }
 0x78f   :  { %v5234_v45 = vpop.f32.mrb[36].mxu1 }
 0x790   :  { %4599 = vst.msk [vmem:[%s9125_s3 + $0x130] sm:$0xff] %vm120_vm0, %v5234_v45  ;;  %v4118_v36 = vpop.f32.mrb[37].mxu1 }
 0x791   :  { %4597 = vst.msk [vmem:[%s9125_s3 + $0x120] sm:$0xff] %vm120_vm0, %v4118_v36  ;;  %v5235_v47 = vpop.f32.mrb[38].mxu1  ;;  %v3348_v45 = vpop.xlane.xlu0 %3347 }
 0x792   :  { %4600 = vst.msk [vmem:[%s9125_s3 + $0x138] sm:$0xff] %vm120_vm0, %v5235_v47  ;;  %v4121_v56 = vpop.f32.mrb[39].mxu1  ;;  %5651 = vrcp.f32 %v3348_v45 }
 0x793   :  { %4598 = vst.msk [vmem:[%s9125_s3 + $0x128] sm:$0xff] %vm120_vm0, %v4121_v56  ;;  %5653 = vrcp.f32 %v3339_v12 }
 0x794   :  { %5655 = vrcp.f32 %v3345_v58 }
 0x79b   :  { %v5238_v1 = vpop.f32.mrb[40].mxu1 }
 0x79c   :  { %4603 = vst.msk [vmem:[%s9125_s3 + $0x150] sm:$0xff] %vm120_vm0, %v5238_v1  ;;  %v4134_v49 = vpop.f32.mrb[41].mxu1  ;;  %v5652_v1 = vpop.eup %5651 }
 0x79d   :  { %4601 = vst.msk [vmem:[%s9125_s3 + $0x140] sm:$0xff] %vm120_vm0, %v4134_v49  ;;  %v5239_v48 = vpop.f32.mrb[42].mxu1  ;;  %v5654_v61 = vpop.eup %5653  ;;  %v3628_v50 = vmul.f32 %v5652_v1, %v8302_v53 }
 0x79e   :  { %4604 = vst.msk [vmem:[%s9125_s3 + $0x158] sm:$0xff] %vm120_vm0, %v5239_v48  ;;  %v4137_v13 = vpop.f32.mrb[43].mxu1  ;;  %v5656_v5 = vpop.eup %5655  ;;  %v3625_v12 = vmul.f32 %v5654_v61, %v8292_v6  ;;  %v9802_v6 = vld [vmem:[#allocation79_spill] sm:$0xff]  ;;  %v9803_v61 = vld [vmem:[#allocation78_spill] sm:$0xff] }
 0x79f   :  { %4602 = vst.msk [vmem:[%s9125_s3 + $0x148] sm:$0xff] %vm120_vm0, %v4137_v13 }
 0x7be   :  { %v3342_v36 = vpop.xlane.xlu1 %3341 }
 0x7bf   :  { %5657 = vrcp.f32 %v3342_v36  ;;  %v3627_v36 = vmul.f32 %v5656_v5, %v8296_v14 }
 0x7c1   :  { %v3698_v21 = vpack.c.bf16 %v3628_v50, %v3627_v36 }
 0x7c2   :  { %v3354_v47 = vpop.xlane.xlu0 %3353  ;;  %v3351_v56 = vpop.xlane.xlu1 %3350 }
 0x7c3   :  { %5659 = vrcp.f32 %v3354_v47 }
 0x7c4   :  { %5661 = vrcp.f32 %v3351_v56 }
 0x7c6   :  { %v3360_v49 = vpop.xlane.xlu0 %3359  ;;  %v3357_v48 = vpop.xlane.xlu1 %3356 }
 0x7c7   :  { %5663 = vrcp.f32 %v3360_v49 }
 0x7c8   :  { %5665 = vrcp.f32 %v3357_v48 }
 0x7c9   :  { %v5658_v13 = vpop.eup %5657 }
 0x7ca   :  { %v3366_v10 = vpop.xlane.xlu0 %3365  ;;  %v3363_v45 = vpop.xlane.xlu1 %3362  ;;  %v3626_v58 = vmul.f32 %v5658_v13, %v8360_v16  ;;  %v3752_v16 = vpack.c.bf16 %v9803_v61, %v9802_v6 }
 0x7cb   :  { %5667 = vrcp.f32 %v3366_v10 }
 0x7cc   :  { %5669 = vrcp.f32 %v3363_v45  ;;  %v3697_v47 = vpack.c.bf16 %v3626_v58, %v3625_v12 }
 0x7cd   :  { %v5660_v56 = vpop.eup %5659 }
 0x7ce   :  { %v5662_v18 = vpop.eup %5661  ;;  %v3372_v49 = vpop.xlane.xlu0 %3371  ;;  %5256 = vmatprep.mubr.msk.bf16.mxu1 %vm3192_vm14, %v3697_v47  ;;  %v3630_v53 = vmul.f32 %v5660_v56, %v8379_v2  ;;  %v9804_v2 = vld [vmem:[#allocation83_spill] sm:$0xff]  ;;  %v9806_v56 = vld [vmem:[#allocation89_spill] sm:$0xff] }
 0x7cf   :  { %v3369_v48 = vpop.xlane.xlu1 %3368  ;;  %5671 = vrcp.f32 %v3372_v49  ;;  %5257 = vmatmul.mubr.msk.bf16.vlgmr.msra.gmra.mrb[48].mxu1 %vm3192_vm14, %v3698_v21  ;;  %v3629_v14 = vmul.f32 %v5662_v18, %v8366_v62  ;;  %v3753_v21 = vpack.c.bf16 %v9728_v41, %v9804_v2  ;;  %v9809_v2 = vld [vmem:[#allocation96_spill] sm:$0xff] }
 0x7d0   :  { %5673 = vrcp.f32 %v3369_v48  ;;  %5269 = vmatpush3.bf16.msra.mxu1 %v8268_v32 }
 0x7d1   :  { %v5664_v10 = vpop.eup %5663  ;;  %5270 = vmatprep.subr.bf16.mxu1 %v3752_v16  ;;  %v3699_v50 = vpack.c.bf16 %v3630_v53, %v3629_v14 }
 0x7d2   :  { %v5666_v5 = vpop.eup %5665  ;;  %v3378_v1 = vpop.xlane.xlu0 %3377  ;;  %v3632_v45 = vmul.f32 %v5664_v10, %v8400_v43  ;;  %v9805_v43 = vld [vmem:[#allocation90_spill] sm:$0xff] }
 0x7d3   :  { %v3375_v13 = vpop.xlane.xlu1 %3374  ;;  %5675 = vrcp.f32 %v3378_v1  ;;  %5260 = vmatprep.mubr.msk.bf16.mxu1 %vm3192_vm14, %v3699_v50  ;;  %v3631_v12 = vmul.f32 %v5666_v5, %v8388_v55  ;;  %v3754_v49 = vpack.c.bf16 %v9806_v56, %v9805_v43 }
 0x7d4   :  { %5677 = vrcp.f32 %v3375_v13  ;;  %5271 = vmatpush3.bf16.msra.mxu1 %v3752_v16 }
 0x7d5   :  { %v5668_v62 = vpop.eup %5667  ;;  %5272 = vmatprep.subr.bf16.mxu1 %v3753_v21  ;;  %v3700_v32 = vpack.c.bf16 %v3632_v45, %v3631_v12 }
 0x7d6   :  { %v5670_v18 = vpop.eup %5669  ;;  %v3384_v58 = vpop.xlane.xlu0 %3383  ;;  %v3634_v47 = vmul.f32 %v5668_v62, %v8413_v57  ;;  %v9807_v57 = vld [vmem:[#allocation93_spill] sm:$0xff] }
 0x7d7   :  { %v3381_v36 = vpop.xlane.xlu1 %3380  ;;  %5679 = vrcp.f32 %v3384_v58  ;;  %5261 = vmatmul.mubr.msk.bf16.gmra.mrb[52].mxu1 %vm3192_vm14, %v3700_v32  ;;  %v3633_v41 = vmul.f32 %v5670_v18, %v8405_v4  ;;  %v3755_v14 = vpack.c.bf16 %v9729_v17, %v9807_v57 }
 0x7d8   :  { %5681 = vrcp.f32 %v3381_v36  ;;  %5273 = vmatpush3.bf16.msra.mxu1 %v3753_v21  ;;  %v9810_v36 = vld [vmem:[#allocation99_spill] sm:$0xff] }
 0x7d9   :  { %v5672_v55 = vpop.eup %5671  ;;  %5274 = vmatprep.subr.bf16.mxu1 %v3754_v49  ;;  %v3701_v48 = vpack.c.bf16 %v3634_v47, %v3633_v41  ;;  %v3757_v47 = vpack.c.bf16 %v9730_v59, %v9810_v36 }
 0x7da   :  { %v5674_v53 = vpop.eup %5673  ;;  %v3390_v6 = vpop.xlane.xlu0 %3389  ;;  %v3636_v16 = vmul.f32 %v5672_v55, %v8429_v26  ;;  %v9808_v26 = vld [vmem:[#allocation97_spill] sm:$0xff]  ;;  %v9812_v55 = vld [vmem:[#allocation102_spill] sm:$0xff] }
 0x7db   :  { %v3387_v61 = vpop.xlane.xlu1 %3386  ;;  %5683 = vrcp.f32 %v3390_v6  ;;  %5264 = vmatprep.mubr.msk.bf16.mxu1 %vm3192_vm14, %v3701_v48  ;;  %v3635_v10 = vmul.f32 %v5674_v53, %v8421_v9  ;;  %v3756_v21 = vpack.c.bf16 %v9809_v2, %v9808_v26 }
 0x7dc   :  { %5685 = vrcp.f32 %v3387_v61  ;;  %5275 = vmatpush3.bf16.msra.mxu1 %v3754_v49 }
 0x7dd   :  { %v5676_v4 = vpop.eup %5675  ;;  %5276 = vmatprep.subr.bf16.mxu1 %v3755_v14  ;;  %v3702_v50 = vpack.c.bf16 %v3636_v16, %v3635_v10 }
 0x7de   :  { %v5678_v5 = vpop.eup %5677  ;;  %v3396_v1 = vpop.xlane.xlu0 %3395  ;;  %v3638_v45 = vmul.f32 %v5676_v4, %v8460_v38 }
 0x7df   :  { %v3393_v13 = vpop.xlane.xlu1 %3392  ;;  %5687 = vrcp.f32 %v3396_v1  ;;  %5265 = vmatmul.mubr.msk.bf16.gmra.mrb[56].mxu1 %vm3192_vm14, %v3702_v50  ;;  %v3637_v17 = vmul.f32 %v5678_v5, %v8448_v33 }
 0x7e0   :  { %5689 = vrcp.f32 %v3393_v13  ;;  %5277 = vmatpush3.bf16.msra.mxu1 %v3755_v14 }
 0x7e1   :  { %v5680_v9 = vpop.eup %5679  ;;  %5278 = vmatprep.subr.bf16.mxu1 %v3756_v21  ;;  %v3703_v12 = vpack.c.bf16 %v3638_v45, %v3637_v17 }
 0x7e2   :  { %v5682_v62 = vpop.eup %5681  ;;  %v3640_v32 = vmul.f32 %v5680_v9, %v8476_v28  ;;  %v3402_v18 = vpop.xlane.xlu0 %3401 }
 0x7e3   :  { %v3399_v58 = vpop.xlane.xlu1 %3398  ;;  %v3639_v38 = vmul.f32 %v5682_v62, %v8468_v24  ;;  %5691 = vrcp.f32 %v3402_v18  ;;  %5280 = vmatprep.mubr.msk.bf16.mxu1 %vm3192_vm14, %v3703_v12  ;;  %v9811_v24 = vld [vmem:[#allocation103_spill] sm:$0xff] }
 0x7e4   :  { %5693 = vrcp.f32 %v3399_v58  ;;  %5279 = vmatpush3.bf16.msra.mxu1 %v3756_v21  ;;  %v3758_v48 = vpack.c.bf16 %v9812_v55, %v9811_v24 }
 0x7e5   :  { %v5684_v33 = vpop.eup %5683  ;;  %v3704_v43 = vpack.c.bf16 %v3640_v32, %v3639_v38  ;;  %5292 = vmatprep.subr.bf16.mxu1 %v3757_v47 }
 0x7e6   :  { %v5686_v56 = vpop.eup %5685  ;;  %v3408_v49 = vpop.xlane.xlu0 %3407  ;;  %v3642_v28 = vmul.f32 %v5684_v33, %v8491_v27  ;;  %v9813_v27 = vld [vmem:[#allocation105_spill] sm:$0xff] }
 0x7e7   :  { %v3405_v41 = vpop.xlane.xlu1 %3404  ;;  %5695 = vrcp.f32 %v3408_v49  ;;  %5281 = vmatmul.mubr.msk.bf16.vlgmr.msra.gmra.mrb[60].mxu1 %vm3192_vm14, %v3704_v43  ;;  %v3641_v53 = vmul.f32 %v5686_v56, %v8483_v40  ;;  %v3759_v10 = vpack.c.bf16 %v9731_v35, %v9813_v27 }
 0x7e8   :  { %5697 = vrcp.f32 %v3405_v41  ;;  %5293 = vmatpush3.bf16.msra.mxu1 %v3757_v47 }
 0x7e9   :  { %v5688_v59 = vpop.eup %5687  ;;  %5294 = vmatprep.subr.bf16.mxu1 %v3758_v48  ;;  %v3705_v6 = vpack.c.bf16 %v3642_v28, %v3641_v53 }
 0x7ea   :  { %v5690_v61 = vpop.eup %5689  ;;  %v3414_v16 = vpop.xlane.xlu0 %3413  ;;  %v3644_v14 = vmul.f32 %v5688_v59, %v8523_v34  ;;  %v9814_v34 = vld [vmem:[#allocation109_spill] sm:$0xff] }
 0x7eb   :  { %v3411_v57 = vpop.xlane.xlu1 %3410  ;;  %5699 = vrcp.f32 %v3414_v16  ;;  %5284 = vmatprep.mubr.msk.bf16.mxu1 %vm3192_vm14, %v3705_v6  ;;  %v3643_v4 = vmul.f32 %v5690_v61, %v8511_v7  ;;  %v3760_v26 = vpack.c.bf16 %v9689_v42, %v9814_v34  ;;  %v9817_v6 = vld [vmem:[#allocation91_spill] sm:$0xff] }
 0x7ec   :  { %5701 = vrcp.f32 %v3411_v57  ;;  %5295 = vmatpush3.bf16.msra.mxu1 %v3758_v48  ;;  %v9816_v48 = vld [vmem:[#allocation63_spill] sm:$0xff] }
 0x7ed   :  { %v5692_v40 = vpop.eup %5691  ;;  %5296 = vmatprep.subr.bf16.mxu1 %v3759_v10  ;;  %v3706_v50 = vpack.c.bf16 %v3644_v14, %v3643_v4  ;;  %v9818_v57 = vld [vmem:[#allocation55_spill] sm:$0xff] }
 0x7ee   :  { %v5694_v5 = vpop.eup %5693  ;;  %v3420_v1 = vpop.xlane.xlu0 %3419  ;;  %v3646_v45 = vmul.f32 %v5692_v40, %v8536_v0  ;;  %v3761_v0 = vpack.c.bf16 %v9732_v37, %v9690_v20 }
 0x7ef   :  { %v3417_v13 = vpop.xlane.xlu1 %3416  ;;  %5703 = vrcp.f32 %v3420_v1  ;;  %5285 = vmatmul.mubr.msk.bf16.gmra.mrb[64].mxu1 %vm3192_vm14, %v3706_v50  ;;  %v3645_v35 = vmul.f32 %v5694_v5, %v8528_v25  ;;  %v9820_v50 = vld [vmem:[#allocation117_spill] sm:$0xff] }
 0x7f0   :  { %5705 = vrcp.f32 %v3417_v13  ;;  %5297 = vmatpush3.bf16.msra.mxu1 %v3759_v10  ;;  %v9819_v10 = vld [vmem:[#allocation4_spill] sm:$0xff] }
 0x7f1   :  { %v5696_v7 = vpop.eup %5695  ;;  %5298 = vmatprep.subr.bf16.mxu1 %v3760_v26  ;;  %v3707_v2 = vpack.c.bf16 %v3646_v45, %v3645_v35 }
 0x7f2   :  { %v5698_v21 = vpop.eup %5697  ;;  %v3426_v17 = vpop.xlane.xlu0 %3425  ;;  %v3648_v12 = vmul.f32 %v5696_v7, %v8552_v11  ;;  %v3762_v11 = vpack.c.bf16 %v9692_v19, %v9691_v44  ;;  %v9821_v7 = vld [vmem:[#allocation122_spill] sm:$0xff] }
 0x7f3   :  { %v3423_v9 = vpop.xlane.xlu1 %3422  ;;  %5707 = vrcp.f32 %v3426_v17  ;;  %5288 = vmatprep.mubr.msk.bf16.mxu1 %vm3192_vm14, %v3707_v2  ;;  %v3647_v42 = vmul.f32 %v5698_v21, %v8544_v52 }
 0x7f4   :  { %5709 = vrcp.f32 %v3423_v9  ;;  %5299 = vmatpush3.bf16.msra.mxu1 %v3760_v26 }
 0x7f5   :  { %v5700_v25 = vpop.eup %5699  ;;  %5300 = vmatprep.subr.bf16.mxu1 %v3761_v0  ;;  %v3708_v62 = vpack.c.bf16 %v3648_v12, %v3647_v42  ;;  %v9822_v12 = vld [vmem:[#allocation67_spill] sm:$0xff]  ;;  %v9823_v42 = vld [vmem:[#allocation126_spill] sm:$0xff] }
 0x7f6   :  { %v5702_v32 = vpop.eup %5701  ;;  %v3432_v18 = vpop.xlane.xlu0 %3431  ;;  %v3650_v38 = vmul.f32 %v5700_v25, %v8583_v8 }
 0x7f7   :  { %v3429_v58 = vpop.xlane.xlu1 %3428  ;;  %5711 = vrcp.f32 %v3432_v18  ;;  %5289 = vmatmul.mubr.msk.bf16.gmra.mrb[68].mxu1 %vm3192_vm14, %v3708_v62  ;;  %v3649_v20 = vmul.f32 %v5702_v32, %v8571_v15 }
 0x7f8   :  { %5713 = vrcp.f32 %v3429_v58  ;;  %5301 = vmatpush3.bf16.msra.mxu1 %v3761_v0 }
 0x7f9   :  { %v5704_v37 = vpop.eup %5703  ;;  %5302 = vmatprep.subr.bf16.mxu1 %v3762_v11  ;;  %v3709_v52 = vpack.c.bf16 %v3650_v38, %v3649_v20 }
 0x7fa   :  { %v5706_v36 = vpop.eup %5705  ;;  %v3652_v47 = vmul.f32 %v5704_v37, %v8599_v22  ;;  %v3438_v33 = vpop.xlane.xlu0 %3437 }
 0x7fb   :  { %v3435_v43 = vpop.xlane.xlu1 %3434  ;;  %v3651_v8 = vmul.f32 %v5706_v36, %v8591_v29  ;;  %5715 = vrcp.f32 %v3438_v33  ;;  %5304 = vmatprep.mubr.msk.bf16.mxu1 %vm3192_vm14, %v3709_v52  ;;  %v5242_v56 = vpop.f32.mrb[44].mxu1  ;;  %v9815_v29 = vld [vmem:[#allocation84_spill] sm:$0xff] }
 0x7fc   :  { %5717 = vrcp.f32 %v3435_v43  ;;  %4607 = vst.msk [vmem:[%s9125_s3 + $0x170] sm:$0xff] %vm120_vm0, %v5242_v56  ;;  %5303 = vmatpush3.bf16.msra.mxu1 %v3762_v11  ;;  %v4150_v44 = vpop.f32.mrb[45].mxu1  ;;  %v9824_v11 = vld [vmem:[#allocation129_spill] sm:$0xff] }
 0x7fd   :  { %v5708_v19 = vpop.eup %5707  ;;  %v3710_v15 = vpack.c.bf16 %v3652_v47, %v3651_v8  ;;  %4605 = vst.msk [vmem:[%s9125_s3 + $0x160] sm:$0xff] %vm120_vm0, %v4150_v44  ;;  %5344 = vmatprep.subr.bf16.mxu1 %v9815_v29  ;;  %v5243_v22 = vpop.f32.mrb[46].mxu1 }
 0x7fe   :  { %v5710_v49 = vpop.eup %5709  ;;  %4608 = vst.msk [vmem:[%s9125_s3 + $0x178] sm:$0xff] %vm120_vm0, %v5243_v22  ;;  %v4153_v41 = vpop.f32.mrb[47].mxu1  ;;  %v3654_v24 = vmul.f32 %v5708_v19, %v8612_v3 }
 0x7ff   :  { %v3444_v28 = vpop.xlane.xlu0 %3443  ;;  %4606 = vst.msk [vmem:[%s9125_s3 + $0x168] sm:$0xff] %vm120_vm0, %v4153_v41  ;;  %v3441_v55 = vpop.xlane.xlu1 %3440  ;;  %5305 = vmatmul.mubr.msk.bf16.vlgmr.msra.gmra.mrb[72].mxu1 %vm3192_vm14, %v3710_v15  ;;  %v3653_v53 = vmul.f32 %v5710_v49, %v9816_v48  ;;  %v9826_v49 = vld [vmem:[#allocation50_spill] sm:$0xff] }
 0x800   :  { %5719 = vrcp.f32 %v3444_v28  ;;  %5350 = vmatpush3.bf16.msra.mxu1 %v9815_v29  ;;  %v9825_v29 = vld [vmem:[#allocation6_spill] sm:$0xff] }
 0x801   :  { %5721 = vrcp.f32 %v3441_v55  ;;  %v5712_v59 = vpop.eup %5711  ;;  %5345 = vmatprep.subr.bf16.mxu1 %v9817_v6  ;;  %v3711_v61 = vpack.c.bf16 %v3654_v24, %v3653_v53  ;;  %v9828_v53 = vld [vmem:[#allocation10_spill] sm:$0xff] }
 0x802   :  { %v5714_v16 = vpop.eup %5713  ;;  %v3656_v14 = vmul.f32 %v5712_v59, %v9818_v57  ;;  %v9830_v57 = vld [vmem:[#allocation108_spill] sm:$0xff] }
 0x803   :  { %v3462_v3 = vpop.xlane.xlu0 %3461  ;;  %5308 = vmatprep.mubr.msk.bf16.mxu1 %vm3192_vm14, %v3711_v61  ;;  %v3459_v27 = vpop.xlane.xlu1 %3458  ;;  %v3655_v4 = vmul.f32 %v5714_v16, %v9819_v10  ;;  %v9829_v16 = vld [vmem:[#allocation15_spill] sm:$0xff] }
 0x804   :  { %5723 = vrcp.f32 %v3462_v3  ;;  %5351 = vmatpush3.bf16.msra.mxu1 %v9817_v6 }
 0x805   :  { %5725 = vrcp.f32 %v3459_v27  ;;  %v5716_v40 = vpop.eup %5715  ;;  %5346 = vmatprep.subr.bf16.mxu1 %v9820_v50  ;;  %v3712_v5 = vpack.c.bf16 %v3656_v14, %v3655_v4 }
 0x806   :  { %v5718_v1 = vpop.eup %5717  ;;  %v3658_v45 = vmul.f32 %v5716_v40, %v8655_v54 }
 0x807   :  { %v3468_v13 = vpop.xlane.xlu0 %3467  ;;  %v3465_v34 = vpop.xlane.xlu1 %3464  ;;  %5309 = vmatmul.mubr.msk.bf16.gmra.mrb[76].mxu1 %vm3192_vm14, %v3712_v5  ;;  %v3657_v26 = vmul.f32 %v5718_v1, %v8647_v39 }
 0x808   :  { %5727 = vrcp.f32 %v3468_v13  ;;  %5352 = vmatpush3.bf16.msra.mxu1 %v9820_v50 }
 0x809   :  { %5729 = vrcp.f32 %v3465_v34  ;;  %5347 = vmatprep.subr.bf16.mxu1 %v9821_v7  ;;  %v3713_v2 = vpack.c.bf16 %v3658_v45, %v3657_v26 }
 0x80a   :  { %v5720_v35 = vpop.eup %5719 }
 0x80b   :  { %v5722_v21 = vpop.eup %5721  ;;  %v3450_v17 = vpop.xlane.xlu0 %3449  ;;  %v3660_v9 = vmul.f32 %v5720_v35, %v8667_v51  ;;  %5312 = vmatprep.mubr.msk.bf16.mxu1 %vm3192_vm14, %v3713_v2 }
 0x80c   :  { %5731 = vrcp.f32 %v3450_v17  ;;  %v3447_v54 = vpop.xlane.xlu1 %3446  ;;  %v3659_v0 = vmul.f32 %v5722_v21, %v9822_v12  ;;  %5353 = vmatpush3.bf16.msra.mxu1 %v9821_v7 }
 0x80d   :  { %5733 = vrcp.f32 %v3447_v54  ;;  %5348 = vmatprep.subr.bf16.mxu1 %v9823_v42 }
 0x80e   :  { %v5724_v39 = vpop.eup %5723  ;;  %v3714_v25 = vpack.c.bf16 %v3660_v9, %v3659_v0 }
 0x80f   :  { %v5726_v62 = vpop.eup %5725  ;;  %v3474_v32 = vpop.xlane.xlu0 %3473  ;;  %v3666_v18 = vmul.f32 %v5724_v39, %v8695_v30 }
 0x810   :  { %5735 = vrcp.f32 %v3474_v32  ;;  %v3471_v58 = vpop.xlane.xlu1 %3470  ;;  %5313 = vmatmul.mubr.msk.bf16.gmra.mrb[80].mxu1 %vm3192_vm14, %v3714_v25  ;;  %v3665_v51 = vmul.f32 %v5726_v62, %v8683_v23 }
 0x811   :  { %5737 = vrcp.f32 %v3471_v58  ;;  %5354 = vmatpush3.bf16.msra.mxu1 %v9823_v42 }
 0x812   :  { %v5728_v38 = vpop.eup %5727  ;;  %5349 = vmatprep.subr.bf16.mxu1 %v9824_v11  ;;  %v3717_v20 = vpack.c.bf16 %v3666_v18, %v3665_v51 }
 0x813   :  { %v5730_v37 = vpop.eup %5729  ;;  %v3668_v52 = vmul.f32 %v5728_v38, %v8705_v46  ;;  %v3456_v36 = vpop.xlane.xlu0 %3455 }
 0x814   :  { %v3667_v47 = vmul.f32 %v5730_v37, %v8699_v31  ;;  %5739 = vrcp.f32 %v3456_v36  ;;  %5332 = vmatprep.mubr.msk.bf16.mxu1 %vm3192_vm14, %v3717_v20  ;;  %v3453_v30 = vpop.xlane.xlu1 %3452 }
 0x815   :  { %5741 = vrcp.f32 %v3453_v30  ;;  %5355 = vmatpush3.bf16.msra.mxu1 %v9824_v11 }
 0x816   :  { %v5732_v23 = vpop.eup %5731  ;;  %v3718_v33 = vpack.c.bf16 %v3668_v52, %v3667_v47 }
 0x817   :  { %v5734_v43 = vpop.eup %5733  ;;  %v3480_v8 = vpop.xlane.xlu0 %3479  ;;  %v3662_v56 = vmul.f32 %v5732_v23, %v8713_v60  ;;  %v9827_v60 = vld [vmem:[#allocation66_spill] sm:$0xff] }
 0x818   :  { %5743 = vrcp.f32 %v3480_v8  ;;  %v3477_v44 = vpop.xlane.xlu1 %3476  ;;  %5333 = vmatmul.mubr.msk.bf16.vlgmr.msra.gmra.mrb[84].mxu1 %vm3192_vm14, %v3718_v33  ;;  %v3661_v46 = vmul.f32 %v5734_v43, %v8707_v63 }
 0x819   :  { %5745 = vrcp.f32 %v3477_v44 }
 0x81a   :  { %v5736_v31 = vpop.eup %5735  ;;  %v3715_v19 = vpack.c.bf16 %v3662_v56, %v3661_v46 }
 0x81b   :  { %v5738_v15 = vpop.eup %5737  ;;  %v3670_v22 = vmul.f32 %v5736_v31, %v9825_v29 }
 0x81c   :  { %5328 = vmatprep.mubr.msk.bf16.mxu0 %vm3192_vm14, %v3715_v19  ;;  %v3669_v41 = vmul.f32 %v5738_v15, %v9826_v49 }
 0x81e   :  { %v5740_v28 = vpop.eup %5739  ;;  %v3719_v24 = vpack.c.bf16 %v3670_v22, %v3669_v41 }
 0x81f   :  { %v5742_v55 = vpop.eup %5741  ;;  %v3664_v48 = vmul.f32 %v5740_v28, %v9827_v60 }
 0x820   :  { %v3663_v59 = vmul.f32 %v5742_v55, %v9828_v53  ;;  %5336 = vmatprep.mubr.msk.bf16.mxu1 %vm3192_vm14, %v3719_v24 }
 0x822   :  { %v5744_v63 = vpop.eup %5743  ;;  %v3716_v6 = vpack.c.bf16 %v3664_v48, %v3663_v59 }
 0x823   :  { %v5746_v61 = vpop.eup %5745  ;;  %v3672_v3 = vmul.f32 %v5744_v63, %v9829_v16 }
 0x824   :  { %5329 = vmatmul.mubr.msk.bf16.vlgmr.msra.gmra.mrb[96].mxu0 %vm3192_vm14, %v3716_v6  ;;  %v3671_v14 = vmul.f32 %v5746_v61, %v9830_v57 }
 0x826   :  { %v3720_v27 = vpack.c.bf16 %v3672_v3, %v3671_v14 }
 0x828   :  { %5337 = vmatmul.mubr.msk.bf16.gmra.mrb[88].mxu1 %vm3192_vm14, %v3720_v27 }
 0x8a2   :  { %v5258_v10 = vpop.f32.mrb[48].mxu1 }
 0x8a3   :  { %4611 = vst.msk [vmem:[%s9125_s3 + $0x190] sm:$0xff] %vm120_vm0, %v5258_v10  ;;  %v4217_v4 = vpop.f32.mrb[49].mxu1 }
 0x8a4   :  { %4609 = vst.msk [vmem:[%s9125_s3 + $0x180] sm:$0xff] %vm120_vm0, %v4217_v4  ;;  %v5259_v40 = vpop.f32.mrb[50].mxu1 }
 0x8a5   :  { %4612 = vst.msk [vmem:[%s9125_s3 + $0x198] sm:$0xff] %vm120_vm0, %v5259_v40  ;;  %v4220_v50 = vpop.f32.mrb[51].mxu1 }
 0x8a6   :  { %4610 = vst.msk [vmem:[%s9125_s3 + $0x188] sm:$0xff] %vm120_vm0, %v4220_v50 }
 0x8aa   :  { %v5262_v5 = vpop.f32.mrb[52].mxu1 }
 0x8ab   :  { %4615 = vst.msk [vmem:[%s9125_s3 + $0x1b0] sm:$0xff] %vm120_vm0, %v5262_v5  ;;  %v4233_v1 = vpop.f32.mrb[53].mxu1 }
 0x8ac   :  { %4613 = vst.msk [vmem:[%s9125_s3 + $0x1a0] sm:$0xff] %vm120_vm0, %v4233_v1  ;;  %v5263_v13 = vpop.f32.mrb[54].mxu1 }
 0x8ad   :  { %4616 = vst.msk [vmem:[%s9125_s3 + $0x1b8] sm:$0xff] %vm120_vm0, %v5263_v13  ;;  %v4236_v45 = vpop.f32.mrb[55].mxu1 }
 0x8ae   :  { %4614 = vst.msk [vmem:[%s9125_s3 + $0x1a8] sm:$0xff] %vm120_vm0, %v4236_v45 }
 0x8b2   :  { %v5266_v34 = vpop.f32.mrb[56].mxu1 }
 0x8b3   :  { %4619 = vst.msk [vmem:[%s9125_s3 + $0x1d0] sm:$0xff] %vm120_vm0, %v5266_v34  ;;  %v4249_v26 = vpop.f32.mrb[57].mxu1 }
 0x8b4   :  { %4617 = vst.msk [vmem:[%s9125_s3 + $0x1c0] sm:$0xff] %vm120_vm0, %v4249_v26  ;;  %v5267_v35 = vpop.f32.mrb[58].mxu1 }
 0x8b5   :  { %4620 = vst.msk [vmem:[%s9125_s3 + $0x1d8] sm:$0xff] %vm120_vm0, %v5267_v35  ;;  %v4252_v7 = vpop.f32.mrb[59].mxu1 }
 0x8b6   :  { %4618 = vst.msk [vmem:[%s9125_s3 + $0x1c8] sm:$0xff] %vm120_vm0, %v4252_v7 }
 0x8ba   :  { %v5282_v2 = vpop.f32.mrb[60].mxu1 }
 0x8bb   :  { %4623 = vst.msk [vmem:[%s9125_s3 + $0x1f0] sm:$0xff] %vm120_vm0, %v5282_v2  ;;  %v4316_v21 = vpop.f32.mrb[61].mxu1 }
 0x8bc   :  { %4621 = vst.msk [vmem:[%s9125_s3 + $0x1e0] sm:$0xff] %vm120_vm0, %v4316_v21  ;;  %v5283_v17 = vpop.f32.mrb[62].mxu1 }
 0x8bd   :  { %4624 = vst.msk [vmem:[%s9125_s3 + $0x1f8] sm:$0xff] %vm120_vm0, %v5283_v17  ;;  %v4319_v9 = vpop.f32.mrb[63].mxu1 }
 0x8be   :  { %4622 = vst.msk [vmem:[%s9125_s3 + $0x1e8] sm:$0xff] %vm120_vm0, %v4319_v9 }
 0x8c2   :  { %v5286_v54 = vpop.f32.mrb[64].mxu1 }
 0x8c3   :  { %4627 = vst.msk [vmem:[%s9125_s3 + $0x210] sm:$0xff] %vm120_vm0, %v5286_v54  ;;  %v4332_v12 = vpop.f32.mrb[65].mxu1 }
 0x8c4   :  { %4625 = vst.msk [vmem:[%s9125_s3 + $0x200] sm:$0xff] %vm120_vm0, %v4332_v12  ;;  %v5287_v0 = vpop.f32.mrb[66].mxu1 }
 0x8c5   :  { %4628 = vst.msk [vmem:[%s9125_s3 + $0x218] sm:$0xff] %vm120_vm0, %v5287_v0  ;;  %v4335_v39 = vpop.f32.mrb[67].mxu1 }
 0x8c6   :  { %4626 = vst.msk [vmem:[%s9125_s3 + $0x208] sm:$0xff] %vm120_vm0, %v4335_v39 }
 0x8ca   :  { %v5290_v42 = vpop.f32.mrb[68].mxu1 }
 0x8cb   :  { %4631 = vst.msk [vmem:[%s9125_s3 + $0x230] sm:$0xff] %vm120_vm0, %v5290_v42  ;;  %v4348_v25 = vpop.f32.mrb[69].mxu1 }
 0x8cc   :  { %4629 = vst.msk [vmem:[%s9125_s3 + $0x220] sm:$0xff] %vm120_vm0, %v4348_v25  ;;  %v5291_v62 = vpop.f32.mrb[70].mxu1 }
 0x8cd   :  { %4632 = vst.msk [vmem:[%s9125_s3 + $0x238] sm:$0xff] %vm120_vm0, %v5291_v62  ;;  %v4351_v32 = vpop.f32.mrb[71].mxu1 }
 0x8ce   :  { %4630 = vst.msk [vmem:[%s9125_s3 + $0x228] sm:$0xff] %vm120_vm0, %v4351_v32 }
 0x8d2   :  { %v5306_v18 = vpop.f32.mrb[72].mxu1 }
 0x8d3   :  { %4635 = vst.msk [vmem:[%s9125_s3 + $0x250] sm:$0xff] %vm120_vm0, %v5306_v18  ;;  %v4415_v58 = vpop.f32.mrb[73].mxu1 }
 0x8d4   :  { %4633 = vst.msk [vmem:[%s9125_s3 + $0x240] sm:$0xff] %vm120_vm0, %v4415_v58  ;;  %v5307_v51 = vpop.f32.mrb[74].mxu1 }
 0x8d5   :  { %4636 = vst.msk [vmem:[%s9125_s3 + $0x258] sm:$0xff] %vm120_vm0, %v5307_v51  ;;  %v4418_v38 = vpop.f32.mrb[75].mxu1 }
 0x8d6   :  { %4634 = vst.msk [vmem:[%s9125_s3 + $0x248] sm:$0xff] %vm120_vm0, %v4418_v38 }
 0x8da   :  { %v5310_v11 = vpop.f32.mrb[76].mxu1 }
 0x8db   :  { %4639 = vst.msk [vmem:[%s9125_s3 + $0x270] sm:$0xff] %vm120_vm0, %v5310_v11  ;;  %v4431_v20 = vpop.f32.mrb[77].mxu1 }
 0x8dc   :  { %4637 = vst.msk [vmem:[%s9125_s3 + $0x260] sm:$0xff] %vm120_vm0, %v4431_v20  ;;  %v5311_v37 = vpop.f32.mrb[78].mxu1 }
 0x8dd   :  { %4640 = vst.msk [vmem:[%s9125_s3 + $0x278] sm:$0xff] %vm120_vm0, %v5311_v37  ;;  %v4434_v52 = vpop.f32.mrb[79].mxu1 }
 0x8de   :  { %4638 = vst.msk [vmem:[%s9125_s3 + $0x268] sm:$0xff] %vm120_vm0, %v4434_v52 }
 0x8e3   :  { %v5314_v36 = vpop.f32.mrb[80].mxu1 }
 0x8e4   :  { %4643 = vst.msk [vmem:[%s9125_s3 + $0x290] sm:$0xff] %vm120_vm0, %v5314_v36  ;;  %v4447_v47 = vpop.f32.mrb[81].mxu1 }
 0x8e5   :  { %4641 = vst.msk [vmem:[%s9125_s3 + $0x280] sm:$0xff] %vm120_vm0, %v4447_v47  ;;  %v5315_v30 = vpop.f32.mrb[82].mxu1 }
 0x8e6   :  { %4644 = vst.msk [vmem:[%s9125_s3 + $0x298] sm:$0xff] %vm120_vm0, %v5315_v30  ;;  %v4450_v23 = vpop.f32.mrb[83].mxu1 }
 0x8e7   :  { %4642 = vst.msk [vmem:[%s9125_s3 + $0x288] sm:$0xff] %vm120_vm0, %v4450_v23 }
 0x8eb   :  { %v5334_v33 = vpop.f32.mrb[84].mxu1 }
 0x8ec   :  { %4651 = vst.msk [vmem:[%s9125_s3 + $0x2d0] sm:$0xff] %vm120_vm0, %v5334_v33  ;;  %v4530_v43 = vpop.f32.mrb[85].mxu1 }
 0x8ed   :  { %4649 = vst.msk [vmem:[%s9125_s3 + $0x2c0] sm:$0xff] %vm120_vm0, %v4530_v43  ;;  %v5335_v8 = vpop.f32.mrb[86].mxu1 }
 0x8ee   :  { %4652 = vst.msk [vmem:[%s9125_s3 + $0x2d8] sm:$0xff] %vm120_vm0, %v5335_v8  ;;  %v4533_v56 = vpop.f32.mrb[87].mxu1 }
 0x8ef   :  { %4650 = vst.msk [vmem:[%s9125_s3 + $0x2c8] sm:$0xff] %vm120_vm0, %v4533_v56 }
 0x8f7   :  { %v5330_v44 = vpop.f32.mrb[96].mxu0 }
 0x8f8   :  { %4647 = vst.msk [vmem:[%s9125_s3 + $0x2b0] sm:$0xff] %vm120_vm0, %v5330_v44  ;;  %v4514_v46 = vpop.f32.mrb[97].mxu0 }
 0x8f9   :  { %4645 = vst.msk [vmem:[%s9125_s3 + $0x2a0] sm:$0xff] %vm120_vm0, %v4514_v46  ;;  %v5331_v31 = vpop.f32.mrb[98].mxu0 }
 0x8fa   :  { %4648 = vst.msk [vmem:[%s9125_s3 + $0x2b8] sm:$0xff] %vm120_vm0, %v5331_v31  ;;  %v4517_v19 = vpop.f32.mrb[99].mxu0 }
 0x8fb   :  { %4646 = vst.msk [vmem:[%s9125_s3 + $0x2a8] sm:$0xff] %vm120_vm0, %v4517_v19  ;;  %v5338_v15 = vpop.f32.mrb[88].mxu1 }
 0x8fc   :  { %4655 = vst.msk [vmem:[%s9125_s3 + $0x2f0] sm:$0xff] %vm120_vm0, %v5338_v15  ;;  %v4546_v29 = vpop.f32.mrb[89].mxu1 }
 0x8fd   :  { %4653 = vst.msk [vmem:[%s9125_s3 + $0x2e0] sm:$0xff] %vm120_vm0, %v4546_v29  ;;  %v5339_v22 = vpop.f32.mrb[90].mxu1 }
 0x8fe   :  { %4656 = vst.msk [vmem:[%s9125_s3 + $0x2f8] sm:$0xff] %vm120_vm0, %v5339_v22  ;;  %v4549_v49 = vpop.f32.mrb[91].mxu1 }
 0x8ff   :  { %4654 = vst.msk [vmem:[%s9125_s3 + $0x2e8] sm:$0xff] %vm120_vm0, %v4549_v49 }

</bundles_post_ra>
